<compile_context>
chip_gen: v6e
topology: v6e:2x2x1
jax: 0.10.0
libtpu: 0.0.40
codegen_flags: <defaults>
</compile_context>

<pallas_src>
import math

import jax
import jax.numpy as jnp
from jax.experimental import pallas as pl
from jax.experimental.pallas import tpu as pltpu

LN_EPS = 1e-5
_INV_SQRT2 = 0.7071067811865476


def _erf(x):
    # Abramowitz & Stegun 7.1.26, max abs error ~1.5e-7. Only uses ops guaranteed to
    # lower in Mosaic (abs / exp / div / select).
    p = 0.3275911
    a1, a2, a3, a4, a5 = (0.254829592, -0.284496736, 1.421413741,
                          -1.453152027, 1.061405429)
    ax = jnp.abs(x)
    t = 1.0 / (1.0 + p * ax)
    poly = ((((a5 * t + a4) * t + a3) * t + a2) * t + a1) * t
    y = 1.0 - poly * jnp.exp(-ax * ax)
    return jnp.where(x >= 0, y, -y)


def _gelu(x):
    # torch.nn.GELU() default = exact erf-based GELU
    return 0.5 * x * (1.0 + _erf(x * _INV_SQRT2))


def _layernorm(x, g, b):
    mu = jnp.mean(x, axis=-1, keepdims=True)
    var = jnp.mean(jnp.square(x - mu), axis=-1, keepdims=True)
    return (x - mu) * jax.lax.rsqrt(var + LN_EPS) * g + b


# --------------------------- fused Pallas kernel -----------------------------

def fused_transformer_kernel(
        x_ref,                       # (1, L, D)        activations, one batch element
        sh_ref,                      # (2, L, L)        causal shift-by-1 / shift-by-2
        win_ref,                     # (depth, 3, D, D) in_proj split per group, bf16
        bin_ref,                     # (depth, 3, 1, D)
        wsf_ref,                     # (depth, 3, 3, D) depthwise taps [group, tap, chan]
        bsf_ref,                     # (depth, 3, 1, D)
        kst_ref,                     # (depth, L, L, D) kst[l,s,t,d] = k[t-s,d]*(t>=s)
        bk_ref,                      # (depth, 1, D)    HyenaFilter bias (skip term)
        wout_ref,                    # (depth, D, D)    bf16
        bout_ref,                    # (depth, 1, D)
        lng_ref, lnb_ref,            # (depth, 1, D)    FFN LayerNorm
        w1_ref, b1_ref,              # (depth, D, H) bf16 / (depth, 1, H)
        w2_ref, b2_ref,              # (depth, H, D) bf16 / (depth, 1, D)
        ng_ref, nb_ref,              # (1, D)           final LayerNorm
        o_ref):                      # (1, L, D)
    x = x_ref[0].astype(jnp.float32)                   # (L, D)
    L = x.shape[0]
    depth = win_ref.shape[0]

    s1 = sh_ref[0]                                     # (S1 @ p)[t] = p[t-1], row 0 = 0
    s2 = sh_ref[1]                                     # (S2 @ p)[t] = p[t-2]

    for l in range(depth):                             # depth is small & static
        # ---------------- HyenaOperator (order=2) + residual -----------------
        xb = x.astype(jnp.bfloat16)                    # MXU operands bf16, f32 accum

        def proj_short(g):
            # in_proj column group g, then depthwise causal 3-tap conv
            # (Conv1d k=3, padding=2, groups=C, truncated to L):
            #   q[t] = w0*p[t-2] + w1*p[t-1] + w2*p[t] + b   with p[<0] = 0
            p = jnp.dot(xb, win_ref[l, g],
                        preferred_element_type=jnp.float32) + bin_ref[l, g]
            p1 = jnp.dot(s1, p, preferred_element_type=jnp.float32)
            p2 = jnp.dot(s2, p, preferred_element_type=jnp.float32)
            w = wsf_ref[l, g]                          # (3, D), tap-major
            return w[0:1] * p2 + w[1:2] * p1 + w[2:3] * p + bsf_ref[l, g]

        x0 = proj_short(0)
        x1 = proj_short(1)
        v = proj_short(2) * x1                         # gate (dropout = identity)

        # long causal depthwise conv (== zero-padded fftconv truncated to L):
        #   y[t, d] = sum_{s<=t} k[t-s, d] * v[s, d]
        kl = kst_ref[l]                                # (L, L, D), pre-masked
        y = kl[0] * v[0:1, :]
        for s in range(1, L):
            y = y + kl[s] * v[s:s + 1, :]
        # TODO(synk): chunk this O(L^2) FMA accumulation over L-tiles (streamed filter)
        #             before scaling l_max up, especially for v7x's 64 MiB VMEM.

        y = _gelu(y + v * bk_ref[l])                   # fftconv bias skip, then GELU
        y = y * x0                                     # final gate
        out = jnp.dot(y.astype(jnp.bfloat16), wout_ref[l],
                      preferred_element_type=jnp.float32) + bout_ref[l]
        x = out + x                                    # residual

        # ---------------- FeedForward + residual -----------------------------
        xn = _layernorm(x, lng_ref[l], lnb_ref[l])
        h = jnp.dot(xn.astype(jnp.bfloat16), w1_ref[l],
                    preferred_element_type=jnp.float32) + b1_ref[l]
        h = _gelu(h)
        y2 = jnp.dot(h.astype(jnp.bfloat16), w2_ref[l],
                     preferred_element_type=jnp.float32) + b2_ref[l]
        x = y2 + x                                     # residual

    # ---------------------- final LayerNorm ----------------------------------
    o_ref[0] = _layernorm(x, ng_ref[...], nb_ref[...]).astype(o_ref.dtype)


# --------------------------- pallas_call wrapper ------------------------------

_CONST_NAMES = ('shifts', 'win', 'bin', 'wsf', 'bsf', 'kst', 'bk', 'wout', 'bout',
                'ln_g', 'ln_b', 'w1', 'b1', 'w2', 'b2', 'norm_g', 'norm_b')


def transformer_forward(x, params):
    B, L, D = x.shape
    consts = tuple(params[n] for n in _CONST_NAMES)

    def full_spec(a):
        nd = a.ndim
        return pl.BlockSpec(a.shape, lambda b, _nd=nd: (0,) * _nd)

    return pl.pallas_call(
        fused_transformer_kernel,
        out_shape=jax.ShapeDtypeStruct((B, L, D), x.dtype),
        grid=(B,),
        in_specs=[pl.BlockSpec((1, L, D), lambda b: (b, 0, 0))]
                 + [full_spec(a) for a in consts],
        out_specs=pl.BlockSpec((1, L, D), lambda b: (b, 0, 0)),
        compiler_params=pltpu.CompilerParams(dimension_semantics=("parallel",)),
    )(x, *consts)


# --------------------------- parameter setup (plain JAX glue) ----------------

def compute_hyena_filter(L, D, fp):
    """HyenaFilter.filter(L): positional emb -> implicit MLP -> exp modulation."""
    t = jnp.linspace(0.0, 1.0, L)[:, None]                       # (L, 1)
    t_resc = jnp.linspace(0.0, float(L - 1), L)[:, None]         # (L, 1)
    w = 2.0 * jnp.pi * t_resc / L
    f = jnp.linspace(1e-4, 0.0, 1)[None, :]                      # bands = 1
    z = jnp.concatenate([t, jnp.cos(f * w), -jnp.sin(f * w)], axis=-1)   # (L, 3)

    h = jnp.sin(fp['freq'] * (z @ fp['fw0'] + fp['fb0']))
    h = jnp.sin(fp['freq'] * (h @ fp['fw1'] + fp['fb1']))
    h = jnp.sin(fp['freq'] * (h @ fp['fw2'] + fp['fb2']))
    h = h @ fp['fwout']                                          # (L, D)

    max_decay = math.log(1e-2) / 0.3
    min_decay = math.log(1e-2) / 1.5
    deltas = jnp.linspace(min_decay, max_decay, D)[None, :]
    decay = jnp.exp(-t * jnp.abs(deltas))
    return (h * decay).astype(jnp.float32)


def init_params(key, dim, depth, mlp_dim, filter_order, l_max):
    D, H, FO, L = dim, mlp_dim, filter_order, l_max

    def lin(k, fan_in, shape):
        return jax.random.normal(k, shape, jnp.float32) / jnp.sqrt(float(fan_in))

    # shifted-filter stack index helpers: diff[s, t] = t - s
    diff = jnp.arange(L)[None, :] - jnp.arange(L)[:, None]
    causal = (diff >= 0)

    layers = []
    for _ in range(depth):
        keys = jax.random.split(key, 20)
        key = keys[-1]

        fp = dict(
            fw0=lin(keys[7], 3, (3, FO)), fb0=lin(keys[8], 3, (1, FO)),
            fw1=lin(keys[9], FO, (FO, FO)), fb1=lin(keys[10], FO, (1, FO)),
            fw2=lin(keys[11], FO, (FO, FO)), fb2=lin(keys[12], FO, (1, FO)),
            fwout=lin(keys[13], FO, (FO, D)),
            freq=jnp.ones((1, FO), jnp.float32),                 # Sin(w=1)
        )
        k_filt = compute_hyena_filter(L, D, fp)                  # (L, D), param-only
        # kst[s, t, d] = k[t - s, d] if t >= s else 0  (pre-masked shifted filter)
        kst = jnp.where(causal[:, :, None],
                        k_filt[jnp.clip(diff, 0, L - 1)], 0.0)   # (L, L, D)

        win = lin(keys[0], D, (D, 3 * D))
        bin_ = lin(keys[1], D, (3 * D,))
        wsf = lin(keys[2], 3, (3 * D, 3))                        # conv weight (C, taps)
        bsf = lin(keys[3], 3, (3 * D,))

        layers.append(dict(
            win=jnp.stack([win[:, g * D:(g + 1) * D] for g in range(3)]
                          ).astype(jnp.bfloat16),                # (3, D, D)
            bin=jnp.stack([bin_[g * D:(g + 1) * D][None, :] for g in range(3)]),
            wsf=jnp.stack([wsf[g * D:(g + 1) * D, :].T for g in range(3)]),  # (3,3,D)
            bsf=jnp.stack([bsf[g * D:(g + 1) * D][None, :] for g in range(3)]),
            kst=kst,
            bk=jax.random.normal(keys[4], (1, D), jnp.float32),  # HyenaFilter.bias
            wout=lin(keys[5], D, (D, D)).astype(jnp.bfloat16),
            bout=lin(keys[6], D, (1, D)),
            ln_g=jnp.ones((1, D), jnp.float32), ln_b=jnp.zeros((1, D), jnp.float32),
            w1=lin(keys[14], D, (D, H)).astype(jnp.bfloat16), b1=lin(keys[15], D, (1, H)),
            w2=lin(keys[16], H, (H, D)).astype(jnp.bfloat16), b2=lin(keys[17], H, (1, D)),
        ))

    stacked = {name: jnp.stack([lyr[name] for lyr in layers]) for name in layers[0]}
    stacked['norm_g'] = jnp.ones((1, dim), jnp.float32)
    stacked['norm_b'] = jnp.zeros((1, dim), jnp.float32)
    # causal shift matrices: (S1 @ p)[t] = p[t-1] (row 0 zero), (S2 @ p)[t] = p[t-2]
    stacked['shifts'] = jnp.stack([jnp.eye(L, k=-1, dtype=jnp.float32),
                                   jnp.eye(L, k=-2, dtype=jnp.float32)])
    return stacked


# --------------------------- main --------------------------------------------

if __name__ == "__main__":
    # Transformer(dim=32, depth=2, heads=4, dim_head=8, mlp_dim=64,
    #             l_max=16, filter_order=16, dropout=0.0, filter_dropout=0.0)
    # (heads / dim_head are unused by the Hyena token mixer.)
    B, L, D = 2, 16, 32
    depth, mlp_dim, filter_order = 2, 64, 16

    key = jax.random.PRNGKey(0)
    kx, kp = jax.random.split(key)
    x = jax.random.normal(kx, (B, L, D), jnp.float32)
    params = init_params(kp, D, depth, mlp_dim, filter_order, L)

    fwd = jax.jit(transformer_forward)
    out = jax.block_until_ready(fwd(x, params))

    assert out.shape == (B, L, D)
    assert bool(jnp.all(jnp.isfinite(out)))
    print("KERNEL_OK")
</pallas_src>

<mosaic_0001>
module attributes {stable_mosaic.version = 11 : i64} {
  func.func @fused_transformer_kernel(%arg0: i32, %arg1: memref<1x16x32xf32, #tpu.memory_space<vmem>>, %arg2: memref<2x16x16xf32, #tpu.memory_space<vmem>>, %arg3: memref<2x3x32x32xbf16, #tpu.memory_space<vmem>>, %arg4: memref<2x3x1x32xf32, #tpu.memory_space<vmem>>, %arg5: memref<2x3x3x32xf32, #tpu.memory_space<vmem>>, %arg6: memref<2x3x1x32xf32, #tpu.memory_space<vmem>>, %arg7: memref<2x16x16x32xf32, #tpu.memory_space<vmem>>, %arg8: memref<2x1x32xf32, #tpu.memory_space<vmem>>, %arg9: memref<2x32x32xbf16, #tpu.memory_space<vmem>>, %arg10: memref<2x1x32xf32, #tpu.memory_space<vmem>>, %arg11: memref<2x1x32xf32, #tpu.memory_space<vmem>>, %arg12: memref<2x1x32xf32, #tpu.memory_space<vmem>>, %arg13: memref<2x32x64xbf16, #tpu.memory_space<vmem>>, %arg14: memref<2x1x64xf32, #tpu.memory_space<vmem>>, %arg15: memref<2x64x32xbf16, #tpu.memory_space<vmem>>, %arg16: memref<2x1x32xf32, #tpu.memory_space<vmem>>, %arg17: memref<1x32xf32, #tpu.memory_space<vmem>>, %arg18: memref<1x32xf32, #tpu.memory_space<vmem>>, %arg19: memref<1x16x32xf32, #tpu.memory_space<vmem>>) attributes {dimension_semantics = [#tpu.dimension_semantics<parallel>], iteration_bounds = array<i64: 2>, scalar_prefetch = 0 : i64, scratch_operands = 0 : i64, tpu.core_type = #tpu.core_type<tc>, window_params = [{transform_indices = @transform_0, window_bounds = array<i64: 1, 16, 32>}, {pipeline_mode = #tpu.pipeline_mode<synchronous>, transform_indices = @transform_1, window_bounds = array<i64: 2, 16, 16>}, {pipeline_mode = #tpu.pipeline_mode<synchronous>, transform_indices = @transform_2, window_bounds = array<i64: 2, 3, 32, 32>}, {pipeline_mode = #tpu.pipeline_mode<synchronous>, transform_indices = @transform_3, window_bounds = array<i64: 2, 3, 1, 32>}, {pipeline_mode = #tpu.pipeline_mode<synchronous>, transform_indices = @transform_4, window_bounds = array<i64: 2, 3, 3, 32>}, {pipeline_mode = #tpu.pipeline_mode<synchronous>, transform_indices = @transform_5, window_bounds = array<i64: 2, 3, 1, 32>}, {pipeline_mode = #tpu.pipeline_mode<synchronous>, transform_indices = @transform_6, window_bounds = array<i64: 2, 16, 16, 32>}, {pipeline_mode = #tpu.pipeline_mode<synchronous>, transform_indices = @transform_7, window_bounds = array<i64: 2, 1, 32>}, {pipeline_mode = #tpu.pipeline_mode<synchronous>, transform_indices = @transform_8, window_bounds = array<i64: 2, 32, 32>}, {pipeline_mode = #tpu.pipeline_mode<synchronous>, transform_indices = @transform_9, window_bounds = array<i64: 2, 1, 32>}, {pipeline_mode = #tpu.pipeline_mode<synchronous>, transform_indices = @transform_10, window_bounds = array<i64: 2, 1, 32>}, {pipeline_mode = #tpu.pipeline_mode<synchronous>, transform_indices = @transform_11, window_bounds = array<i64: 2, 1, 32>}, {pipeline_mode = #tpu.pipeline_mode<synchronous>, transform_indices = @transform_12, window_bounds = array<i64: 2, 32, 64>}, {pipeline_mode = #tpu.pipeline_mode<synchronous>, transform_indices = @transform_13, window_bounds = array<i64: 2, 1, 64>}, {pipeline_mode = #tpu.pipeline_mode<synchronous>, transform_indices = @transform_14, window_bounds = array<i64: 2, 64, 32>}, {pipeline_mode = #tpu.pipeline_mode<synchronous>, transform_indices = @transform_15, window_bounds = array<i64: 2, 1, 32>}, {pipeline_mode = #tpu.pipeline_mode<synchronous>, transform_indices = @transform_16, window_bounds = array<i64: 1, 32>}, {pipeline_mode = #tpu.pipeline_mode<synchronous>, transform_indices = @transform_17, window_bounds = array<i64: 1, 32>}, {transform_indices = @transform_18, window_bounds = array<i64: 1, 16, 32>}]} {
    %c0 = arith.constant 0 : index
    %c0_0 = arith.constant 0 : index
    %c0_1 = arith.constant 0 : index
    %0 = vector.load %arg1[%c0, %c0_0, %c0_1] : memref<1x16x32xf32, #tpu.memory_space<vmem>>, vector<1x16x32xf32>
    %1 = vector.shape_cast %0 : vector<1x16x32xf32> to vector<16x32xf32>
    %c0_2 = arith.constant 0 : index
    %c0_3 = arith.constant 0 : index
    %c0_4 = arith.constant 0 : index
    %2 = vector.load %arg2[%c0_2, %c0_3, %c0_4] : memref<2x16x16xf32, #tpu.memory_space<vmem>>, vector<1x16x16xf32>
    %3 = vector.shape_cast %2 : vector<1x16x16xf32> to vector<16x16xf32>
    %c1 = arith.constant 1 : index
    %c0_5 = arith.constant 0 : index
    %c0_6 = arith.constant 0 : index
    %4 = vector.load %arg2[%c1, %c0_5, %c0_6] : memref<2x16x16xf32, #tpu.memory_space<vmem>>, vector<1x16x16xf32>
    %5 = vector.shape_cast %4 : vector<1x16x16xf32> to vector<16x16xf32>
    %6 = arith.truncf %1 : vector<16x32xf32> to vector<16x32xbf16>
    %c0_7 = arith.constant 0 : index
    %c0_8 = arith.constant 0 : index
    %c0_9 = arith.constant 0 : index
    %c0_10 = arith.constant 0 : index
    %7 = vector.load %arg3[%c0_7, %c0_8, %c0_9, %c0_10] : memref<2x3x32x32xbf16, #tpu.memory_space<vmem>>, vector<1x1x32x32xbf16>
    %8 = vector.shape_cast %7 : vector<1x1x32x32xbf16> to vector<32x32xbf16>
    %cst = arith.constant dense<0.000000e+00> : vector<16x32xf32>
    %9 = tpu.matmul %6, %8, %cst {dimension_numbers = #tpu.dot_dimension_numbers<[1], [0], [0], [1], [0, 0, 1, 1], [], []>} : vector<16x32xbf16>, vector<32x32xbf16>, vector<16x32xf32> -> vector<16x32xf32>
    %c0_11 = arith.constant 0 : index
    %c0_12 = arith.constant 0 : index
    %c0_13 = arith.constant 0 : index
    %c0_14 = arith.constant 0 : index
    %10 = vector.load %arg4[%c0_11, %c0_12, %c0_13, %c0_14] : memref<2x3x1x32xf32, #tpu.memory_space<vmem>>, vector<1x1x1x32xf32>
    %11 = vector.shape_cast %10 : vector<1x1x1x32xf32> to vector<1x32xf32>
    %12 = vector.broadcast %11 : vector<1x32xf32> to vector<16x32xf32>
    %13 = arith.addf %9, %12 : vector<16x32xf32>
    %cst_15 = arith.constant dense<0.000000e+00> : vector<16x32xf32>
    %14 = tpu.matmul %3, %13, %cst_15 {dimension_numbers = #tpu.dot_dimension_numbers<[1], [0], [0], [1], [0, 0, 1, 1], [], []>} : vector<16x16xf32>, vector<16x32xf32>, vector<16x32xf32> -> vector<16x32xf32>
    %cst_16 = arith.constant dense<0.000000e+00> : vector<16x32xf32>
    %15 = tpu.matmul %5, %13, %cst_16 {dimension_numbers = #tpu.dot_dimension_numbers<[1], [0], [0], [1], [0, 0, 1, 1], [], []>} : vector<16x16xf32>, vector<16x32xf32>, vector<16x32xf32> -> vector<16x32xf32>
    %c0_17 = arith.constant 0 : index
    %c0_18 = arith.constant 0 : index
    %c0_19 = arith.constant 0 : index
    %c0_20 = arith.constant 0 : index
    %16 = vector.load %arg5[%c0_17, %c0_18, %c0_19, %c0_20] : memref<2x3x3x32xf32, #tpu.memory_space<vmem>>, vector<1x1x3x32xf32>
    %17 = vector.shape_cast %16 : vector<1x1x3x32xf32> to vector<3x32xf32>
    %18 = vector.extract_strided_slice %17 {offsets = [0, 0], sizes = [1, 32], strides = [1, 1]} : vector<3x32xf32> to vector<1x32xf32>
    %19 = vector.broadcast %18 : vector<1x32xf32> to vector<16x32xf32>
    %20 = arith.mulf %19, %15 : vector<16x32xf32>
    %21 = vector.extract_strided_slice %17 {offsets = [1, 0], sizes = [1, 32], strides = [1, 1]} : vector<3x32xf32> to vector<1x32xf32>
    %22 = vector.broadcast %21 : vector<1x32xf32> to vector<16x32xf32>
    %23 = arith.mulf %22, %14 : vector<16x32xf32>
    %24 = arith.addf %20, %23 : vector<16x32xf32>
    %25 = vector.extract_strided_slice %17 {offsets = [2, 0], sizes = [1, 32], strides = [1, 1]} : vector<3x32xf32> to vector<1x32xf32>
    %26 = vector.broadcast %25 : vector<1x32xf32> to vector<16x32xf32>
    %27 = arith.mulf %26, %13 : vector<16x32xf32>
    %28 = arith.addf %24, %27 : vector<16x32xf32>
    %c0_21 = arith.constant 0 : index
    %c0_22 = arith.constant 0 : index
    %c0_23 = arith.constant 0 : index
    %c0_24 = arith.constant 0 : index
    %29 = vector.load %arg6[%c0_21, %c0_22, %c0_23, %c0_24] : memref<2x3x1x32xf32, #tpu.memory_space<vmem>>, vector<1x1x1x32xf32>
    %30 = vector.shape_cast %29 : vector<1x1x1x32xf32> to vector<1x32xf32>
    %31 = vector.broadcast %30 : vector<1x32xf32> to vector<16x32xf32>
    %32 = arith.addf %28, %31 : vector<16x32xf32>
    %c0_25 = arith.constant 0 : index
    %c1_26 = arith.constant 1 : index
    %c0_27 = arith.constant 0 : index
    %c0_28 = arith.constant 0 : index
    %33 = vector.load %arg3[%c0_25, %c1_26, %c0_27, %c0_28] : memref<2x3x32x32xbf16, #tpu.memory_space<vmem>>, vector<1x1x32x32xbf16>
    %34 = vector.shape_cast %33 : vector<1x1x32x32xbf16> to vector<32x32xbf16>
    %cst_29 = arith.constant dense<0.000000e+00> : vector<16x32xf32>
    %35 = tpu.matmul %6, %34, %cst_29 {dimension_numbers = #tpu.dot_dimension_numbers<[1], [0], [0], [1], [0, 0, 1, 1], [], []>} : vector<16x32xbf16>, vector<32x32xbf16>, vector<16x32xf32> -> vector<16x32xf32>
    %c0_30 = arith.constant 0 : index
    %c1_31 = arith.constant 1 : index
    %c0_32 = arith.constant 0 : index
    %c0_33 = arith.constant 0 : index
    %36 = vector.load %arg4[%c0_30, %c1_31, %c0_32, %c0_33] : memref<2x3x1x32xf32, #tpu.memory_space<vmem>>, vector<1x1x1x32xf32>
    %37 = vector.shape_cast %36 : vector<1x1x1x32xf32> to vector<1x32xf32>
    %38 = vector.broadcast %37 : vector<1x32xf32> to vector<16x32xf32>
    %39 = arith.addf %35, %38 : vector<16x32xf32>
    %cst_34 = arith.constant dense<0.000000e+00> : vector<16x32xf32>
    %40 = tpu.matmul %3, %39, %cst_34 {dimension_numbers = #tpu.dot_dimension_numbers<[1], [0], [0], [1], [0, 0, 1, 1], [], []>} : vector<16x16xf32>, vector<16x32xf32>, vector<16x32xf32> -> vector<16x32xf32>
    %cst_35 = arith.constant dense<0.000000e+00> : vector<16x32xf32>
    %41 = tpu.matmul %5, %39, %cst_35 {dimension_numbers = #tpu.dot_dimension_numbers<[1], [0], [0], [1], [0, 0, 1, 1], [], []>} : vector<16x16xf32>, vector<16x32xf32>, vector<16x32xf32> -> vector<16x32xf32>
    %c0_36 = arith.constant 0 : index
    %c1_37 = arith.constant 1 : index
    %c0_38 = arith.constant 0 : index
    %c0_39 = arith.constant 0 : index
    %42 = vector.load %arg5[%c0_36, %c1_37, %c0_38, %c0_39] : memref<2x3x3x32xf32, #tpu.memory_space<vmem>>, vector<1x1x3x32xf32>
    %43 = vector.shape_cast %42 : vector<1x1x3x32xf32> to vector<3x32xf32>
    %44 = vector.extract_strided_slice %43 {offsets = [0, 0], sizes = [1, 32], strides = [1, 1]} : vector<3x32xf32> to vector<1x32xf32>
    %45 = vector.broadcast %44 : vector<1x32xf32> to vector<16x32xf32>
    %46 = arith.mulf %45, %41 : vector<16x32xf32>
    %47 = vector.extract_strided_slice %43 {offsets = [1, 0], sizes = [1, 32], strides = [1, 1]} : vector<3x32xf32> to vector<1x32xf32>
    %48 = vector.broadcast %47 : vector<1x32xf32> to vector<16x32xf32>
    %49 = arith.mulf %48, %40 : vector<16x32xf32>
    %50 = arith.addf %46, %49 : vector<16x32xf32>
    %51 = vector.extract_strided_slice %43 {offsets = [2, 0], sizes = [1, 32], strides = [1, 1]} : vector<3x32xf32> to vector<1x32xf32>
    %52 = vector.broadcast %51 : vector<1x32xf32> to vector<16x32xf32>
    %53 = arith.mulf %52, %39 : vector<16x32xf32>
    %54 = arith.addf %50, %53 : vector<16x32xf32>
    %c0_40 = arith.constant 0 : index
    %c1_41 = arith.constant 1 : index
    %c0_42 = arith.constant 0 : index
    %c0_43 = arith.constant 0 : index
    %55 = vector.load %arg6[%c0_40, %c1_41, %c0_42, %c0_43] : memref<2x3x1x32xf32, #tpu.memory_space<vmem>>, vector<1x1x1x32xf32>
    %56 = vector.shape_cast %55 : vector<1x1x1x32xf32> to vector<1x32xf32>
    %57 = vector.broadcast %56 : vector<1x32xf32> to vector<16x32xf32>
    %58 = arith.addf %54, %57 : vector<16x32xf32>
    %c0_44 = arith.constant 0 : index
    %c2 = arith.constant 2 : index
    %c0_45 = arith.constant 0 : index
    %c0_46 = arith.constant 0 : index
    %59 = vector.load %arg3[%c0_44, %c2, %c0_45, %c0_46] : memref<2x3x32x32xbf16, #tpu.memory_space<vmem>>, vector<1x1x32x32xbf16>
    %60 = vector.shape_cast %59 : vector<1x1x32x32xbf16> to vector<32x32xbf16>
    %cst_47 = arith.constant dense<0.000000e+00> : vector<16x32xf32>
    %61 = tpu.matmul %6, %60, %cst_47 {dimension_numbers = #tpu.dot_dimension_numbers<[1], [0], [0], [1], [0, 0, 1, 1], [], []>} : vector<16x32xbf16>, vector<32x32xbf16>, vector<16x32xf32> -> vector<16x32xf32>
    %c0_48 = arith.constant 0 : index
    %c2_49 = arith.constant 2 : index
    %c0_50 = arith.constant 0 : index
    %c0_51 = arith.constant 0 : index
    %62 = vector.load %arg4[%c0_48, %c2_49, %c0_50, %c0_51] : memref<2x3x1x32xf32, #tpu.memory_space<vmem>>, vector<1x1x1x32xf32>
    %63 = vector.shape_cast %62 : vector<1x1x1x32xf32> to vector<1x32xf32>
    %64 = vector.broadcast %63 : vector<1x32xf32> to vector<16x32xf32>
    %65 = arith.addf %61, %64 : vector<16x32xf32>
    %cst_52 = arith.constant dense<0.000000e+00> : vector<16x32xf32>
    %66 = tpu.matmul %3, %65, %cst_52 {dimension_numbers = #tpu.dot_dimension_numbers<[1], [0], [0], [1], [0, 0, 1, 1], [], []>} : vector<16x16xf32>, vector<16x32xf32>, vector<16x32xf32> -> vector<16x32xf32>
    %cst_53 = arith.constant dense<0.000000e+00> : vector<16x32xf32>
    %67 = tpu.matmul %5, %65, %cst_53 {dimension_numbers = #tpu.dot_dimension_numbers<[1], [0], [0], [1], [0, 0, 1, 1], [], []>} : vector<16x16xf32>, vector<16x32xf32>, vector<16x32xf32> -> vector<16x32xf32>
    %c0_54 = arith.constant 0 : index
    %c2_55 = arith.constant 2 : index
    %c0_56 = arith.constant 0 : index
    %c0_57 = arith.constant 0 : index
    %68 = vector.load %arg5[%c0_54, %c2_55, %c0_56, %c0_57] : memref<2x3x3x32xf32, #tpu.memory_space<vmem>>, vector<1x1x3x32xf32>
    %69 = vector.shape_cast %68 : vector<1x1x3x32xf32> to vector<3x32xf32>
    %70 = vector.extract_strided_slice %69 {offsets = [0, 0], sizes = [1, 32], strides = [1, 1]} : vector<3x32xf32> to vector<1x32xf32>
    %71 = vector.broadcast %70 : vector<1x32xf32> to vector<16x32xf32>
    %72 = arith.mulf %71, %67 : vector<16x32xf32>
    %73 = vector.extract_strided_slice %69 {offsets = [1, 0], sizes = [1, 32], strides = [1, 1]} : vector<3x32xf32> to vector<1x32xf32>
    %74 = vector.broadcast %73 : vector<1x32xf32> to vector<16x32xf32>
    %75 = arith.mulf %74, %66 : vector<16x32xf32>
    %76 = arith.addf %72, %75 : vector<16x32xf32>
    %77 = vector.extract_strided_slice %69 {offsets = [2, 0], sizes = [1, 32], strides = [1, 1]} : vector<3x32xf32> to vector<1x32xf32>
    %78 = vector.broadcast %77 : vector<1x32xf32> to vector<16x32xf32>
    %79 = arith.mulf %78, %65 : vector<16x32xf32>
    %80 = arith.addf %76, %79 : vector<16x32xf32>
    %c0_58 = arith.constant 0 : index
    %c2_59 = arith.constant 2 : index
    %c0_60 = arith.constant 0 : index
    %c0_61 = arith.constant 0 : index
    %81 = vector.load %arg6[%c0_58, %c2_59, %c0_60, %c0_61] : memref<2x3x1x32xf32, #tpu.memory_space<vmem>>, vector<1x1x1x32xf32>
    %82 = vector.shape_cast %81 : vector<1x1x1x32xf32> to vector<1x32xf32>
    %83 = vector.broadcast %82 : vector<1x32xf32> to vector<16x32xf32>
    %84 = arith.addf %80, %83 : vector<16x32xf32>
    %85 = arith.mulf %84, %58 : vector<16x32xf32>
    %c0_62 = arith.constant 0 : index
    %c0_63 = arith.constant 0 : index
    %c0_64 = arith.constant 0 : index
    %c0_65 = arith.constant 0 : index
    %86 = vector.load %arg7[%c0_62, %c0_63, %c0_64, %c0_65] : memref<2x16x16x32xf32, #tpu.memory_space<vmem>>, vector<1x16x16x32xf32>
    %87 = vector.shape_cast %86 : vector<1x16x16x32xf32> to vector<16x16x32xf32>
    %88 = vector.extract_strided_slice %87 {offsets = [0, 0, 0], sizes = [1, 16, 32], strides = [1, 1, 1]} : vector<16x16x32xf32> to vector<1x16x32xf32>
    %89 = vector.shape_cast %88 : vector<1x16x32xf32> to vector<16x32xf32>
    %90 = vector.extract_strided_slice %85 {offsets = [0, 0], sizes = [1, 32], strides = [1, 1]} : vector<16x32xf32> to vector<1x32xf32>
    %91 = vector.broadcast %90 : vector<1x32xf32> to vector<16x32xf32>
    %92 = arith.mulf %89, %91 : vector<16x32xf32>
    %93 = vector.extract_strided_slice %87 {offsets = [1, 0, 0], sizes = [1, 16, 32], strides = [1, 1, 1]} : vector<16x16x32xf32> to vector<1x16x32xf32>
    %94 = vector.shape_cast %93 : vector<1x16x32xf32> to vector<16x32xf32>
    %95 = vector.extract_strided_slice %85 {offsets = [1, 0], sizes = [1, 32], strides = [1, 1]} : vector<16x32xf32> to vector<1x32xf32>
    %96 = vector.broadcast %95 : vector<1x32xf32> to vector<16x32xf32>
    %97 = arith.mulf %94, %96 : vector<16x32xf32>
    %98 = arith.addf %92, %97 : vector<16x32xf32>
    %99 = vector.extract_strided_slice %87 {offsets = [2, 0, 0], sizes = [1, 16, 32], strides = [1, 1, 1]} : vector<16x16x32xf32> to vector<1x16x32xf32>
    %100 = vector.shape_cast %99 : vector<1x16x32xf32> to vector<16x32xf32>
    %101 = vector.extract_strided_slice %85 {offsets = [2, 0], sizes = [1, 32], strides = [1, 1]} : vector<16x32xf32> to vector<1x32xf32>
    %102 = vector.broadcast %101 : vector<1x32xf32> to vector<16x32xf32>
    %103 = arith.mulf %100, %102 : vector<16x32xf32>
    %104 = arith.addf %98, %103 : vector<16x32xf32>
    %105 = vector.extract_strided_slice %87 {offsets = [3, 0, 0], sizes = [1, 16, 32], strides = [1, 1, 1]} : vector<16x16x32xf32> to vector<1x16x32xf32>
    %106 = vector.shape_cast %105 : vector<1x16x32xf32> to vector<16x32xf32>
    %107 = vector.extract_strided_slice %85 {offsets = [3, 0], sizes = [1, 32], strides = [1, 1]} : vector<16x32xf32> to vector<1x32xf32>
    %108 = vector.broadcast %107 : vector<1x32xf32> to vector<16x32xf32>
    %109 = arith.mulf %106, %108 : vector<16x32xf32>
    %110 = arith.addf %104, %109 : vector<16x32xf32>
    %111 = vector.extract_strided_slice %87 {offsets = [4, 0, 0], sizes = [1, 16, 32], strides = [1, 1, 1]} : vector<16x16x32xf32> to vector<1x16x32xf32>
    %112 = vector.shape_cast %111 : vector<1x16x32xf32> to vector<16x32xf32>
    %113 = vector.extract_strided_slice %85 {offsets = [4, 0], sizes = [1, 32], strides = [1, 1]} : vector<16x32xf32> to vector<1x32xf32>
    %114 = vector.broadcast %113 : vector<1x32xf32> to vector<16x32xf32>
    %115 = arith.mulf %112, %114 : vector<16x32xf32>
    %116 = arith.addf %110, %115 : vector<16x32xf32>
    %117 = vector.extract_strided_slice %87 {offsets = [5, 0, 0], sizes = [1, 16, 32], strides = [1, 1, 1]} : vector<16x16x32xf32> to vector<1x16x32xf32>
    %118 = vector.shape_cast %117 : vector<1x16x32xf32> to vector<16x32xf32>
    %119 = vector.extract_strided_slice %85 {offsets = [5, 0], sizes = [1, 32], strides = [1, 1]} : vector<16x32xf32> to vector<1x32xf32>
    %120 = vector.broadcast %119 : vector<1x32xf32> to vector<16x32xf32>
    %121 = arith.mulf %118, %120 : vector<16x32xf32>
    %122 = arith.addf %116, %121 : vector<16x32xf32>
    %123 = vector.extract_strided_slice %87 {offsets = [6, 0, 0], sizes = [1, 16, 32], strides = [1, 1, 1]} : vector<16x16x32xf32> to vector<1x16x32xf32>
    %124 = vector.shape_cast %123 : vector<1x16x32xf32> to vector<16x32xf32>
    %125 = vector.extract_strided_slice %85 {offsets = [6, 0], sizes = [1, 32], strides = [1, 1]} : vector<16x32xf32> to vector<1x32xf32>
    %126 = vector.broadcast %125 : vector<1x32xf32> to vector<16x32xf32>
    %127 = arith.mulf %124, %126 : vector<16x32xf32>
    %128 = arith.addf %122, %127 : vector<16x32xf32>
    %129 = vector.extract_strided_slice %87 {offsets = [7, 0, 0], sizes = [1, 16, 32], strides = [1, 1, 1]} : vector<16x16x32xf32> to vector<1x16x32xf32>
    %130 = vector.shape_cast %129 : vector<1x16x32xf32> to vector<16x32xf32>
    %131 = vector.extract_strided_slice %85 {offsets = [7, 0], sizes = [1, 32], strides = [1, 1]} : vector<16x32xf32> to vector<1x32xf32>
    %132 = vector.broadcast %131 : vector<1x32xf32> to vector<16x32xf32>
    %133 = arith.mulf %130, %132 : vector<16x32xf32>
    %134 = arith.addf %128, %133 : vector<16x32xf32>
    %135 = vector.extract_strided_slice %87 {offsets = [8, 0, 0], sizes = [1, 16, 32], strides = [1, 1, 1]} : vector<16x16x32xf32> to vector<1x16x32xf32>
    %136 = vector.shape_cast %135 : vector<1x16x32xf32> to vector<16x32xf32>
    %137 = vector.extract_strided_slice %85 {offsets = [8, 0], sizes = [1, 32], strides = [1, 1]} : vector<16x32xf32> to vector<1x32xf32>
    %138 = vector.broadcast %137 : vector<1x32xf32> to vector<16x32xf32>
    %139 = arith.mulf %136, %138 : vector<16x32xf32>
    %140 = arith.addf %134, %139 : vector<16x32xf32>
    %141 = vector.extract_strided_slice %87 {offsets = [9, 0, 0], sizes = [1, 16, 32], strides = [1, 1, 1]} : vector<16x16x32xf32> to vector<1x16x32xf32>
    %142 = vector.shape_cast %141 : vector<1x16x32xf32> to vector<16x32xf32>
    %143 = vector.extract_strided_slice %85 {offsets = [9, 0], sizes = [1, 32], strides = [1, 1]} : vector<16x32xf32> to vector<1x32xf32>
    %144 = vector.broadcast %143 : vector<1x32xf32> to vector<16x32xf32>
    %145 = arith.mulf %142, %144 : vector<16x32xf32>
    %146 = arith.addf %140, %145 : vector<16x32xf32>
    %147 = vector.extract_strided_slice %87 {offsets = [10, 0, 0], sizes = [1, 16, 32], strides = [1, 1, 1]} : vector<16x16x32xf32> to vector<1x16x32xf32>
    %148 = vector.shape_cast %147 : vector<1x16x32xf32> to vector<16x32xf32>
    %149 = vector.extract_strided_slice %85 {offsets = [10, 0], sizes = [1, 32], strides = [1, 1]} : vector<16x32xf32> to vector<1x32xf32>
    %150 = vector.broadcast %149 : vector<1x32xf32> to vector<16x32xf32>
    %151 = arith.mulf %148, %150 : vector<16x32xf32>
    %152 = arith.addf %146, %151 : vector<16x32xf32>
    %153 = vector.extract_strided_slice %87 {offsets = [11, 0, 0], sizes = [1, 16, 32], strides = [1, 1, 1]} : vector<16x16x32xf32> to vector<1x16x32xf32>
    %154 = vector.shape_cast %153 : vector<1x16x32xf32> to vector<16x32xf32>
    %155 = vector.extract_strided_slice %85 {offsets = [11, 0], sizes = [1, 32], strides = [1, 1]} : vector<16x32xf32> to vector<1x32xf32>
    %156 = vector.broadcast %155 : vector<1x32xf32> to vector<16x32xf32>
    %157 = arith.mulf %154, %156 : vector<16x32xf32>
    %158 = arith.addf %152, %157 : vector<16x32xf32>
    %159 = vector.extract_strided_slice %87 {offsets = [12, 0, 0], sizes = [1, 16, 32], strides = [1, 1, 1]} : vector<16x16x32xf32> to vector<1x16x32xf32>
    %160 = vector.shape_cast %159 : vector<1x16x32xf32> to vector<16x32xf32>
    %161 = vector.extract_strided_slice %85 {offsets = [12, 0], sizes = [1, 32], strides = [1, 1]} : vector<16x32xf32> to vector<1x32xf32>
    %162 = vector.broadcast %161 : vector<1x32xf32> to vector<16x32xf32>
    %163 = arith.mulf %160, %162 : vector<16x32xf32>
    %164 = arith.addf %158, %163 : vector<16x32xf32>
    %165 = vector.extract_strided_slice %87 {offsets = [13, 0, 0], sizes = [1, 16, 32], strides = [1, 1, 1]} : vector<16x16x32xf32> to vector<1x16x32xf32>
    %166 = vector.shape_cast %165 : vector<1x16x32xf32> to vector<16x32xf32>
    %167 = vector.extract_strided_slice %85 {offsets = [13, 0], sizes = [1, 32], strides = [1, 1]} : vector<16x32xf32> to vector<1x32xf32>
    %168 = vector.broadcast %167 : vector<1x32xf32> to vector<16x32xf32>
    %169 = arith.mulf %166, %168 : vector<16x32xf32>
    %170 = arith.addf %164, %169 : vector<16x32xf32>
    %171 = vector.extract_strided_slice %87 {offsets = [14, 0, 0], sizes = [1, 16, 32], strides = [1, 1, 1]} : vector<16x16x32xf32> to vector<1x16x32xf32>
    %172 = vector.shape_cast %171 : vector<1x16x32xf32> to vector<16x32xf32>
    %173 = vector.extract_strided_slice %85 {offsets = [14, 0], sizes = [1, 32], strides = [1, 1]} : vector<16x32xf32> to vector<1x32xf32>
    %174 = vector.broadcast %173 : vector<1x32xf32> to vector<16x32xf32>
    %175 = arith.mulf %172, %174 : vector<16x32xf32>
    %176 = arith.addf %170, %175 : vector<16x32xf32>
    %177 = vector.extract_strided_slice %87 {offsets = [15, 0, 0], sizes = [1, 16, 32], strides = [1, 1, 1]} : vector<16x16x32xf32> to vector<1x16x32xf32>
    %178 = vector.shape_cast %177 : vector<1x16x32xf32> to vector<16x32xf32>
    %179 = vector.extract_strided_slice %85 {offsets = [15, 0], sizes = [1, 32], strides = [1, 1]} : vector<16x32xf32> to vector<1x32xf32>
    %180 = vector.broadcast %179 : vector<1x32xf32> to vector<16x32xf32>
    %181 = arith.mulf %178, %180 : vector<16x32xf32>
    %182 = arith.addf %176, %181 : vector<16x32xf32>
    %c0_66 = arith.constant 0 : index
    %c0_67 = arith.constant 0 : index
    %c0_68 = arith.constant 0 : index
    %183 = vector.load %arg8[%c0_66, %c0_67, %c0_68] : memref<2x1x32xf32, #tpu.memory_space<vmem>>, vector<1x1x32xf32>
    %184 = vector.shape_cast %183 : vector<1x1x32xf32> to vector<1x32xf32>
    %185 = vector.broadcast %184 : vector<1x32xf32> to vector<16x32xf32>
    %186 = arith.mulf %85, %185 : vector<16x32xf32>
    %187 = arith.addf %182, %186 : vector<16x32xf32>
    %cst_69 = arith.constant 5.000000e-01 : f32
    %188 = vector.broadcast %cst_69 : f32 to vector<16x32xf32>
    %189 = arith.mulf %188, %187 : vector<16x32xf32>
    %cst_70 = arith.constant 0.707106769 : f32
    %190 = vector.broadcast %cst_70 : f32 to vector<16x32xf32>
    %191 = arith.mulf %187, %190 : vector<16x32xf32>
    %192 = math.absf %191 : vector<16x32xf32>
    %cst_71 = arith.constant 0.327591091 : f32
    %193 = vector.broadcast %cst_71 : f32 to vector<16x32xf32>
    %194 = arith.mulf %193, %192 : vector<16x32xf32>
    %cst_72 = arith.constant 1.000000e+00 : f32
    %195 = vector.broadcast %cst_72 : f32 to vector<16x32xf32>
    %196 = arith.addf %195, %194 : vector<16x32xf32>
    %cst_73 = arith.constant 1.000000e+00 : f32
    %197 = vector.broadcast %cst_73 : f32 to vector<16x32xf32>
    %198 = arith.divf %197, %196 : vector<16x32xf32>
    %cst_74 = arith.constant 1.06140542 : f32
    %199 = vector.broadcast %cst_74 : f32 to vector<16x32xf32>
    %200 = arith.mulf %199, %198 : vector<16x32xf32>
    %cst_75 = arith.constant -1.45315206 : f32
    %201 = vector.broadcast %cst_75 : f32 to vector<16x32xf32>
    %202 = arith.addf %200, %201 : vector<16x32xf32>
    %203 = arith.mulf %202, %198 : vector<16x32xf32>
    %cst_76 = arith.constant 1.42141378 : f32
    %204 = vector.broadcast %cst_76 : f32 to vector<16x32xf32>
    %205 = arith.addf %203, %204 : vector<16x32xf32>
    %206 = arith.mulf %205, %198 : vector<16x32xf32>
    %cst_77 = arith.constant -0.284496725 : f32
    %207 = vector.broadcast %cst_77 : f32 to vector<16x32xf32>
    %208 = arith.addf %206, %207 : vector<16x32xf32>
    %209 = arith.mulf %208, %198 : vector<16x32xf32>
    %cst_78 = arith.constant 0.254829586 : f32
    %210 = vector.broadcast %cst_78 : f32 to vector<16x32xf32>
    %211 = arith.addf %209, %210 : vector<16x32xf32>
    %212 = arith.mulf %211, %198 : vector<16x32xf32>
    %cst_79 = arith.constant 0.000000e+00 : f32
    %213 = vector.broadcast %cst_79 : f32 to vector<16x32xf32>
    %214 = arith.subf %213, %192 : vector<16x32xf32>
    %215 = arith.mulf %214, %192 : vector<16x32xf32>
    %216 = math.exp %215 : vector<16x32xf32>
    %217 = arith.mulf %212, %216 : vector<16x32xf32>
    %cst_80 = arith.constant 1.000000e+00 : f32
    %218 = vector.broadcast %cst_80 : f32 to vector<16x32xf32>
    %219 = arith.subf %218, %217 : vector<16x32xf32>
    %cst_81 = arith.constant 0.000000e+00 : f32
    %220 = vector.broadcast %cst_81 : f32 to vector<16x32xf32>
    %221 = arith.cmpf oge, %191, %220 : vector<16x32xf32>
    %cst_82 = arith.constant 0.000000e+00 : f32
    %222 = vector.broadcast %cst_82 : f32 to vector<16x32xf32>
    %223 = arith.subf %222, %219 : vector<16x32xf32>
    %224 = arith.select %221, %219, %223 : vector<16x32xi1>, vector<16x32xf32>
    %cst_83 = arith.constant 1.000000e+00 : f32
    %225 = vector.broadcast %cst_83 : f32 to vector<16x32xf32>
    %226 = arith.addf %225, %224 : vector<16x32xf32>
    %227 = arith.mulf %189, %226 : vector<16x32xf32>
    %228 = arith.mulf %227, %32 : vector<16x32xf32>
    %229 = arith.truncf %228 : vector<16x32xf32> to vector<16x32xbf16>
    %c0_84 = arith.constant 0 : index
    %c0_85 = arith.constant 0 : index
    %c0_86 = arith.constant 0 : index
    %230 = vector.load %arg9[%c0_84, %c0_85, %c0_86] : memref<2x32x32xbf16, #tpu.memory_space<vmem>>, vector<1x32x32xbf16>
    %231 = vector.shape_cast %230 : vector<1x32x32xbf16> to vector<32x32xbf16>
    %cst_87 = arith.constant dense<0.000000e+00> : vector<16x32xf32>
    %232 = tpu.matmul %229, %231, %cst_87 {dimension_numbers = #tpu.dot_dimension_numbers<[1], [0], [0], [1], [0, 0, 1, 1], [], []>} : vector<16x32xbf16>, vector<32x32xbf16>, vector<16x32xf32> -> vector<16x32xf32>
    %c0_88 = arith.constant 0 : index
    %c0_89 = arith.constant 0 : index
    %c0_90 = arith.constant 0 : index
    %233 = vector.load %arg10[%c0_88, %c0_89, %c0_90] : memref<2x1x32xf32, #tpu.memory_space<vmem>>, vector<1x1x32xf32>
    %234 = vector.shape_cast %233 : vector<1x1x32xf32> to vector<1x32xf32>
    %235 = vector.broadcast %234 : vector<1x32xf32> to vector<16x32xf32>
    %236 = arith.addf %232, %235 : vector<16x32xf32>
    %237 = arith.addf %236, %1 : vector<16x32xf32>
    %c0_91 = arith.constant 0 : index
    %c0_92 = arith.constant 0 : index
    %c0_93 = arith.constant 0 : index
    %238 = vector.load %arg11[%c0_91, %c0_92, %c0_93] : memref<2x1x32xf32, #tpu.memory_space<vmem>>, vector<1x1x32xf32>
    %239 = vector.shape_cast %238 : vector<1x1x32xf32> to vector<1x32xf32>
    %c0_94 = arith.constant 0 : index
    %c0_95 = arith.constant 0 : index
    %c0_96 = arith.constant 0 : index
    %240 = vector.load %arg12[%c0_94, %c0_95, %c0_96] : memref<2x1x32xf32, #tpu.memory_space<vmem>>, vector<1x1x32xf32>
    %241 = vector.shape_cast %240 : vector<1x1x32xf32> to vector<1x32xf32>
    %cst_97 = arith.constant dense<0.000000e+00> : vector<16xf32>
    %242 = vector.multi_reduction <add>, %237, %cst_97 [1] : vector<16x32xf32> to vector<16xf32>
    %243 = vector.shape_cast %242 : vector<16xf32> to vector<16x1xf32>
    %cst_98 = arith.constant 3.200000e+01 : f32
    %244 = vector.broadcast %cst_98 : f32 to vector<16x1xf32>
    %245 = arith.divf %243, %244 : vector<16x1xf32>
    %246 = vector.broadcast %245 : vector<16x1xf32> to vector<16x32xf32>
    %247 = arith.subf %237, %246 : vector<16x32xf32>
    %248 = arith.mulf %247, %247 : vector<16x32xf32>
    %cst_99 = arith.constant dense<0.000000e+00> : vector<16xf32>
    %249 = vector.multi_reduction <add>, %248, %cst_99 [1] : vector<16x32xf32> to vector<16xf32>
    %250 = vector.shape_cast %249 : vector<16xf32> to vector<16x1xf32>
    %cst_100 = arith.constant 3.200000e+01 : f32
    %251 = vector.broadcast %cst_100 : f32 to vector<16x1xf32>
    %252 = arith.divf %250, %251 : vector<16x1xf32>
    %253 = vector.broadcast %245 : vector<16x1xf32> to vector<16x32xf32>
    %254 = arith.subf %237, %253 : vector<16x32xf32>
    %cst_101 = arith.constant 9.99999974E-6 : f32
    %255 = vector.broadcast %cst_101 : f32 to vector<16x1xf32>
    %256 = arith.addf %252, %255 : vector<16x1xf32>
    %257 = math.rsqrt %256 : vector<16x1xf32>
    %258 = vector.broadcast %257 : vector<16x1xf32> to vector<16x32xf32>
    %259 = arith.mulf %254, %258 : vector<16x32xf32>
    %260 = vector.broadcast %239 : vector<1x32xf32> to vector<16x32xf32>
    %261 = arith.mulf %259, %260 : vector<16x32xf32>
    %262 = vector.broadcast %241 : vector<1x32xf32> to vector<16x32xf32>
    %263 = arith.addf %261, %262 : vector<16x32xf32>
    %264 = arith.truncf %263 : vector<16x32xf32> to vector<16x32xbf16>
    %c0_102 = arith.constant 0 : index
    %c0_103 = arith.constant 0 : index
    %c0_104 = arith.constant 0 : index
    %265 = vector.load %arg13[%c0_102, %c0_103, %c0_104] : memref<2x32x64xbf16, #tpu.memory_space<vmem>>, vector<1x32x64xbf16>
    %266 = vector.shape_cast %265 : vector<1x32x64xbf16> to vector<32x64xbf16>
    %cst_105 = arith.constant dense<0.000000e+00> : vector<16x64xf32>
    %267 = tpu.matmul %264, %266, %cst_105 {dimension_numbers = #tpu.dot_dimension_numbers<[1], [0], [0], [1], [0, 0, 1, 1], [], []>} : vector<16x32xbf16>, vector<32x64xbf16>, vector<16x64xf32> -> vector<16x64xf32>
    %c0_106 = arith.constant 0 : index
    %c0_107 = arith.constant 0 : index
    %c0_108 = arith.constant 0 : index
    %268 = vector.load %arg14[%c0_106, %c0_107, %c0_108] : memref<2x1x64xf32, #tpu.memory_space<vmem>>, vector<1x1x64xf32>
    %269 = vector.shape_cast %268 : vector<1x1x64xf32> to vector<1x64xf32>
    %270 = vector.broadcast %269 : vector<1x64xf32> to vector<16x64xf32>
    %271 = arith.addf %267, %270 : vector<16x64xf32>
    %cst_109 = arith.constant 5.000000e-01 : f32
    %272 = vector.broadcast %cst_109 : f32 to vector<16x64xf32>
    %273 = arith.mulf %272, %271 : vector<16x64xf32>
    %cst_110 = arith.constant 0.707106769 : f32
    %274 = vector.broadcast %cst_110 : f32 to vector<16x64xf32>
    %275 = arith.mulf %271, %274 : vector<16x64xf32>
    %276 = math.absf %275 : vector<16x64xf32>
    %cst_111 = arith.constant 0.327591091 : f32
    %277 = vector.broadcast %cst_111 : f32 to vector<16x64xf32>
    %278 = arith.mulf %277, %276 : vector<16x64xf32>
    %cst_112 = arith.constant 1.000000e+00 : f32
    %279 = vector.broadcast %cst_112 : f32 to vector<16x64xf32>
    %280 = arith.addf %279, %278 : vector<16x64xf32>
    %cst_113 = arith.constant 1.000000e+00 : f32
    %281 = vector.broadcast %cst_113 : f32 to vector<16x64xf32>
    %282 = arith.divf %281, %280 : vector<16x64xf32>
    %cst_114 = arith.constant 1.06140542 : f32
    %283 = vector.broadcast %cst_114 : f32 to vector<16x64xf32>
    %284 = arith.mulf %283, %282 : vector<16x64xf32>
    %cst_115 = arith.constant -1.45315206 : f32
    %285 = vector.broadcast %cst_115 : f32 to vector<16x64xf32>
    %286 = arith.addf %284, %285 : vector<16x64xf32>
    %287 = arith.mulf %286, %282 : vector<16x64xf32>
    %cst_116 = arith.constant 1.42141378 : f32
    %288 = vector.broadcast %cst_116 : f32 to vector<16x64xf32>
    %289 = arith.addf %287, %288 : vector<16x64xf32>
    %290 = arith.mulf %289, %282 : vector<16x64xf32>
    %cst_117 = arith.constant -0.284496725 : f32
    %291 = vector.broadcast %cst_117 : f32 to vector<16x64xf32>
    %292 = arith.addf %290, %291 : vector<16x64xf32>
    %293 = arith.mulf %292, %282 : vector<16x64xf32>
    %cst_118 = arith.constant 0.254829586 : f32
    %294 = vector.broadcast %cst_118 : f32 to vector<16x64xf32>
    %295 = arith.addf %293, %294 : vector<16x64xf32>
    %296 = arith.mulf %295, %282 : vector<16x64xf32>
    %cst_119 = arith.constant 0.000000e+00 : f32
    %297 = vector.broadcast %cst_119 : f32 to vector<16x64xf32>
    %298 = arith.subf %297, %276 : vector<16x64xf32>
    %299 = arith.mulf %298, %276 : vector<16x64xf32>
    %300 = math.exp %299 : vector<16x64xf32>
    %301 = arith.mulf %296, %300 : vector<16x64xf32>
    %cst_120 = arith.constant 1.000000e+00 : f32
    %302 = vector.broadcast %cst_120 : f32 to vector<16x64xf32>
    %303 = arith.subf %302, %301 : vector<16x64xf32>
    %cst_121 = arith.constant 0.000000e+00 : f32
    %304 = vector.broadcast %cst_121 : f32 to vector<16x64xf32>
    %305 = arith.cmpf oge, %275, %304 : vector<16x64xf32>
    %cst_122 = arith.constant 0.000000e+00 : f32
    %306 = vector.broadcast %cst_122 : f32 to vector<16x64xf32>
    %307 = arith.subf %306, %303 : vector<16x64xf32>
    %308 = arith.select %305, %303, %307 : vector<16x64xi1>, vector<16x64xf32>
    %cst_123 = arith.constant 1.000000e+00 : f32
    %309 = vector.broadcast %cst_123 : f32 to vector<16x64xf32>
    %310 = arith.addf %309, %308 : vector<16x64xf32>
    %311 = arith.mulf %273, %310 : vector<16x64xf32>
    %312 = arith.truncf %311 : vector<16x64xf32> to vector<16x64xbf16>
    %c0_124 = arith.constant 0 : index
    %c0_125 = arith.constant 0 : index
    %c0_126 = arith.constant 0 : index
    %313 = vector.load %arg15[%c0_124, %c0_125, %c0_126] : memref<2x64x32xbf16, #tpu.memory_space<vmem>>, vector<1x64x32xbf16>
    %314 = vector.shape_cast %313 : vector<1x64x32xbf16> to vector<64x32xbf16>
    %cst_127 = arith.constant dense<0.000000e+00> : vector<16x32xf32>
    %315 = tpu.matmul %312, %314, %cst_127 {dimension_numbers = #tpu.dot_dimension_numbers<[1], [0], [0], [1], [0, 0, 1, 1], [], []>} : vector<16x64xbf16>, vector<64x32xbf16>, vector<16x32xf32> -> vector<16x32xf32>
    %c0_128 = arith.constant 0 : index
    %c0_129 = arith.constant 0 : index
    %c0_130 = arith.constant 0 : index
    %316 = vector.load %arg16[%c0_128, %c0_129, %c0_130] : memref<2x1x32xf32, #tpu.memory_space<vmem>>, vector<1x1x32xf32>
    %317 = vector.shape_cast %316 : vector<1x1x32xf32> to vector<1x32xf32>
    %318 = vector.broadcast %317 : vector<1x32xf32> to vector<16x32xf32>
    %319 = arith.addf %315, %318 : vector<16x32xf32>
    %320 = arith.addf %319, %237 : vector<16x32xf32>
    %321 = arith.truncf %320 : vector<16x32xf32> to vector<16x32xbf16>
    %c1_131 = arith.constant 1 : index
    %c0_132 = arith.constant 0 : index
    %c0_133 = arith.constant 0 : index
    %c0_134 = arith.constant 0 : index
    %322 = vector.load %arg3[%c1_131, %c0_132, %c0_133, %c0_134] : memref<2x3x32x32xbf16, #tpu.memory_space<vmem>>, vector<1x1x32x32xbf16>
    %323 = vector.shape_cast %322 : vector<1x1x32x32xbf16> to vector<32x32xbf16>
    %cst_135 = arith.constant dense<0.000000e+00> : vector<16x32xf32>
    %324 = tpu.matmul %321, %323, %cst_135 {dimension_numbers = #tpu.dot_dimension_numbers<[1], [0], [0], [1], [0, 0, 1, 1], [], []>} : vector<16x32xbf16>, vector<32x32xbf16>, vector<16x32xf32> -> vector<16x32xf32>
    %c1_136 = arith.constant 1 : index
    %c0_137 = arith.constant 0 : index
    %c0_138 = arith.constant 0 : index
    %c0_139 = arith.constant 0 : index
    %325 = vector.load %arg4[%c1_136, %c0_137, %c0_138, %c0_139] : memref<2x3x1x32xf32, #tpu.memory_space<vmem>>, vector<1x1x1x32xf32>
    %326 = vector.shape_cast %325 : vector<1x1x1x32xf32> to vector<1x32xf32>
    %327 = vector.broadcast %326 : vector<1x32xf32> to vector<16x32xf32>
    %328 = arith.addf %324, %327 : vector<16x32xf32>
    %cst_140 = arith.constant dense<0.000000e+00> : vector<16x32xf32>
    %329 = tpu.matmul %3, %328, %cst_140 {dimension_numbers = #tpu.dot_dimension_numbers<[1], [0], [0], [1], [0, 0, 1, 1], [], []>} : vector<16x16xf32>, vector<16x32xf32>, vector<16x32xf32> -> vector<16x32xf32>
    %cst_141 = arith.constant dense<0.000000e+00> : vector<16x32xf32>
    %330 = tpu.matmul %5, %328, %cst_141 {dimension_numbers = #tpu.dot_dimension_numbers<[1], [0], [0], [1], [0, 0, 1, 1], [], []>} : vector<16x16xf32>, vector<16x32xf32>, vector<16x32xf32> -> vector<16x32xf32>
    %c1_142 = arith.constant 1 : index
    %c0_143 = arith.constant 0 : index
    %c0_144 = arith.constant 0 : index
    %c0_145 = arith.constant 0 : index
    %331 = vector.load %arg5[%c1_142, %c0_143, %c0_144, %c0_145] : memref<2x3x3x32xf32, #tpu.memory_space<vmem>>, vector<1x1x3x32xf32>
    %332 = vector.shape_cast %331 : vector<1x1x3x32xf32> to vector<3x32xf32>
    %333 = vector.extract_strided_slice %332 {offsets = [0, 0], sizes = [1, 32], strides = [1, 1]} : vector<3x32xf32> to vector<1x32xf32>
    %334 = vector.broadcast %333 : vector<1x32xf32> to vector<16x32xf32>
    %335 = arith.mulf %334, %330 : vector<16x32xf32>
    %336 = vector.extract_strided_slice %332 {offsets = [1, 0], sizes = [1, 32], strides = [1, 1]} : vector<3x32xf32> to vector<1x32xf32>
    %337 = vector.broadcast %336 : vector<1x32xf32> to vector<16x32xf32>
    %338 = arith.mulf %337, %329 : vector<16x32xf32>
    %339 = arith.addf %335, %338 : vector<16x32xf32>
    %340 = vector.extract_strided_slice %332 {offsets = [2, 0], sizes = [1, 32], strides = [1, 1]} : vector<3x32xf32> to vector<1x32xf32>
    %341 = vector.broadcast %340 : vector<1x32xf32> to vector<16x32xf32>
    %342 = arith.mulf %341, %328 : vector<16x32xf32>
    %343 = arith.addf %339, %342 : vector<16x32xf32>
    %c1_146 = arith.constant 1 : index
    %c0_147 = arith.constant 0 : index
    %c0_148 = arith.constant 0 : index
    %c0_149 = arith.constant 0 : index
    %344 = vector.load %arg6[%c1_146, %c0_147, %c0_148, %c0_149] : memref<2x3x1x32xf32, #tpu.memory_space<vmem>>, vector<1x1x1x32xf32>
    %345 = vector.shape_cast %344 : vector<1x1x1x32xf32> to vector<1x32xf32>
    %346 = vector.broadcast %345 : vector<1x32xf32> to vector<16x32xf32>
    %347 = arith.addf %343, %346 : vector<16x32xf32>
    %c1_150 = arith.constant 1 : index
    %c1_151 = arith.constant 1 : index
    %c0_152 = arith.constant 0 : index
    %c0_153 = arith.constant 0 : index
    %348 = vector.load %arg3[%c1_150, %c1_151, %c0_152, %c0_153] : memref<2x3x32x32xbf16, #tpu.memory_space<vmem>>, vector<1x1x32x32xbf16>
    %349 = vector.shape_cast %348 : vector<1x1x32x32xbf16> to vector<32x32xbf16>
    %cst_154 = arith.constant dense<0.000000e+00> : vector<16x32xf32>
    %350 = tpu.matmul %321, %349, %cst_154 {dimension_numbers = #tpu.dot_dimension_numbers<[1], [0], [0], [1], [0, 0, 1, 1], [], []>} : vector<16x32xbf16>, vector<32x32xbf16>, vector<16x32xf32> -> vector<16x32xf32>
    %c1_155 = arith.constant 1 : index
    %c1_156 = arith.constant 1 : index
    %c0_157 = arith.constant 0 : index
    %c0_158 = arith.constant 0 : index
    %351 = vector.load %arg4[%c1_155, %c1_156, %c0_157, %c0_158] : memref<2x3x1x32xf32, #tpu.memory_space<vmem>>, vector<1x1x1x32xf32>
    %352 = vector.shape_cast %351 : vector<1x1x1x32xf32> to vector<1x32xf32>
    %353 = vector.broadcast %352 : vector<1x32xf32> to vector<16x32xf32>
    %354 = arith.addf %350, %353 : vector<16x32xf32>
    %cst_159 = arith.constant dense<0.000000e+00> : vector<16x32xf32>
    %355 = tpu.matmul %3, %354, %cst_159 {dimension_numbers = #tpu.dot_dimension_numbers<[1], [0], [0], [1], [0, 0, 1, 1], [], []>} : vector<16x16xf32>, vector<16x32xf32>, vector<16x32xf32> -> vector<16x32xf32>
    %cst_160 = arith.constant dense<0.000000e+00> : vector<16x32xf32>
    %356 = tpu.matmul %5, %354, %cst_160 {dimension_numbers = #tpu.dot_dimension_numbers<[1], [0], [0], [1], [0, 0, 1, 1], [], []>} : vector<16x16xf32>, vector<16x32xf32>, vector<16x32xf32> -> vector<16x32xf32>
    %c1_161 = arith.constant 1 : index
    %c1_162 = arith.constant 1 : index
    %c0_163 = arith.constant 0 : index
    %c0_164 = arith.constant 0 : index
    %357 = vector.load %arg5[%c1_161, %c1_162, %c0_163, %c0_164] : memref<2x3x3x32xf32, #tpu.memory_space<vmem>>, vector<1x1x3x32xf32>
    %358 = vector.shape_cast %357 : vector<1x1x3x32xf32> to vector<3x32xf32>
    %359 = vector.extract_strided_slice %358 {offsets = [0, 0], sizes = [1, 32], strides = [1, 1]} : vector<3x32xf32> to vector<1x32xf32>
    %360 = vector.broadcast %359 : vector<1x32xf32> to vector<16x32xf32>
    %361 = arith.mulf %360, %356 : vector<16x32xf32>
    %362 = vector.extract_strided_slice %358 {offsets = [1, 0], sizes = [1, 32], strides = [1, 1]} : vector<3x32xf32> to vector<1x32xf32>
    %363 = vector.broadcast %362 : vector<1x32xf32> to vector<16x32xf32>
    %364 = arith.mulf %363, %355 : vector<16x32xf32>
    %365 = arith.addf %361, %364 : vector<16x32xf32>
    %366 = vector.extract_strided_slice %358 {offsets = [2, 0], sizes = [1, 32], strides = [1, 1]} : vector<3x32xf32> to vector<1x32xf32>
    %367 = vector.broadcast %366 : vector<1x32xf32> to vector<16x32xf32>
    %368 = arith.mulf %367, %354 : vector<16x32xf32>
    %369 = arith.addf %365, %368 : vector<16x32xf32>
    %c1_165 = arith.constant 1 : index
    %c1_166 = arith.constant 1 : index
    %c0_167 = arith.constant 0 : index
    %c0_168 = arith.constant 0 : index
    %370 = vector.load %arg6[%c1_165, %c1_166, %c0_167, %c0_168] : memref<2x3x1x32xf32, #tpu.memory_space<vmem>>, vector<1x1x1x32xf32>
    %371 = vector.shape_cast %370 : vector<1x1x1x32xf32> to vector<1x32xf32>
    %372 = vector.broadcast %371 : vector<1x32xf32> to vector<16x32xf32>
    %373 = arith.addf %369, %372 : vector<16x32xf32>
    %c1_169 = arith.constant 1 : index
    %c2_170 = arith.constant 2 : index
    %c0_171 = arith.constant 0 : index
    %c0_172 = arith.constant 0 : index
    %374 = vector.load %arg3[%c1_169, %c2_170, %c0_171, %c0_172] : memref<2x3x32x32xbf16, #tpu.memory_space<vmem>>, vector<1x1x32x32xbf16>
    %375 = vector.shape_cast %374 : vector<1x1x32x32xbf16> to vector<32x32xbf16>
    %cst_173 = arith.constant dense<0.000000e+00> : vector<16x32xf32>
    %376 = tpu.matmul %321, %375, %cst_173 {dimension_numbers = #tpu.dot_dimension_numbers<[1], [0], [0], [1], [0, 0, 1, 1], [], []>} : vector<16x32xbf16>, vector<32x32xbf16>, vector<16x32xf32> -> vector<16x32xf32>
    %c1_174 = arith.constant 1 : index
    %c2_175 = arith.constant 2 : index
    %c0_176 = arith.constant 0 : index
    %c0_177 = arith.constant 0 : index
    %377 = vector.load %arg4[%c1_174, %c2_175, %c0_176, %c0_177] : memref<2x3x1x32xf32, #tpu.memory_space<vmem>>, vector<1x1x1x32xf32>
    %378 = vector.shape_cast %377 : vector<1x1x1x32xf32> to vector<1x32xf32>
    %379 = vector.broadcast %378 : vector<1x32xf32> to vector<16x32xf32>
    %380 = arith.addf %376, %379 : vector<16x32xf32>
    %cst_178 = arith.constant dense<0.000000e+00> : vector<16x32xf32>
    %381 = tpu.matmul %3, %380, %cst_178 {dimension_numbers = #tpu.dot_dimension_numbers<[1], [0], [0], [1], [0, 0, 1, 1], [], []>} : vector<16x16xf32>, vector<16x32xf32>, vector<16x32xf32> -> vector<16x32xf32>
    %cst_179 = arith.constant dense<0.000000e+00> : vector<16x32xf32>
    %382 = tpu.matmul %5, %380, %cst_179 {dimension_numbers = #tpu.dot_dimension_numbers<[1], [0], [0], [1], [0, 0, 1, 1], [], []>} : vector<16x16xf32>, vector<16x32xf32>, vector<16x32xf32> -> vector<16x32xf32>
    %c1_180 = arith.constant 1 : index
    %c2_181 = arith.constant 2 : index
    %c0_182 = arith.constant 0 : index
    %c0_183 = arith.constant 0 : index
    %383 = vector.load %arg5[%c1_180, %c2_181, %c0_182, %c0_183] : memref<2x3x3x32xf32, #tpu.memory_space<vmem>>, vector<1x1x3x32xf32>
    %384 = vector.shape_cast %383 : vector<1x1x3x32xf32> to vector<3x32xf32>
    %385 = vector.extract_strided_slice %384 {offsets = [0, 0], sizes = [1, 32], strides = [1, 1]} : vector<3x32xf32> to vector<1x32xf32>
    %386 = vector.broadcast %385 : vector<1x32xf32> to vector<16x32xf32>
    %387 = arith.mulf %386, %382 : vector<16x32xf32>
    %388 = vector.extract_strided_slice %384 {offsets = [1, 0], sizes = [1, 32], strides = [1, 1]} : vector<3x32xf32> to vector<1x32xf32>
    %389 = vector.broadcast %388 : vector<1x32xf32> to vector<16x32xf32>
    %390 = arith.mulf %389, %381 : vector<16x32xf32>
    %391 = arith.addf %387, %390 : vector<16x32xf32>
    %392 = vector.extract_strided_slice %384 {offsets = [2, 0], sizes = [1, 32], strides = [1, 1]} : vector<3x32xf32> to vector<1x32xf32>
    %393 = vector.broadcast %392 : vector<1x32xf32> to vector<16x32xf32>
    %394 = arith.mulf %393, %380 : vector<16x32xf32>
    %395 = arith.addf %391, %394 : vector<16x32xf32>
    %c1_184 = arith.constant 1 : index
    %c2_185 = arith.constant 2 : index
    %c0_186 = arith.constant 0 : index
    %c0_187 = arith.constant 0 : index
    %396 = vector.load %arg6[%c1_184, %c2_185, %c0_186, %c0_187] : memref<2x3x1x32xf32, #tpu.memory_space<vmem>>, vector<1x1x1x32xf32>
    %397 = vector.shape_cast %396 : vector<1x1x1x32xf32> to vector<1x32xf32>
    %398 = vector.broadcast %397 : vector<1x32xf32> to vector<16x32xf32>
    %399 = arith.addf %395, %398 : vector<16x32xf32>
    %400 = arith.mulf %399, %373 : vector<16x32xf32>
    %c1_188 = arith.constant 1 : index
    %c0_189 = arith.constant 0 : index
    %c0_190 = arith.constant 0 : index
    %c0_191 = arith.constant 0 : index
    %401 = vector.load %arg7[%c1_188, %c0_189, %c0_190, %c0_191] : memref<2x16x16x32xf32, #tpu.memory_space<vmem>>, vector<1x16x16x32xf32>
    %402 = vector.shape_cast %401 : vector<1x16x16x32xf32> to vector<16x16x32xf32>
    %403 = vector.extract_strided_slice %402 {offsets = [0, 0, 0], sizes = [1, 16, 32], strides = [1, 1, 1]} : vector<16x16x32xf32> to vector<1x16x32xf32>
    %404 = vector.shape_cast %403 : vector<1x16x32xf32> to vector<16x32xf32>
    %405 = vector.extract_strided_slice %400 {offsets = [0, 0], sizes = [1, 32], strides = [1, 1]} : vector<16x32xf32> to vector<1x32xf32>
    %406 = vector.broadcast %405 : vector<1x32xf32> to vector<16x32xf32>
    %407 = arith.mulf %404, %406 : vector<16x32xf32>
    %408 = vector.extract_strided_slice %402 {offsets = [1, 0, 0], sizes = [1, 16, 32], strides = [1, 1, 1]} : vector<16x16x32xf32> to vector<1x16x32xf32>
    %409 = vector.shape_cast %408 : vector<1x16x32xf32> to vector<16x32xf32>
    %410 = vector.extract_strided_slice %400 {offsets = [1, 0], sizes = [1, 32], strides = [1, 1]} : vector<16x32xf32> to vector<1x32xf32>
    %411 = vector.broadcast %410 : vector<1x32xf32> to vector<16x32xf32>
    %412 = arith.mulf %409, %411 : vector<16x32xf32>
    %413 = arith.addf %407, %412 : vector<16x32xf32>
    %414 = vector.extract_strided_slice %402 {offsets = [2, 0, 0], sizes = [1, 16, 32], strides = [1, 1, 1]} : vector<16x16x32xf32> to vector<1x16x32xf32>
    %415 = vector.shape_cast %414 : vector<1x16x32xf32> to vector<16x32xf32>
    %416 = vector.extract_strided_slice %400 {offsets = [2, 0], sizes = [1, 32], strides = [1, 1]} : vector<16x32xf32> to vector<1x32xf32>
    %417 = vector.broadcast %416 : vector<1x32xf32> to vector<16x32xf32>
    %418 = arith.mulf %415, %417 : vector<16x32xf32>
    %419 = arith.addf %413, %418 : vector<16x32xf32>
    %420 = vector.extract_strided_slice %402 {offsets = [3, 0, 0], sizes = [1, 16, 32], strides = [1, 1, 1]} : vector<16x16x32xf32> to vector<1x16x32xf32>
    %421 = vector.shape_cast %420 : vector<1x16x32xf32> to vector<16x32xf32>
    %422 = vector.extract_strided_slice %400 {offsets = [3, 0], sizes = [1, 32], strides = [1, 1]} : vector<16x32xf32> to vector<1x32xf32>
    %423 = vector.broadcast %422 : vector<1x32xf32> to vector<16x32xf32>
    %424 = arith.mulf %421, %423 : vector<16x32xf32>
    %425 = arith.addf %419, %424 : vector<16x32xf32>
    %426 = vector.extract_strided_slice %402 {offsets = [4, 0, 0], sizes = [1, 16, 32], strides = [1, 1, 1]} : vector<16x16x32xf32> to vector<1x16x32xf32>
    %427 = vector.shape_cast %426 : vector<1x16x32xf32> to vector<16x32xf32>
    %428 = vector.extract_strided_slice %400 {offsets = [4, 0], sizes = [1, 32], strides = [1, 1]} : vector<16x32xf32> to vector<1x32xf32>
    %429 = vector.broadcast %428 : vector<1x32xf32> to vector<16x32xf32>
    %430 = arith.mulf %427, %429 : vector<16x32xf32>
    %431 = arith.addf %425, %430 : vector<16x32xf32>
    %432 = vector.extract_strided_slice %402 {offsets = [5, 0, 0], sizes = [1, 16, 32], strides = [1, 1, 1]} : vector<16x16x32xf32> to vector<1x16x32xf32>
    %433 = vector.shape_cast %432 : vector<1x16x32xf32> to vector<16x32xf32>
    %434 = vector.extract_strided_slice %400 {offsets = [5, 0], sizes = [1, 32], strides = [1, 1]} : vector<16x32xf32> to vector<1x32xf32>
    %435 = vector.broadcast %434 : vector<1x32xf32> to vector<16x32xf32>
    %436 = arith.mulf %433, %435 : vector<16x32xf32>
    %437 = arith.addf %431, %436 : vector<16x32xf32>
    %438 = vector.extract_strided_slice %402 {offsets = [6, 0, 0], sizes = [1, 16, 32], strides = [1, 1, 1]} : vector<16x16x32xf32> to vector<1x16x32xf32>
    %439 = vector.shape_cast %438 : vector<1x16x32xf32> to vector<16x32xf32>
    %440 = vector.extract_strided_slice %400 {offsets = [6, 0], sizes = [1, 32], strides = [1, 1]} : vector<16x32xf32> to vector<1x32xf32>
    %441 = vector.broadcast %440 : vector<1x32xf32> to vector<16x32xf32>
    %442 = arith.mulf %439, %441 : vector<16x32xf32>
    %443 = arith.addf %437, %442 : vector<16x32xf32>
    %444 = vector.extract_strided_slice %402 {offsets = [7, 0, 0], sizes = [1, 16, 32], strides = [1, 1, 1]} : vector<16x16x32xf32> to vector<1x16x32xf32>
    %445 = vector.shape_cast %444 : vector<1x16x32xf32> to vector<16x32xf32>
    %446 = vector.extract_strided_slice %400 {offsets = [7, 0], sizes = [1, 32], strides = [1, 1]} : vector<16x32xf32> to vector<1x32xf32>
    %447 = vector.broadcast %446 : vector<1x32xf32> to vector<16x32xf32>
    %448 = arith.mulf %445, %447 : vector<16x32xf32>
    %449 = arith.addf %443, %448 : vector<16x32xf32>
    %450 = vector.extract_strided_slice %402 {offsets = [8, 0, 0], sizes = [1, 16, 32], strides = [1, 1, 1]} : vector<16x16x32xf32> to vector<1x16x32xf32>
    %451 = vector.shape_cast %450 : vector<1x16x32xf32> to vector<16x32xf32>
    %452 = vector.extract_strided_slice %400 {offsets = [8, 0], sizes = [1, 32], strides = [1, 1]} : vector<16x32xf32> to vector<1x32xf32>
    %453 = vector.broadcast %452 : vector<1x32xf32> to vector<16x32xf32>
    %454 = arith.mulf %451, %453 : vector<16x32xf32>
    %455 = arith.addf %449, %454 : vector<16x32xf32>
    %456 = vector.extract_strided_slice %402 {offsets = [9, 0, 0], sizes = [1, 16, 32], strides = [1, 1, 1]} : vector<16x16x32xf32> to vector<1x16x32xf32>
    %457 = vector.shape_cast %456 : vector<1x16x32xf32> to vector<16x32xf32>
    %458 = vector.extract_strided_slice %400 {offsets = [9, 0], sizes = [1, 32], strides = [1, 1]} : vector<16x32xf32> to vector<1x32xf32>
    %459 = vector.broadcast %458 : vector<1x32xf32> to vector<16x32xf32>
    %460 = arith.mulf %457, %459 : vector<16x32xf32>
    %461 = arith.addf %455, %460 : vector<16x32xf32>
    %462 = vector.extract_strided_slice %402 {offsets = [10, 0, 0], sizes = [1, 16, 32], strides = [1, 1, 1]} : vector<16x16x32xf32> to vector<1x16x32xf32>
    %463 = vector.shape_cast %462 : vector<1x16x32xf32> to vector<16x32xf32>
    %464 = vector.extract_strided_slice %400 {offsets = [10, 0], sizes = [1, 32], strides = [1, 1]} : vector<16x32xf32> to vector<1x32xf32>
    %465 = vector.broadcast %464 : vector<1x32xf32> to vector<16x32xf32>
    %466 = arith.mulf %463, %465 : vector<16x32xf32>
    %467 = arith.addf %461, %466 : vector<16x32xf32>
    %468 = vector.extract_strided_slice %402 {offsets = [11, 0, 0], sizes = [1, 16, 32], strides = [1, 1, 1]} : vector<16x16x32xf32> to vector<1x16x32xf32>
    %469 = vector.shape_cast %468 : vector<1x16x32xf32> to vector<16x32xf32>
    %470 = vector.extract_strided_slice %400 {offsets = [11, 0], sizes = [1, 32], strides = [1, 1]} : vector<16x32xf32> to vector<1x32xf32>
    %471 = vector.broadcast %470 : vector<1x32xf32> to vector<16x32xf32>
    %472 = arith.mulf %469, %471 : vector<16x32xf32>
    %473 = arith.addf %467, %472 : vector<16x32xf32>
    %474 = vector.extract_strided_slice %402 {offsets = [12, 0, 0], sizes = [1, 16, 32], strides = [1, 1, 1]} : vector<16x16x32xf32> to vector<1x16x32xf32>
    %475 = vector.shape_cast %474 : vector<1x16x32xf32> to vector<16x32xf32>
    %476 = vector.extract_strided_slice %400 {offsets = [12, 0], sizes = [1, 32], strides = [1, 1]} : vector<16x32xf32> to vector<1x32xf32>
    %477 = vector.broadcast %476 : vector<1x32xf32> to vector<16x32xf32>
    %478 = arith.mulf %475, %477 : vector<16x32xf32>
    %479 = arith.addf %473, %478 : vector<16x32xf32>
    %480 = vector.extract_strided_slice %402 {offsets = [13, 0, 0], sizes = [1, 16, 32], strides = [1, 1, 1]} : vector<16x16x32xf32> to vector<1x16x32xf32>
    %481 = vector.shape_cast %480 : vector<1x16x32xf32> to vector<16x32xf32>
    %482 = vector.extract_strided_slice %400 {offsets = [13, 0], sizes = [1, 32], strides = [1, 1]} : vector<16x32xf32> to vector<1x32xf32>
    %483 = vector.broadcast %482 : vector<1x32xf32> to vector<16x32xf32>
    %484 = arith.mulf %481, %483 : vector<16x32xf32>
    %485 = arith.addf %479, %484 : vector<16x32xf32>
    %486 = vector.extract_strided_slice %402 {offsets = [14, 0, 0], sizes = [1, 16, 32], strides = [1, 1, 1]} : vector<16x16x32xf32> to vector<1x16x32xf32>
    %487 = vector.shape_cast %486 : vector<1x16x32xf32> to vector<16x32xf32>
    %488 = vector.extract_strided_slice %400 {offsets = [14, 0], sizes = [1, 32], strides = [1, 1]} : vector<16x32xf32> to vector<1x32xf32>
    %489 = vector.broadcast %488 : vector<1x32xf32> to vector<16x32xf32>
    %490 = arith.mulf %487, %489 : vector<16x32xf32>
    %491 = arith.addf %485, %490 : vector<16x32xf32>
    %492 = vector.extract_strided_slice %402 {offsets = [15, 0, 0], sizes = [1, 16, 32], strides = [1, 1, 1]} : vector<16x16x32xf32> to vector<1x16x32xf32>
    %493 = vector.shape_cast %492 : vector<1x16x32xf32> to vector<16x32xf32>
    %494 = vector.extract_strided_slice %400 {offsets = [15, 0], sizes = [1, 32], strides = [1, 1]} : vector<16x32xf32> to vector<1x32xf32>
    %495 = vector.broadcast %494 : vector<1x32xf32> to vector<16x32xf32>
    %496 = arith.mulf %493, %495 : vector<16x32xf32>
    %497 = arith.addf %491, %496 : vector<16x32xf32>
    %c1_192 = arith.constant 1 : index
    %c0_193 = arith.constant 0 : index
    %c0_194 = arith.constant 0 : index
    %498 = vector.load %arg8[%c1_192, %c0_193, %c0_194] : memref<2x1x32xf32, #tpu.memory_space<vmem>>, vector<1x1x32xf32>
    %499 = vector.shape_cast %498 : vector<1x1x32xf32> to vector<1x32xf32>
    %500 = vector.broadcast %499 : vector<1x32xf32> to vector<16x32xf32>
    %501 = arith.mulf %400, %500 : vector<16x32xf32>
    %502 = arith.addf %497, %501 : vector<16x32xf32>
    %cst_195 = arith.constant 5.000000e-01 : f32
    %503 = vector.broadcast %cst_195 : f32 to vector<16x32xf32>
    %504 = arith.mulf %503, %502 : vector<16x32xf32>
    %cst_196 = arith.constant 0.707106769 : f32
    %505 = vector.broadcast %cst_196 : f32 to vector<16x32xf32>
    %506 = arith.mulf %502, %505 : vector<16x32xf32>
    %507 = math.absf %506 : vector<16x32xf32>
    %cst_197 = arith.constant 0.327591091 : f32
    %508 = vector.broadcast %cst_197 : f32 to vector<16x32xf32>
    %509 = arith.mulf %508, %507 : vector<16x32xf32>
    %cst_198 = arith.constant 1.000000e+00 : f32
    %510 = vector.broadcast %cst_198 : f32 to vector<16x32xf32>
    %511 = arith.addf %510, %509 : vector<16x32xf32>
    %cst_199 = arith.constant 1.000000e+00 : f32
    %512 = vector.broadcast %cst_199 : f32 to vector<16x32xf32>
    %513 = arith.divf %512, %511 : vector<16x32xf32>
    %cst_200 = arith.constant 1.06140542 : f32
    %514 = vector.broadcast %cst_200 : f32 to vector<16x32xf32>
    %515 = arith.mulf %514, %513 : vector<16x32xf32>
    %cst_201 = arith.constant -1.45315206 : f32
    %516 = vector.broadcast %cst_201 : f32 to vector<16x32xf32>
    %517 = arith.addf %515, %516 : vector<16x32xf32>
    %518 = arith.mulf %517, %513 : vector<16x32xf32>
    %cst_202 = arith.constant 1.42141378 : f32
    %519 = vector.broadcast %cst_202 : f32 to vector<16x32xf32>
    %520 = arith.addf %518, %519 : vector<16x32xf32>
    %521 = arith.mulf %520, %513 : vector<16x32xf32>
    %cst_203 = arith.constant -0.284496725 : f32
    %522 = vector.broadcast %cst_203 : f32 to vector<16x32xf32>
    %523 = arith.addf %521, %522 : vector<16x32xf32>
    %524 = arith.mulf %523, %513 : vector<16x32xf32>
    %cst_204 = arith.constant 0.254829586 : f32
    %525 = vector.broadcast %cst_204 : f32 to vector<16x32xf32>
    %526 = arith.addf %524, %525 : vector<16x32xf32>
    %527 = arith.mulf %526, %513 : vector<16x32xf32>
    %cst_205 = arith.constant 0.000000e+00 : f32
    %528 = vector.broadcast %cst_205 : f32 to vector<16x32xf32>
    %529 = arith.subf %528, %507 : vector<16x32xf32>
    %530 = arith.mulf %529, %507 : vector<16x32xf32>
    %531 = math.exp %530 : vector<16x32xf32>
    %532 = arith.mulf %527, %531 : vector<16x32xf32>
    %cst_206 = arith.constant 1.000000e+00 : f32
    %533 = vector.broadcast %cst_206 : f32 to vector<16x32xf32>
    %534 = arith.subf %533, %532 : vector<16x32xf32>
    %cst_207 = arith.constant 0.000000e+00 : f32
    %535 = vector.broadcast %cst_207 : f32 to vector<16x32xf32>
    %536 = arith.cmpf oge, %506, %535 : vector<16x32xf32>
    %cst_208 = arith.constant 0.000000e+00 : f32
    %537 = vector.broadcast %cst_208 : f32 to vector<16x32xf32>
    %538 = arith.subf %537, %534 : vector<16x32xf32>
    %539 = arith.select %536, %534, %538 : vector<16x32xi1>, vector<16x32xf32>
    %cst_209 = arith.constant 1.000000e+00 : f32
    %540 = vector.broadcast %cst_209 : f32 to vector<16x32xf32>
    %541 = arith.addf %540, %539 : vector<16x32xf32>
    %542 = arith.mulf %504, %541 : vector<16x32xf32>
    %543 = arith.mulf %542, %347 : vector<16x32xf32>
    %544 = arith.truncf %543 : vector<16x32xf32> to vector<16x32xbf16>
    %c1_210 = arith.constant 1 : index
    %c0_211 = arith.constant 0 : index
    %c0_212 = arith.constant 0 : index
    %545 = vector.load %arg9[%c1_210, %c0_211, %c0_212] : memref<2x32x32xbf16, #tpu.memory_space<vmem>>, vector<1x32x32xbf16>
    %546 = vector.shape_cast %545 : vector<1x32x32xbf16> to vector<32x32xbf16>
    %cst_213 = arith.constant dense<0.000000e+00> : vector<16x32xf32>
    %547 = tpu.matmul %544, %546, %cst_213 {dimension_numbers = #tpu.dot_dimension_numbers<[1], [0], [0], [1], [0, 0, 1, 1], [], []>} : vector<16x32xbf16>, vector<32x32xbf16>, vector<16x32xf32> -> vector<16x32xf32>
    %c1_214 = arith.constant 1 : index
    %c0_215 = arith.constant 0 : index
    %c0_216 = arith.constant 0 : index
    %548 = vector.load %arg10[%c1_214, %c0_215, %c0_216] : memref<2x1x32xf32, #tpu.memory_space<vmem>>, vector<1x1x32xf32>
    %549 = vector.shape_cast %548 : vector<1x1x32xf32> to vector<1x32xf32>
    %550 = vector.broadcast %549 : vector<1x32xf32> to vector<16x32xf32>
    %551 = arith.addf %547, %550 : vector<16x32xf32>
    %552 = arith.addf %551, %320 : vector<16x32xf32>
    %c1_217 = arith.constant 1 : index
    %c0_218 = arith.constant 0 : index
    %c0_219 = arith.constant 0 : index
    %553 = vector.load %arg11[%c1_217, %c0_218, %c0_219] : memref<2x1x32xf32, #tpu.memory_space<vmem>>, vector<1x1x32xf32>
    %554 = vector.shape_cast %553 : vector<1x1x32xf32> to vector<1x32xf32>
    %c1_220 = arith.constant 1 : index
    %c0_221 = arith.constant 0 : index
    %c0_222 = arith.constant 0 : index
    %555 = vector.load %arg12[%c1_220, %c0_221, %c0_222] : memref<2x1x32xf32, #tpu.memory_space<vmem>>, vector<1x1x32xf32>
    %556 = vector.shape_cast %555 : vector<1x1x32xf32> to vector<1x32xf32>
    %cst_223 = arith.constant dense<0.000000e+00> : vector<16xf32>
    %557 = vector.multi_reduction <add>, %552, %cst_223 [1] : vector<16x32xf32> to vector<16xf32>
    %558 = vector.shape_cast %557 : vector<16xf32> to vector<16x1xf32>
    %cst_224 = arith.constant 3.200000e+01 : f32
    %559 = vector.broadcast %cst_224 : f32 to vector<16x1xf32>
    %560 = arith.divf %558, %559 : vector<16x1xf32>
    %561 = vector.broadcast %560 : vector<16x1xf32> to vector<16x32xf32>
    %562 = arith.subf %552, %561 : vector<16x32xf32>
    %563 = arith.mulf %562, %562 : vector<16x32xf32>
    %cst_225 = arith.constant dense<0.000000e+00> : vector<16xf32>
    %564 = vector.multi_reduction <add>, %563, %cst_225 [1] : vector<16x32xf32> to vector<16xf32>
    %565 = vector.shape_cast %564 : vector<16xf32> to vector<16x1xf32>
    %cst_226 = arith.constant 3.200000e+01 : f32
    %566 = vector.broadcast %cst_226 : f32 to vector<16x1xf32>
    %567 = arith.divf %565, %566 : vector<16x1xf32>
    %568 = vector.broadcast %560 : vector<16x1xf32> to vector<16x32xf32>
    %569 = arith.subf %552, %568 : vector<16x32xf32>
    %cst_227 = arith.constant 9.99999974E-6 : f32
    %570 = vector.broadcast %cst_227 : f32 to vector<16x1xf32>
    %571 = arith.addf %567, %570 : vector<16x1xf32>
    %572 = math.rsqrt %571 : vector<16x1xf32>
    %573 = vector.broadcast %572 : vector<16x1xf32> to vector<16x32xf32>
    %574 = arith.mulf %569, %573 : vector<16x32xf32>
    %575 = vector.broadcast %554 : vector<1x32xf32> to vector<16x32xf32>
    %576 = arith.mulf %574, %575 : vector<16x32xf32>
    %577 = vector.broadcast %556 : vector<1x32xf32> to vector<16x32xf32>
    %578 = arith.addf %576, %577 : vector<16x32xf32>
    %579 = arith.truncf %578 : vector<16x32xf32> to vector<16x32xbf16>
    %c1_228 = arith.constant 1 : index
    %c0_229 = arith.constant 0 : index
    %c0_230 = arith.constant 0 : index
    %580 = vector.load %arg13[%c1_228, %c0_229, %c0_230] : memref<2x32x64xbf16, #tpu.memory_space<vmem>>, vector<1x32x64xbf16>
    %581 = vector.shape_cast %580 : vector<1x32x64xbf16> to vector<32x64xbf16>
    %cst_231 = arith.constant dense<0.000000e+00> : vector<16x64xf32>
    %582 = tpu.matmul %579, %581, %cst_231 {dimension_numbers = #tpu.dot_dimension_numbers<[1], [0], [0], [1], [0, 0, 1, 1], [], []>} : vector<16x32xbf16>, vector<32x64xbf16>, vector<16x64xf32> -> vector<16x64xf32>
    %c1_232 = arith.constant 1 : index
    %c0_233 = arith.constant 0 : index
    %c0_234 = arith.constant 0 : index
    %583 = vector.load %arg14[%c1_232, %c0_233, %c0_234] : memref<2x1x64xf32, #tpu.memory_space<vmem>>, vector<1x1x64xf32>
    %584 = vector.shape_cast %583 : vector<1x1x64xf32> to vector<1x64xf32>
    %585 = vector.broadcast %584 : vector<1x64xf32> to vector<16x64xf32>
    %586 = arith.addf %582, %585 : vector<16x64xf32>
    %cst_235 = arith.constant 5.000000e-01 : f32
    %587 = vector.broadcast %cst_235 : f32 to vector<16x64xf32>
    %588 = arith.mulf %587, %586 : vector<16x64xf32>
    %cst_236 = arith.constant 0.707106769 : f32
    %589 = vector.broadcast %cst_236 : f32 to vector<16x64xf32>
    %590 = arith.mulf %586, %589 : vector<16x64xf32>
    %591 = math.absf %590 : vector<16x64xf32>
    %cst_237 = arith.constant 0.327591091 : f32
    %592 = vector.broadcast %cst_237 : f32 to vector<16x64xf32>
    %593 = arith.mulf %592, %591 : vector<16x64xf32>
    %cst_238 = arith.constant 1.000000e+00 : f32
    %594 = vector.broadcast %cst_238 : f32 to vector<16x64xf32>
    %595 = arith.addf %594, %593 : vector<16x64xf32>
    %cst_239 = arith.constant 1.000000e+00 : f32
    %596 = vector.broadcast %cst_239 : f32 to vector<16x64xf32>
    %597 = arith.divf %596, %595 : vector<16x64xf32>
    %cst_240 = arith.constant 1.06140542 : f32
    %598 = vector.broadcast %cst_240 : f32 to vector<16x64xf32>
    %599 = arith.mulf %598, %597 : vector<16x64xf32>
    %cst_241 = arith.constant -1.45315206 : f32
    %600 = vector.broadcast %cst_241 : f32 to vector<16x64xf32>
    %601 = arith.addf %599, %600 : vector<16x64xf32>
    %602 = arith.mulf %601, %597 : vector<16x64xf32>
    %cst_242 = arith.constant 1.42141378 : f32
    %603 = vector.broadcast %cst_242 : f32 to vector<16x64xf32>
    %604 = arith.addf %602, %603 : vector<16x64xf32>
    %605 = arith.mulf %604, %597 : vector<16x64xf32>
    %cst_243 = arith.constant -0.284496725 : f32
    %606 = vector.broadcast %cst_243 : f32 to vector<16x64xf32>
    %607 = arith.addf %605, %606 : vector<16x64xf32>
    %608 = arith.mulf %607, %597 : vector<16x64xf32>
    %cst_244 = arith.constant 0.254829586 : f32
    %609 = vector.broadcast %cst_244 : f32 to vector<16x64xf32>
    %610 = arith.addf %608, %609 : vector<16x64xf32>
    %611 = arith.mulf %610, %597 : vector<16x64xf32>
    %cst_245 = arith.constant 0.000000e+00 : f32
    %612 = vector.broadcast %cst_245 : f32 to vector<16x64xf32>
    %613 = arith.subf %612, %591 : vector<16x64xf32>
    %614 = arith.mulf %613, %591 : vector<16x64xf32>
    %615 = math.exp %614 : vector<16x64xf32>
    %616 = arith.mulf %611, %615 : vector<16x64xf32>
    %cst_246 = arith.constant 1.000000e+00 : f32
    %617 = vector.broadcast %cst_246 : f32 to vector<16x64xf32>
    %618 = arith.subf %617, %616 : vector<16x64xf32>
    %cst_247 = arith.constant 0.000000e+00 : f32
    %619 = vector.broadcast %cst_247 : f32 to vector<16x64xf32>
    %620 = arith.cmpf oge, %590, %619 : vector<16x64xf32>
    %cst_248 = arith.constant 0.000000e+00 : f32
    %621 = vector.broadcast %cst_248 : f32 to vector<16x64xf32>
    %622 = arith.subf %621, %618 : vector<16x64xf32>
    %623 = arith.select %620, %618, %622 : vector<16x64xi1>, vector<16x64xf32>
    %cst_249 = arith.constant 1.000000e+00 : f32
    %624 = vector.broadcast %cst_249 : f32 to vector<16x64xf32>
    %625 = arith.addf %624, %623 : vector<16x64xf32>
    %626 = arith.mulf %588, %625 : vector<16x64xf32>
    %627 = arith.truncf %626 : vector<16x64xf32> to vector<16x64xbf16>
    %c1_250 = arith.constant 1 : index
    %c0_251 = arith.constant 0 : index
    %c0_252 = arith.constant 0 : index
    %628 = vector.load %arg15[%c1_250, %c0_251, %c0_252] : memref<2x64x32xbf16, #tpu.memory_space<vmem>>, vector<1x64x32xbf16>
    %629 = vector.shape_cast %628 : vector<1x64x32xbf16> to vector<64x32xbf16>
    %cst_253 = arith.constant dense<0.000000e+00> : vector<16x32xf32>
    %630 = tpu.matmul %627, %629, %cst_253 {dimension_numbers = #tpu.dot_dimension_numbers<[1], [0], [0], [1], [0, 0, 1, 1], [], []>} : vector<16x64xbf16>, vector<64x32xbf16>, vector<16x32xf32> -> vector<16x32xf32>
    %c1_254 = arith.constant 1 : index
    %c0_255 = arith.constant 0 : index
    %c0_256 = arith.constant 0 : index
    %631 = vector.load %arg16[%c1_254, %c0_255, %c0_256] : memref<2x1x32xf32, #tpu.memory_space<vmem>>, vector<1x1x32xf32>
    %632 = vector.shape_cast %631 : vector<1x1x32xf32> to vector<1x32xf32>
    %633 = vector.broadcast %632 : vector<1x32xf32> to vector<16x32xf32>
    %634 = arith.addf %630, %633 : vector<16x32xf32>
    %635 = arith.addf %634, %552 : vector<16x32xf32>
    %c0_257 = arith.constant 0 : index
    %c0_258 = arith.constant 0 : index
    %636 = vector.load %arg17[%c0_257, %c0_258] : memref<1x32xf32, #tpu.memory_space<vmem>>, vector<1x32xf32>
    %c0_259 = arith.constant 0 : index
    %c0_260 = arith.constant 0 : index
    %637 = vector.load %arg18[%c0_259, %c0_260] : memref<1x32xf32, #tpu.memory_space<vmem>>, vector<1x32xf32>
    %cst_261 = arith.constant dense<0.000000e+00> : vector<16xf32>
    %638 = vector.multi_reduction <add>, %635, %cst_261 [1] : vector<16x32xf32> to vector<16xf32>
    %639 = vector.shape_cast %638 : vector<16xf32> to vector<16x1xf32>
    %cst_262 = arith.constant 3.200000e+01 : f32
    %640 = vector.broadcast %cst_262 : f32 to vector<16x1xf32>
    %641 = arith.divf %639, %640 : vector<16x1xf32>
    %642 = vector.broadcast %641 : vector<16x1xf32> to vector<16x32xf32>
    %643 = arith.subf %635, %642 : vector<16x32xf32>
    %644 = arith.mulf %643, %643 : vector<16x32xf32>
    %cst_263 = arith.constant dense<0.000000e+00> : vector<16xf32>
    %645 = vector.multi_reduction <add>, %644, %cst_263 [1] : vector<16x32xf32> to vector<16xf32>
    %646 = vector.shape_cast %645 : vector<16xf32> to vector<16x1xf32>
    %cst_264 = arith.constant 3.200000e+01 : f32
    %647 = vector.broadcast %cst_264 : f32 to vector<16x1xf32>
    %648 = arith.divf %646, %647 : vector<16x1xf32>
    %649 = vector.broadcast %641 : vector<16x1xf32> to vector<16x32xf32>
    %650 = arith.subf %635, %649 : vector<16x32xf32>
    %cst_265 = arith.constant 9.99999974E-6 : f32
    %651 = vector.broadcast %cst_265 : f32 to vector<16x1xf32>
    %652 = arith.addf %648, %651 : vector<16x1xf32>
    %653 = math.rsqrt %652 : vector<16x1xf32>
    %654 = vector.broadcast %653 : vector<16x1xf32> to vector<16x32xf32>
    %655 = arith.mulf %650, %654 : vector<16x32xf32>
    %656 = vector.broadcast %636 : vector<1x32xf32> to vector<16x32xf32>
    %657 = arith.mulf %655, %656 : vector<16x32xf32>
    %658 = vector.broadcast %637 : vector<1x32xf32> to vector<16x32xf32>
    %659 = arith.addf %657, %658 : vector<16x32xf32>
    %c0_266 = arith.constant 0 : index
    %c0_267 = arith.constant 0 : index
    %c0_268 = arith.constant 0 : index
    %660 = vector.load %arg19[%c0_266, %c0_267, %c0_268] : memref<1x16x32xf32, #tpu.memory_space<vmem>>, vector<1x16x32xf32>
    %661 = vector.shape_cast %660 : vector<1x16x32xf32> to vector<16x32xf32>
    %662 = vector.shape_cast %659 : vector<16x32xf32> to vector<1x16x32xf32>
    tpu.vector_store %arg19[%c0_266, %c0_267, %c0_268], %662 {strides = array<i32>} : memref<1x16x32xf32, #tpu.memory_space<vmem>>, vector<1x16x32xf32>,
    return
  }
  func.func @transform_0(%arg0: i32) -> (i32, i32, i32) {
    %c0_i32 = arith.constant 0 : i32
    %c0_i32_0 = arith.constant 0 : i32
    %c0_i32_1 = arith.constant 0 : i32
    return %arg0, %c0_i32, %c0_i32_0 : i32, i32, i32
  }
  func.func @transform_1(%arg0: i32) -> (i32, i32, i32) {
    %c0_i32 = arith.constant 0 : i32
    %c0_i32_0 = arith.constant 0 : i32
    %c0_i32_1 = arith.constant 0 : i32
    %c0_i32_2 = arith.constant 0 : i32
    return %c0_i32, %c0_i32_0, %c0_i32_1 : i32, i32, i32
  }
  func.func @transform_2(%arg0: i32) -> (i32, i32, i32, i32) {
    %c0_i32 = arith.constant 0 : i32
    %c0_i32_0 = arith.constant 0 : i32
    %c0_i32_1 = arith.constant 0 : i32
    %c0_i32_2 = arith.constant 0 : i32
    %c0_i32_3 = arith.constant 0 : i32
    return %c0_i32, %c0_i32_0, %c0_i32_1, %c0_i32_2 : i32, i32, i32, i32
  }
  func.func @transform_3(%arg0: i32) -> (i32, i32, i32, i32) {
    %c0_i32 = arith.constant 0 : i32
    %c0_i32_0 = arith.constant 0 : i32
    %c0_i32_1 = arith.constant 0 : i32
    %c0_i32_2 = arith.constant 0 : i32
    %c0_i32_3 = arith.constant 0 : i32
    return %c0_i32, %c0_i32_0, %c0_i32_1, %c0_i32_2 : i32, i32, i32, i32
  }
  func.func @transform_4(%arg0: i32) -> (i32, i32, i32, i32) {
    %c0_i32 = arith.constant 0 : i32
    %c0_i32_0 = arith.constant 0 : i32
    %c0_i32_1 = arith.constant 0 : i32
    %c0_i32_2 = arith.constant 0 : i32
    %c0_i32_3 = arith.constant 0 : i32
    return %c0_i32, %c0_i32_0, %c0_i32_1, %c0_i32_2 : i32, i32, i32, i32
  }
  func.func @transform_5(%arg0: i32) -> (i32, i32, i32, i32) {
    %c0_i32 = arith.constant 0 : i32
    %c0_i32_0 = arith.constant 0 : i32
    %c0_i32_1 = arith.constant 0 : i32
    %c0_i32_2 = arith.constant 0 : i32
    %c0_i32_3 = arith.constant 0 : i32
    return %c0_i32, %c0_i32_0, %c0_i32_1, %c0_i32_2 : i32, i32, i32, i32
  }
  func.func @transform_6(%arg0: i32) -> (i32, i32, i32, i32) {
    %c0_i32 = arith.constant 0 : i32
    %c0_i32_0 = arith.constant 0 : i32
    %c0_i32_1 = arith.constant 0 : i32
    %c0_i32_2 = arith.constant 0 : i32
    %c0_i32_3 = arith.constant 0 : i32
    return %c0_i32, %c0_i32_0, %c0_i32_1, %c0_i32_2 : i32, i32, i32, i32
  }
  func.func @transform_7(%arg0: i32) -> (i32, i32, i32) {
    %c0_i32 = arith.constant 0 : i32
    %c0_i32_0 = arith.constant 0 : i32
    %c0_i32_1 = arith.constant 0 : i32
    %c0_i32_2 = arith.constant 0 : i32
    return %c0_i32, %c0_i32_0, %c0_i32_1 : i32, i32, i32
  }
  func.func @transform_8(%arg0: i32) -> (i32, i32, i32) {
    %c0_i32 = arith.constant 0 : i32
    %c0_i32_0 = arith.constant 0 : i32
    %c0_i32_1 = arith.constant 0 : i32
    %c0_i32_2 = arith.constant 0 : i32
    return %c0_i32, %c0_i32_0, %c0_i32_1 : i32, i32, i32
  }
  func.func @transform_9(%arg0: i32) -> (i32, i32, i32) {
    %c0_i32 = arith.constant 0 : i32
    %c0_i32_0 = arith.constant 0 : i32
    %c0_i32_1 = arith.constant 0 : i32
    %c0_i32_2 = arith.constant 0 : i32
    return %c0_i32, %c0_i32_0, %c0_i32_1 : i32, i32, i32
  }
  func.func @transform_10(%arg0: i32) -> (i32, i32, i32) {
    %c0_i32 = arith.constant 0 : i32
    %c0_i32_0 = arith.constant 0 : i32
    %c0_i32_1 = arith.constant 0 : i32
    %c0_i32_2 = arith.constant 0 : i32
    return %c0_i32, %c0_i32_0, %c0_i32_1 : i32, i32, i32
  }
  func.func @transform_11(%arg0: i32) -> (i32, i32, i32) {
    %c0_i32 = arith.constant 0 : i32
    %c0_i32_0 = arith.constant 0 : i32
    %c0_i32_1 = arith.constant 0 : i32
    %c0_i32_2 = arith.constant 0 : i32
    return %c0_i32, %c0_i32_0, %c0_i32_1 : i32, i32, i32
  }
  func.func @transform_12(%arg0: i32) -> (i32, i32, i32) {
    %c0_i32 = arith.constant 0 : i32
    %c0_i32_0 = arith.constant 0 : i32
    %c0_i32_1 = arith.constant 0 : i32
    %c0_i32_2 = arith.constant 0 : i32
    return %c0_i32, %c0_i32_0, %c0_i32_1 : i32, i32, i32
  }
  func.func @transform_13(%arg0: i32) -> (i32, i32, i32) {
    %c0_i32 = arith.constant 0 : i32
    %c0_i32_0 = arith.constant 0 : i32
    %c0_i32_1 = arith.constant 0 : i32
    %c0_i32_2 = arith.constant 0 : i32
    return %c0_i32, %c0_i32_0, %c0_i32_1 : i32, i32, i32
  }
  func.func @transform_14(%arg0: i32) -> (i32, i32, i32) {
    %c0_i32 = arith.constant 0 : i32
    %c0_i32_0 = arith.constant 0 : i32
    %c0_i32_1 = arith.constant 0 : i32
    %c0_i32_2 = arith.constant 0 : i32
    return %c0_i32, %c0_i32_0, %c0_i32_1 : i32, i32, i32
  }
  func.func @transform_15(%arg0: i32) -> (i32, i32, i32) {
    %c0_i32 = arith.constant 0 : i32
    %c0_i32_0 = arith.constant 0 : i32
    %c0_i32_1 = arith.constant 0 : i32
    %c0_i32_2 = arith.constant 0 : i32
    return %c0_i32, %c0_i32_0, %c0_i32_1 : i32, i32, i32
  }
  func.func @transform_16(%arg0: i32) -> (i32, i32) {
    %c0_i32 = arith.constant 0 : i32
    %c0_i32_0 = arith.constant 0 : i32
    %c0_i32_1 = arith.constant 0 : i32
    return %c0_i32, %c0_i32_0 : i32, i32
  }
  func.func @transform_17(%arg0: i32) -> (i32, i32) {
    %c0_i32 = arith.constant 0 : i32
    %c0_i32_0 = arith.constant 0 : i32
    %c0_i32_1 = arith.constant 0 : i32
    return %c0_i32, %c0_i32_0 : i32, i32
  }
  func.func @transform_18(%arg0: i32) -> (i32, i32, i32) {
    %c0_i32 = arith.constant 0 : i32
    %c0_i32_0 = arith.constant 0 : i32
    %c0_i32_1 = arith.constant 0 : i32
    return %arg0, %c0_i32, %c0_i32_0 : i32, i32, i32
  }
}

</mosaic_0001>

<bundles_post_ra>
// kernel: transformer_forward.1
= control target key start
LH: loop header
LB: loop body
LE: loop exit
PB: predicated region body
PF: predicated region fallthrough
CT: control target
= control target key end

     0   :  { %s5438_s0 = inlined_call_operand.vmem [shape: f32[2,16,32], index: 0, kind: input, shape index: {}]   ;;  %s5439_s1 = inlined_call_operand.vmem [shape: f32[2,16,16], index: 1, kind: input, shape index: {}]   ;;  %s5440_s2 = inlined_call_operand.vmem [shape: bf16[2,3,32,32], index: 2, kind: input, shape index: {}]   ;;  %s5441_s3 = inlined_call_operand.hbm [shape: f32[2,3,1,32], index: 3, kind: input, shape index: {}]   ;;  %s5442_s4 = inlined_call_operand.vmem [shape: f32[2,3,3,32], index: 4, kind: input, shape index: {}]   ;;  %s5443_s5 = inlined_call_operand.hbm [shape: f32[2,3,1,32], index: 5, kind: input, shape index: {}]   ;;  %s5444_s6 = inlined_call_operand.hbm [shape: f32[2,16,16,32], index: 6, kind: input, shape index: {}]   ;;  %s5445_s7 = inlined_call_operand.vmem [shape: f32[2,1,32], index: 7, kind: input, shape index: {}]   ;;  %s5446_s8 = inlined_call_operand.hbm [shape: bf16[2,32,32], index: 8, kind: input, shape index: {}]   ;;  %s5447_s9 = inlined_call_operand.vmem [shape: f32[2,1,32], index: 9, kind: input, shape index: {}]   ;;  %s5448_s10 = inlined_call_operand.hbm [shape: f32[2,1,32], index: 10, kind: input, shape index: {}]   ;;  %s5449_s11 = inlined_call_operand.hbm [shape: f32[2,1,32], index: 11, kind: input, shape index: {}]   ;;  %s5450_s12 = inlined_call_operand.hbm [shape: bf16[2,32,64], index: 12, kind: input, shape index: {}]   ;;  %s5451_s13 = inlined_call_operand.hbm [shape: f32[2,1,64], index: 13, kind: input, shape index: {}]   ;;  %s5452_s14 = inlined_call_operand.vmem [shape: bf16[2,64,32], index: 14, kind: input, shape index: {}]   ;;  %s5453_s15 = inlined_call_operand.hbm [shape: f32[2,1,32], index: 15, kind: input, shape index: {}]   ;;  %s5454_s16 = inlined_call_operand.vmem [shape: f32[1,32], index: 16, kind: input, shape index: {}]   ;;  %s5455_s17 = inlined_call_operand.hbm [shape: f32[1,32], index: 17, kind: input, shape index: {}]   ;;  %s5456_s18 = inlined_call_operand.hbm [shape: f32[2,16,32], index: 18, kind: output, shape index: {}]  }
   0x1   :  { %5472 = sst [smem:[#allocation33_spill]] %s5438_s0 }
   0x2   :  { %5473 = sst [smem:[#allocation34_spill]] %s5439_s1 }
   0x3   :  { %5474 = sst [smem:[#allocation35_spill]] %s5440_s2 }
   0x4   :  { %5475 = sst [smem:[#allocation36_spill]] %s5441_s3 }
   0x5   :  { %5476 = sst [smem:[#allocation37_spill]] %s5443_s5 }
   0x6   :  { %5477 = sst [smem:[#allocation38_spill]] %s5446_s8 }
   0x7   :  { %5478 = sst [smem:[#allocation39_spill]] %s5449_s11 }
   0x8   :  { %23 = vsyncpa [#allocation3], 0 }
   0x9   :  { %24 = vsyncpa [#allocation6], 0 }
   0xa   :  { %25 = vsyncpa [#allocation9], 0 }
   0xb   :  { %26 = vsyncpa [#allocation12], 0 }
   0xc   :  { %27 = vsyncpa [#allocation15], 0 }
   0xd   :  { %28 = vsyncpa [#allocation18], 0 }
   0xe   :  { %29 = vsyncpa [#allocation4], 0 }
   0xf   :  { %31 = vsyncpa [#allocation4 + $0x1], 0  ;;  %s4699_s27 = smov 0   ;;  %s4701_s28 = smov 0  }
  0x10   :  { %s4703_s29 = smov 0   ;;  %s4705_s30 = smov 0  }
  0x11 LB: > { %5479 = sst [smem:[#allocation27_spill]] %s4569_s27  ;;  %s4720_s0 = sadd.s32 4294967295, %s4581_s30   ;;  %s4581_s30 = sphi %s4705_s30, %s5517_s30   ;;  %s4577_s29 = sphi %s4703_s29, %s5519_s29   ;;  %s4573_s28 = sphi %s4701_s28, %s5521_s28   ;;  %s4569_s27 = sphi %s4699_s27, %s5520_s27  }
  0x12   : > { %5480 = sst [smem:[#allocation28_spill]] %s4577_s29  ;;  %s3574_s19 = sadd.s32 4294967294, %s4581_s30  }
  0x13   : > { %5481 = sst [smem:[#allocation29_spill]] %s4581_s30  ;;  %s4724_s1 = sadd.s32 1, %s4581_s30  }
  0x14   : > { %5482 = sst [smem:[#allocation30_spill]] %s4724_s1  ;;  %s427_s20 = sadd.s32 1, %s4577_s29 }
  0x15   : > { %s424_s21 = ssub.s32 %s4581_s30, %s4724_s1  ;;  %p437_p0 = scmp.ne.s32.totalorder %s4577_s29, %s4573_s28 }
  0x16   : > { %p425_p1 = scmp.eq.s32.totalorder %s424_s21, 0  ;;  %p438_p2 = scmp.eq.s32.totalorder %s4720_s0, 1 }
  0x17   : > { %p443_p3 = scmp.ne.s32.totalorder %s4573_s28, %s4569_s27  ;;  %p444_p4 = scmp.eq.s32.totalorder %s3574_s19, 1 }
  0x18   : > { %s4735_s22 = scalar_select %p425_p1, %s4577_s29, %s427_s20  }
  0x19   : > { %p4737_p5 = por %p438_p2, %p437_p0  ;;  %p4741_p6 = por %p444_p4, %p443_p3 }
  0x1a   : > { %5483 = sst [smem:[#allocation31_spill]] %s4735_s22  ;;  %p3575_p7 = scmp.ge.s32.totalorder %s4581_s30, 1 }
  0x1b   : > { %s5485_s23 = scalar_select %p4741_p6, 1, 0 }
  0x1c   : > { %p451_p8 = scmp.lt.s32.totalorder %s4581_s30, 3  ;;  %p5469_p9 = scmp.eq.s32.totalorder %s4720_s0, 0 }
  0x1d   : > { %5486 = sst [smem:[#allocation32_spill]] %s5485_s23  ;;  %s4583_s25 = smov [#allocation5]  }
  0x1e   : > { %p4748_p10 = pnand %p3575_p7, %p451_p8  ;;  %s485_s26 = sshll.u32 %s4583_s25, 4  ;;  %s486_s26 = int_to_ptr.vmem [resolvable:$true] %s485_s26 }
  0x1f   : > { %s4584_s20 = smov [#allocation8]   ;;  %s4248_s29 = scalar_lea.vmem %s486_s26, 96 }
  0x20   : > { %p4053_p11 = pneg %p4748_p10  ;;  %s514_s21 = sshll.u32 %s4584_s20, 4  ;;  %s515_s21 = int_to_ptr.vmem [resolvable:$true] %s514_s21 }
  0x21   : > { %p4249_p0 = scmp.ne.s32.totalorder %s486_s26, %s4248_s29  ;;  %p4256_p3 = scmp.lt.s32.totalorder %s486_s26, %s486_s26 }
  0x22   : > { %p4756_p12 = pnand %p5469_p9, %p4053_p11  ;;  %p4257_p4 = scmp.lt.s32.totalorder %s4248_s29, %s4248_s29 }
  0x24   : > { %p4762_p13 = pneg %p4756_p12  ;;  %p4258_p7 = por %p4257_p4, %p4256_p3 }
  0x26   : > { %p4251_p1 = pnand %p4249_p0, %p4762_p13 }
  0x28   : > { %p4252_p2 = pneg %p4251_p1 }
  0x2a   : > { %p4259_p8 = pnand %p4258_p7, %p4252_p2 }
  0x2c   : > { %4262 = shalt.err (!%p4259_p8)
}
  0x2d   : > { %s5465_s25 = smov 16   ;;  %s5467_s20 = smov 1  }
  0x2e   : > { %s5490_s5 = sld [smem:[#allocation37_spill]]  ;;  %s4274_s27 = scalar_lea.vmem %s515_s21, 512 }
  0x2f   : > { %p4275_p11 = scmp.ne.s32.totalorder %s515_s21, %s4274_s27  ;;  %p4282_p3 = scmp.lt.s32.totalorder %s515_s21, %s515_s21 }
  0x30   : > { %p4283_p2 = scmp.lt.s32.totalorder %s4274_s27, %s4274_s27 }
  0x31   : > { %p4277_p0 = pnand %p4275_p11, %p4762_p13 }
  0x32   : > { %p4284_p4 = por %p4283_p2, %p4282_p3 }
  0x33   : > { %p4278_p1 = pneg %p4277_p0 }
  0x34   : > { %4059 = dma.hbm_to_vmem [thread:$0]  (!%p4756_p12), %s5490_s5, 96, %s486_s26, [#allocation6], %s5465_s25, %s5465_s25, %s5467_s20  }
  0x35   : > { %p4285_p7 = pnand %p4284_p4, %p4278_p1 }
  0x37   : > { %4288 = shalt.err (!%p4285_p7)
}
  0x38   : > { %s5470_s29 = smov 64   ;;  %s5471_s30 = smov 4  }
  0x39   : > { %s5491_s8 = sld [smem:[#allocation38_spill]]  ;;  %s4589_s26 = smov [#allocation11]  }
  0x3a   : > { %s543_s25 = sshll.u32 %s4589_s26, 4  ;;  %s4590_s20 = smov [#allocation14]   ;;  %s544_s25 = int_to_ptr.vmem [resolvable:$true] %s543_s25 }
  0x3b   : > { %s569_s5 = sshll.u32 %s4590_s20, 4  ;;  %s4300_s27 = scalar_lea.vmem %s544_s25, 32  ;;  %s570_s5 = int_to_ptr.vmem [resolvable:$true] %s569_s5 }
  0x3c   : > { %p4301_p8 = scmp.ne.s32.totalorder %s544_s25, %s4300_s27  ;;  %p4308_p1 = scmp.lt.s32.totalorder %s544_s25, %s544_s25 }
  0x3d   : > { %p4309_p3 = scmp.lt.s32.totalorder %s4300_s27, %s4300_s27 }
  0x3e   : > { %p4303_p11 = pnand %p4301_p8, %p4762_p13 }
  0x3f   : > { %4065 = dma.hbm_to_vmem [thread:$0]  (!%p4756_p12), %s5491_s8, 512, %s515_s21, [#allocation9], %s5470_s29, %s5470_s29, %s5471_s30  }
  0x40   : > { %p4304_p0 = pneg %p4303_p11  ;;  %p4310_p2 = por %p4309_p3, %p4308_p1 }
  0x42   : > { %p4311_p4 = pnand %p4310_p2, %p4304_p0 }
  0x44   : > { %4314 = shalt.err (!%p4311_p4)
}
  0x45   : > { %s5492_s1 = smov 1   ;;  %s5493_s21 = smov 16  }
  0x46   : > { %s5494_s11 = sld [smem:[#allocation39_spill]]  ;;  %s4326_s20 = scalar_lea.vmem %s570_s5, 32 }
  0x47   : > { %p4327_p7 = scmp.ne.s32.totalorder %s570_s5, %s4326_s20  ;;  %p4334_p9 = scmp.lt.s32.totalorder %s570_s5, %s570_s5 }
  0x48   : > { %p4335_p6 = scmp.lt.s32.totalorder %s4326_s20, %s4326_s20 }
  0x49   : > { %p4329_p8 = pnand %p4327_p7, %p4762_p13 }
  0x4a   : > { %p4336_p1 = por %p4335_p6, %p4334_p9 }
  0x4b   : > { %p4330_p11 = pneg %p4329_p8 }
  0x4c   : > { %4071 = dma.hbm_to_vmem [thread:$0]  (!%p4756_p12), %s5494_s11, 32, %s544_s25, [#allocation12], %s5493_s21, %s5493_s21, %s5492_s1  }
  0x4d   : > { %p4337_p0 = pnand %p4336_p1, %p4330_p11 }
  0x4f   : > { %4340 = shalt.err (!%p4337_p0)
}
  0x50   : > { %4077 = dma.hbm_to_vmem [thread:$0]  (!%p4756_p12), %s5451_s13, 32, %s570_s5, [#allocation15], %s5493_s21, %s5493_s21, %s5492_s1  }
  0x51   : > { %s4591_s25 = smov [#allocation2]   ;;  %s4592_s26 = smov [#allocation7]  }
  0x52   : > { %s469_s23 = sshll.u32 %s4591_s25, 4  ;;  %s498_s30 = sshll.u32 %s4592_s26, 4  ;;  %s470_s23 = int_to_ptr.vmem [resolvable:$true] %s469_s23  ;;  %s499_s30 = int_to_ptr.vmem [resolvable:$true] %s498_s30 }
  0x53   : > { %s4352_s20 = scalar_lea.vmem %s470_s23, 96  ;;  %p4360_p2 = scmp.lt.s32.totalorder %s470_s23, %s470_s23 }
  0x54   : > { %p4353_p6 = scmp.ne.s32.totalorder %s470_s23, %s4352_s20  ;;  %p4361_p4 = scmp.lt.s32.totalorder %s4352_s20, %s4352_s20 }
  0x56   : > { %p4355_p9 = pnand %p4353_p6, %p4762_p13  ;;  %p4362_p7 = por %p4361_p4, %p4360_p2 }
  0x58   : > { %p4356_p3 = pneg %p4355_p9 }
  0x5a   : > { %p4363_p8 = pnand %p4362_p7, %p4356_p3 }
  0x5c   : > { %4366 = shalt.err (!%p4363_p8)
}
  0x5d   : > { %s5495_s3 = sld [smem:[#allocation36_spill]]  ;;  %s4378_s27 = scalar_lea.vmem %s499_s30, 8192 }
  0x5e   : > { %p4379_p11 = scmp.ne.s32.totalorder %s499_s30, %s4378_s27  ;;  %p4386_p6 = scmp.lt.s32.totalorder %s499_s30, %s499_s30 }
  0x5f   : > { %p4387_p9 = scmp.lt.s32.totalorder %s4378_s27, %s4378_s27 }
  0x60   : > { %p4381_p1 = pnand %p4379_p11, %p4762_p13 }
  0x61   : > { %p4388_p2 = por %p4387_p9, %p4386_p6 }
  0x62   : > { %p4382_p0 = pneg %p4381_p1 }
  0x63   : > { %4056 = dma.hbm_to_vmem [thread:$0]  (!%p4756_p12), %s5495_s3, 96, %s470_s23, [#allocation3], %s5493_s21, %s5493_s21, %s5492_s1  }
  0x64   : > { %p4389_p3 = pnand %p4388_p2, %p4382_p0 }
  0x66   : > { %4392 = shalt.err (!%p4389_p3)
}
  0x67   : > { %s4593_s25 = smov 128   ;;  %s4594_s26 = smov 8  }
  0x68   : > { %4062 = dma.hbm_to_vmem [thread:$0]  (!%p4756_p12), %s5444_s6, 8192, %s499_s30, [#allocation6], %s4593_s25, %s4593_s25, %s4594_s26  }
  0x69   : > { %s4595_s23 = smov [#allocation10]   ;;  %s4596_s29 = smov [#allocation13]  }
  0x6a   : > { %s530_s5 = sshll.u32 %s4595_s23, 4  ;;  %s556_s3 = sshll.u32 %s4596_s29, 4  ;;  %s531_s5 = int_to_ptr.vmem [resolvable:$true] %s530_s5  ;;  %s557_s3 = int_to_ptr.vmem [resolvable:$true] %s556_s3 }
  0x6b   : > { %s4404_s11 = scalar_lea.vmem %s531_s5, 32  ;;  %p4412_p11 = scmp.lt.s32.totalorder %s531_s5, %s531_s5 }
  0x6c   : > { %p4405_p4 = scmp.ne.s32.totalorder %s531_s5, %s4404_s11  ;;  %p4413_p1 = scmp.lt.s32.totalorder %s4404_s11, %s4404_s11 }
  0x6e   : > { %p4407_p7 = pnand %p4405_p4, %p4762_p13  ;;  %p4414_p0 = por %p4413_p1, %p4412_p11 }
  0x70   : > { %p4408_p8 = pneg %p4407_p7 }
  0x72   : > { %p4415_p6 = pnand %p4414_p0, %p4408_p8 }
  0x74   : > { %4418 = shalt.err (!%p4415_p6)
}
  0x75   : > { %4068 = dma.hbm_to_vmem [thread:$0]  (!%p4756_p12), %s5448_s10, 32, %s531_s5, [#allocation9], %s5493_s21, %s5493_s21, %s5492_s1  }
  0x76   : > { %s4430_s27 = scalar_lea.vmem %s557_s3, 512  ;;  %p4438_p4 = scmp.lt.s32.totalorder %s557_s3, %s557_s3 }
  0x77   : > { %p4431_p9 = scmp.ne.s32.totalorder %s557_s3, %s4430_s27  ;;  %p4439_p7 = scmp.lt.s32.totalorder %s4430_s27, %s4430_s27 }
  0x79   : > { %p4433_p2 = pnand %p4431_p9, %p4762_p13  ;;  %p4440_p11 = por %p4439_p7, %p4438_p4 }
  0x7b   : > { %p4434_p3 = pneg %p4433_p2 }
  0x7d   : > { %p4441_p8 = pnand %p4440_p11, %p4434_p3 }
  0x7f   : > { %4444 = shalt.err (!%p4441_p8)
}
  0x80   : > { %s5496_s11 = smov 4   ;;  %s5497_s25 = smov 64  }
  0x81   : > { %4074 = dma.hbm_to_vmem [thread:$0]  (!%p4756_p12), %s5450_s12, 512, %s557_s3, [#allocation12], %s5497_s25, %s5497_s25, %s5496_s11  }
  0x82   : > { %s4597_s23 = smov [#allocation16]   ;;  %s4598_s29 = smov [#allocation17]  }
  0x83   : > { %s585_s5 = sshll.u32 %s4597_s23, 4  ;;  %s602_s8 = sshll.u32 %s4598_s29, 4  ;;  %s586_s5 = int_to_ptr.vmem [resolvable:$true] %s585_s5  ;;  %s603_s8 = int_to_ptr.vmem [resolvable:$true] %s602_s8 }
  0x84   : > { %s4456_s30 = scalar_lea.vmem %s586_s5, 32  ;;  %p4464_p9 = scmp.lt.s32.totalorder %s586_s5, %s586_s5 }
  0x85   : > { %p4457_p1 = scmp.ne.s32.totalorder %s586_s5, %s4456_s30  ;;  %p4465_p2 = scmp.lt.s32.totalorder %s4456_s30, %s4456_s30 }
  0x87   : > { %p4459_p0 = pnand %p4457_p1, %p4762_p13  ;;  %p4466_p3 = por %p4465_p2, %p4464_p9 }
  0x89   : > { %p4460_p6 = pneg %p4459_p0 }
  0x8b   : > { %p4467_p4 = pnand %p4466_p3, %p4460_p6 }
  0x8d   : > { %4470 = shalt.err (!%p4467_p4)
}
  0x8e   : > { %4080 = dma.hbm_to_vmem [thread:$0]  (!%p4756_p12), %s5453_s15, 32, %s586_s5, [#allocation15], %s5493_s21, %s5493_s21, %s5492_s1  }
  0x8f   : > { %s4482_s11 = scalar_lea.vmem %s603_s8, 16  ;;  %s4489_s25 = scalar_lea.vmem %s603_s8, 32 }
  0x90   : > { %p4483_p7 = scmp.ne.s32.totalorder %s603_s8, %s4482_s11  ;;  %p4490_p1 = scmp.lt.s32.totalorder %s603_s8, %s603_s8 }
  0x91   : > { %p4491_p0 = scmp.lt.s32.totalorder %s4489_s25, %s4482_s11 }
  0x92   : > { %p4485_p11 = pnand %p4483_p7, %p4762_p13 }
  0x93   : > { %p4492_p6 = por %p4491_p0, %p4490_p1 }
  0x94   : > { %p4486_p8 = pneg %p4485_p11 }
  0x96   : > { %p4493_p9 = pnand %p4492_p6, %p4486_p8 }
  0x98   : > { %4496 = shalt.err (!%p4493_p9)
}
  0x99   : > { %4083 = dma.hbm_to_vmem [thread:$0]  (!%p4756_p12), %s5455_s17, 16, %s603_s8, [#allocation18]  }
  0x9a   : > { %623 = sbr.rel (%p4748_p10) target bundleno = 3483 (0xd9b), region = 92  ;;  %p5498_p2 = scmp.eq.s32.totalorder (!%p4748_p10), %s4720_s0, 0 }
  0x9f   : > { %4540 = dma.done.wait (%p5498_p2), [#allocation3], 96   ;;  %p5499_p13 = pmov %p5498_p2 }
  0xa0   : > { %p5500_p3 = pmov %p5498_p2 }
  0xa1   : > { %4542 = vsyncadd (%p5499_p13), [#allocation3], 4294967200 }
  0xa2   : > { %4544 = dma.done.wait (%p5500_p3), [#allocation6], 8288   ;;  %p5501_p4 = pmov %p5498_p2 }
  0xa3   : > { %p5502_p7 = pmov %p5498_p2 }
  0xa4   : > { %4546 = vsyncadd (%p5501_p4), [#allocation6], 4294959008 }
  0xa5   : > { %4548 = dma.done.wait (%p5502_p7), [#allocation9], 544   ;;  %p5503_p12 = pmov %p5498_p2 }
  0xa6   : > { %p5504_p10 = pmov %p5498_p2 }
  0xa7   : > { %4550 = vsyncadd (%p5503_p12), [#allocation9], 4294966752 }
  0xa8   : > { %4552 = dma.done.wait (%p5504_p10), [#allocation12], 544   ;;  %p5505_p11 = pmov %p5498_p2 }
  0xa9   : > { %p5506_p8 = pmov %p5498_p2 }
  0xaa   : > { %4554 = vsyncadd (%p5505_p11), [#allocation12], 4294966752 }
  0xab   : > { %4556 = dma.done.wait (%p5506_p8), [#allocation15], 64   ;;  %p5507_p1 = pmov %p5498_p2 }
  0xad   : > { %4558 = vsyncadd (%p5507_p1), [#allocation15], 4294967232  ;;  %p5508_p0 = pmov %p5507_p1 }
  0xaf   : > { %4560 = dma.done.wait (%p5508_p0), [#allocation18], 16   ;;  %p5509_p6 = pmov %p5508_p0 }
  0xb0   : > { %p713_p9 = scmp.lt.s32.totalorder %s4720_s0, 1  ;;  %v4599_v0 = vmov 0.0   ;;  %vm4600_vm0 = vmmov 0   ;;  %s5510_s21 = sld [smem:[#allocation33_spill]]  ;;  %vm750_vm1 = vcmask 261120   ;;  %vm795_vm2 = vcmask 130048  }
  0xb1   : > { %4562 = vsyncadd (%p5509_p6), [#allocation18], 4294967280  ;;  %3823 = vmatprep.subr.bf16.mxu0 %v4599_v0  ;;  %3827 = vmatprep.mubr.msk.bf16.mxu0 %vm4600_vm0, %v4599_v0  ;;  %s5511_s8 = sld [smem:[#allocation35_spill]]  ;;  %v3603_v13 = vld [vmem:[#allocation2] ss:$0 sm:$0xff]  ;;  %v4167_v35 = vld [vmem:[#allocation8 + $0x8] sm:$0xff]   ;;  %v959_v37 = vlaneseq }
  0xb2   : > { %s714_s22 = scalar_select %p713_p9, %s4720_s0, 1  ;;  %v3616_v22 = vld [vmem:[#allocation2 + $0x1] ss:$0 sm:$0xff]  ;;  %v3630_v30 = vld [vmem:[#allocation2 + $0x2] ss:$0 sm:$0xff]  ;;  %v4168_v36 = vld [vmem:[#allocation8] sm:$0xff]  }
  0xb3   : > { %v5018_v38 = vshrl.u32 %v959_v37, 7  ;;  %v958_v42 = vld [vmem:[%s5442_s4] sm:$0x7]  ;;  %v3624_v60 = vld [vmem:[%s5442_s4 + $0x4] sm:$0x7]  ;;  %vm1994_vm7 = vcmask 523264  }
  0xb4   : > { %s3733_s24 = sshll.u32 %s714_s22, 4  ;;  %s710_s25 = sand.u32 1, %s4573_s28  }
  0xb5   : > { %v5021_v39 = vsub.s32 1, %v5018_v38  ;;  %v5024_v40 = vsub.s32 0, %v5018_v38  ;;  %v5031_v44 = vsub.s32 2, %v5018_v38  ;;  %s3598_s22 = sshll.u32 %s710_s25, 4  ;;  %s5398_s30 = scalar_lea.sflag [#allocation4], %s710_s25 }
  0xb6   : > { %s717_s23 = scalar_lea.vmem %s5510_s21, %s3733_s24  ;;  %s3734_s24 = sshll.u32 %s4720_s0, 8 }
  0xb7   : > { %v4161_v1 = vld [vmem:[%s5511_s8 + $0x8] sm:$0xff]   ;;  %v4162_v2 = vld [vmem:[%s5511_s8] sm:$0xff]   ;;  %v4163_v6 = vld [vmem:[%s5511_s8 + $0x18] sm:$0xff]   ;;  %v968_v43 = vrot.slane %v958_v42, %v5021_v39  ;;  %v962_v45 = vrot.slane %v958_v42, %v5024_v40  ;;  %v976_v49 = vrot.slane %v958_v42, %v5031_v44  ;;  %v1211_v63 = vrot.slane %v3624_v60, %v5024_v40  ;;  %s712_s19 = scalar_lea.vmem [#allocation19], %s3598_s22  ;;  %s5393_s29 = scalar_lea.hbm %s5456_s18, %s3734_s24 }
  0xb8   : > { %3824 = vmatpush3.bf16.msra.mxu0 %v4161_v1  ;;  %v4900_v3 = vld [vmem:[%s717_s23] sm:$0xff]  ;;  %v4902_v4 = vld [vmem:[%s717_s23 + $0x8] sm:$0xff]  ;;  %v4164_v7 = vld [vmem:[%s5511_s8 + $0x10] sm:$0xff]   ;;  %s5512_s23 = sld [smem:[#allocation34_spill]]  ;;  %s3414_s1 = sshll.u32 %s712_s19, 4  ;;  %s5395_s1 = int_to_ptr.vmem [resolvable:$true] %s3414_s1 }
  0xb9   : > { %3825 = vmatprep.subr.bf16.mxu0 %v4599_v0  ;;  %v726_v5 = vpack.c.bf16 %v4902_v4, %v4900_v3  ;;  %v4165_v8 = vld [vmem:[%s5511_s8 + $0x28] sm:$0xff]   ;;  %v4166_v9 = vld [vmem:[%s5511_s8 + $0x20] sm:$0xff]   ;;  %s4497_s0 = scalar_lea.vmem %s5395_s1, 256  ;;  %s4601_s3 = smov [#allocation19]  }
  0xba   : > { %v3639_v42 = vld [vmem:[#allocation5 + $0x2] ss:$0 sm:$0xff]  ;;  %p4498_p2 = scmp.ne.s32.totalorder %s5395_s1, %s4497_s0  ;;  %s4501_s27 = sshll.u32 %s4601_s3, 4  ;;  %s4502_s27 = int_to_ptr.vmem [resolvable:$false] %s4501_s27 }
  0xbb   : > { %s4503_s11 = scalar_lea.vmem %s4502_s27, 512  ;;  %p4504_p4 = scmp.lt.s32.totalorder %s5395_s1, %s4502_s27 }
  0xbc   : > { %3826 = vmatpush3.bf16.msra.mxu0 %v4162_v2  ;;  %v1217_v2 = vrot.slane %v3624_v60, %v5021_v39  ;;  %p4499_p13 = pnand %p4498_p2, %p4737_p5  ;;  %p4505_p7 = scmp.lt.s32.totalorder %s4503_s11, %s4497_s0 }
  0xbd   : > { %3845 = vmatprep.subr.bf16.mxu0 %v4599_v0 }
  0xbe   : > { %v4936_v10 = vld [vmem:[%s5512_s23] sm:$0xff]  ;;  %v4949_v19 = vld [vmem:[%s5512_s23 + $0x8] sm:$0xff]  ;;  %v4955_v20 = vld [vmem:[%s5512_s23 + $0x10] sm:$0xff]  ;;  %p4500_p3 = pneg %p4499_p13  ;;  %p4506_p12 = por %p4505_p7, %p4504_p4 }
  0xbf   : > { %3828 = vmatmul.mubr.msk.bf16.vlgmr.msra.gmra.mxu0 %vm750_vm1, %v726_v5  ;;  %3835 = vmatprep.mubr.msk.f32.mxu1 %vm795_vm2, %v4936_v10  ;;  %v4967_v24 = vld [vmem:[%s5512_s23 + $0x18] sm:$0xff] }
  0xc0   : > { %3846 = vmatpush3.bf16.msra.mxu0 %v4163_v6  ;;  %3849 = vmatprep.mubr.msk.bf16.mxu0 %vm4600_vm0, %v4599_v0  ;;  %p4507_p10 = pnand %p4506_p12, %p4500_p3 }
  0xc1   : > { %3847 = vmatprep.subr.bf16.mxu0 %v4599_v0 }
  0xc4   : > { %3848 = vmatpush3.bf16.msra.mxu0 %v4164_v7 }
  0xc5   : > { %3867 = vmatprep.subr.bf16.mxu0 %v4599_v0 }
  0xc7   : > { %3850 = vmatmul.mubr.msk.bf16.vlgmr.msra.gmra.mxu0 %vm750_vm1, %v726_v5 }
  0xc8   : > { %3868 = vmatpush3.bf16.msra.mxu0 %v4165_v8  ;;  %3871 = vmatprep.mubr.msk.bf16.mxu0 %vm4600_vm0, %v4599_v0  ;;  %v3638_v8 = vld [vmem:[%s5442_s4 + $0x8] sm:$0x7] }
  0xc9   : > { %3869 = vmatprep.subr.bf16.mxu0 %v4599_v0 }
  0xcc   : > { %3870 = vmatpush3.bf16.msra.mxu0 %v4166_v9 }
  0xcd   : > { %3905 = vmatprep.subr.bf16.mxu0 %v4599_v0 }
  0xcf   : > { %3872 = vmatmul.mubr.msk.bf16.vlgmr.msra.gmra.mxu0 %vm750_vm1, %v726_v5 }
  0xd0   : > { %3913 = vmatprep.mubr.msk.bf16.mxu0 %vm4600_vm0, %v4599_v0 }
 0x17f   : > { %v788_v11 = vpop.f32.mrf.mxu0 }
 0x180   : > { %v4942_v17 = vadd.f32 %v3603_v13, %v788_v11 }
 0x181   : > { %v3829_v12 = vpop.f32.mrf.mxu0 }
 0x182   : > { %v977_v59 = vmul.f32 %v976_v49, %v4942_v17  ;;  %v1467_v12 = vrot.slane %v3638_v8, %v5021_v39 }
 0x183   : > { %v791_v14 = vpop.f32.mrf.mxu0 }
 0x184   : > { %v4940_v15 = vadd.f32 %v3603_v13, %v791_v14  ;;  %v1461_v13 = vrot.slane %v3638_v8, %v5024_v40  ;;  %v1225_v14 = vrot.slane %v3624_v60, %v5031_v44  ;;  %v1496_v60 = vld [vmem:[#allocation7 + $0x20] sm:$0xff] }
 0x185   : > { %v3830_v16 = vpop.f32.mrf.mxu0 }
 0x186   : > { %3831 = vmatprep.subr.mxu1 %v4940_v15  ;;  %v978_v54 = vmul.f32 %v976_v49, %v4940_v15 }
 0x187   : > { %3832 = vmatpush3.msra.mxu1 %v4940_v15  ;;  %v1049_v18 = vpop.f32.mrf.mxu0 }
 0x188   : > { %3833 = vmatprep.subr.mxu1 %v4942_v17  ;;  %v4973_v27 = vadd.f32 %v3616_v22, %v1049_v18  ;;  %v1475_v18 = vrot.slane %v3638_v8, %v5031_v44  ;;  %v1498_v8 = vld [vmem:[#allocation7 + $0x30] sm:$0xff] }
 0x189   : > { %3834 = vmatpush3.msra.mxu1 %v4942_v17  ;;  %v3851_v21 = vpop.f32.mrf.mxu0 }
 0x18a   : > { %3836 = vmatmul.mubr.msk.f32.vlgmr.msra.gmra.mxu1 %vm795_vm2, %v4949_v19  ;;  %3838 = vmatprep.subr.mxu1 %v4940_v15 }
 0x18b   : > { %3839 = vmatpush3.msra.mxu1 %v4940_v15  ;;  %v1052_v23 = vpop.f32.mrf.mxu0  ;;  %3842 = vmatprep.mubr.msk.f32.mxu1 %vm795_vm2, %v4955_v20 }
 0x18c   : > { %v4969_v25 = vadd.f32 %v3616_v22, %v1052_v23  ;;  %3840 = vmatprep.subr.mxu1 %v4942_v17 }
 0x18d   : > { %3841 = vmatpush3.msra.mxu1 %v4942_v17  ;;  %v3852_v26 = vpop.f32.mrf.mxu0 }
 0x18e   : > { %3843 = vmatmul.mubr.msk.f32.vlgmr.msra.gmra.mxu1 %vm795_vm2, %v4967_v24  ;;  %3853 = vmatprep.subr.mxu1 %v4969_v25  ;;  %v1227_v22 = vmul.f32 %v1225_v14, %v4969_v25 }
 0x18f   : > { %3854 = vmatpush3.msra.mxu1 %v4969_v25  ;;  %v1299_v28 = vpop.f32.mrf.mxu0  ;;  %3857 = vmatprep.mubr.msk.f32.mxu1 %vm795_vm2, %v4936_v10 }
 0x190   : > { %3855 = vmatprep.subr.mxu1 %v4973_v27  ;;  %v4993_v34 = vadd.f32 %v3630_v30, %v1299_v28 }
 0x191   : > { %3856 = vmatpush3.msra.mxu1 %v4973_v27  ;;  %v3873_v29 = vpop.f32.mrf.mxu0 }
 0x192   : > { %3858 = vmatmul.mubr.msk.f32.vlgmr.msra.gmra.mxu1 %vm795_vm2, %v4949_v19  ;;  %3860 = vmatprep.subr.mxu1 %v4969_v25  ;;  %v1226_v29 = vmul.f32 %v1225_v14, %v4973_v27 }
 0x193   : > { %3861 = vmatpush3.msra.mxu1 %v4969_v25  ;;  %v1302_v31 = vpop.f32.mrf.mxu0  ;;  %3864 = vmatprep.mubr.msk.f32.mxu1 %vm795_vm2, %v4955_v20 }
 0x194   : > { %v4989_v32 = vadd.f32 %v3630_v30, %v1302_v31  ;;  %3862 = vmatprep.subr.mxu1 %v4973_v27 }
 0x195   : > { %3863 = vmatpush3.msra.mxu1 %v4973_v27  ;;  %v3874_v33 = vpop.f32.mrf.mxu0 }
 0x196   : > { %3865 = vmatmul.mubr.msk.f32.vlgmr.msra.gmra.mxu1 %vm795_vm2, %v4967_v24  ;;  %3875 = vmatprep.subr.mxu1 %v4989_v32  ;;  %v1477_v30 = vmul.f32 %v1475_v18, %v4989_v32 }
 0x197   : > { %3876 = vmatpush3.msra.mxu1 %v4989_v32  ;;  %3879 = vmatprep.mubr.msk.f32.mxu1 %vm795_vm2, %v4936_v10 }
 0x198   : > { %3877 = vmatprep.subr.mxu1 %v4993_v34 }
 0x199   : > { %3878 = vmatpush3.msra.mxu1 %v4993_v34 }
 0x19a   : > { %3880 = vmatmul.mubr.msk.f32.vlgmr.msra.gmra.mxu1 %vm795_vm2, %v4949_v19  ;;  %3882 = vmatprep.subr.mxu1 %v4989_v32 }
 0x19b   : > { %3883 = vmatpush3.msra.mxu1 %v4989_v32  ;;  %3886 = vmatprep.mubr.msk.f32.mxu1 %vm795_vm2, %v4955_v20 }
 0x19c   : > { %3884 = vmatprep.subr.mxu1 %v4993_v34 }
 0x19d   : > { %3885 = vmatpush3.msra.mxu1 %v4993_v34 }
 0x19e   : > { %3887 = vmatmul.mubr.msk.f32.vlgmr.msra.gmra.mxu1 %vm795_vm2, %v4967_v24  ;;  %3889 = vmatprep.subr.bf16.mxu1 %v4599_v0 }
 0x19f   : > { %3893 = vmatprep.mubr.msk.bf16.mxu1 %vm4600_vm0, %v4599_v0  ;;  %3890 = vmatpush3.bf16.msra.mxu1 %v4167_v35 }
 0x1a0   : > { %3891 = vmatprep.subr.bf16.mxu1 %v4599_v0 }
 0x1a3   : > { %3892 = vmatpush3.bf16.msra.mxu1 %v4168_v36 }
 0x1a4   : > { %3897 = vmatprep.subr.bf16.mxu1 %v4599_v0 }
 0x24a   : > { %v3837_v41 = vpop.f32.mrf.mxu1 }
 0x24b   : > { %v970_v48 = vmul.f32 %v3837_v41, %v968_v43  ;;  %v3625_v41 = vld [vmem:[#allocation5 + $0x1] ss:$0 sm:$0xff] }
 0x24c   : > { %v868_v46 = vpop.f32.mrf.mxu1 }
 0x24d   : > { %v969_v52 = vmul.f32 %v968_v43, %v868_v46 }
 0x24e   : > { %v3844_v47 = vpop.f32.mrf.mxu1 }
 0x24f   : > { %v964_v50 = vmul.f32 %v3844_v47, %v962_v45  ;;  %v1476_v47 = vmul.f32 %v1475_v18, %v4993_v34  ;;  %v1501_v18 = vld [vmem:[#allocation7 + $0x48] sm:$0xff] }
 0x250   : > { %v949_v51 = vpop.f32.mrf.mxu1 }
 0x251   : > { %v972_v53 = vadd.f32 %v970_v48, %v964_v50  ;;  %v963_v55 = vmul.f32 %v962_v45, %v949_v51 }
 0x252   : > { %v3859_v56 = vpop.f32.mrf.mxu1 }
 0x253   : > { %v5036_v57 = vadd.f32 %v978_v54, %v972_v53  ;;  %v971_v58 = vadd.f32 %v969_v52, %v963_v55  ;;  %v1219_v9 = vmul.f32 %v3859_v56, %v1217_v2  ;;  %v1492_v52 = vld [vmem:[#allocation7] sm:$0xff]  ;;  %v1493_v53 = vld [vmem:[#allocation7 + $0x8] sm:$0xff]  ;;  %v1494_v54 = vld [vmem:[#allocation7 + $0x10] sm:$0xff]  ;;  %v5062_v56 = vsub.s32 3, %v5018_v38 }
 0x254   : > { %v1122_v61 = vpop.f32.mrf.mxu1  ;;  %v1495_v55 = vld [vmem:[#allocation7 + $0x18] sm:$0xff] }
 0x255   : > { %v5042_v62 = vadd.f32 %v977_v59, %v971_v58  ;;  %v1218_v16 = vmul.f32 %v1217_v2, %v1122_v61  ;;  %v1497_v61 = vld [vmem:[#allocation7 + $0x28] sm:$0xff] }
 0x256   : > { %v3866_v1 = vpop.f32.mrf.mxu1 }
 0x257   : > { %v1213_v6 = vmul.f32 %v3866_v1, %v1211_v63  ;;  %v5073_v1 = vsub.s32 4, %v5018_v38 }
 0x258   : > { %v1197_v5 = vpop.f32.mrf.mxu1 }
 0x259   : > { %v1212_v11 = vmul.f32 %v1211_v63, %v1197_v5  ;;  %v1221_v17 = vadd.f32 %v1219_v9, %v1213_v6  ;;  %v1499_v9 = vld [vmem:[#allocation7 + $0x38] sm:$0xff] }
 0x25a   : > { %v3881_v7 = vpop.f32.mrf.mxu1 }
 0x25b   : > { %v1220_v23 = vadd.f32 %v1218_v16, %v1212_v11  ;;  %v1469_v26 = vmul.f32 %v3881_v7, %v1467_v12  ;;  %v1229_v33 = vadd.f32 %v1227_v22, %v1221_v17  ;;  %v1500_v17 = vld [vmem:[#allocation7 + $0x40] sm:$0xff]  ;;  %v5083_v22 = vsub.s32 6, %v5018_v38 }
 0x25c   : > { %v1372_v15 = vpop.f32.mrf.mxu1 }
 0x25d   : > { %v1468_v35 = vmul.f32 %v1467_v12, %v1372_v15  ;;  %v1228_v43 = vadd.f32 %v1226_v29, %v1220_v23  ;;  %v1239_v25 = vadd.f32 %v3625_v41, %v1229_v33  ;;  %v5078_v12 = vsub.s32 5, %v5018_v38 }
 0x25e   : > { %v3888_v21 = vpop.f32.mrf.mxu1 }
 0x25f   : > { %v1463_v28 = vmul.f32 %v3888_v21, %v1461_v13  ;;  %v1238_v50 = vadd.f32 %v3625_v41, %v1228_v43  ;;  %v1504_v43 = vld [vmem:[#allocation7 + $0x60] sm:$0xff] }
 0x260   : > { %v1447_v31 = vpop.f32.mrf.mxu1 }
 0x261   : > { %v1471_v36 = vadd.f32 %v1469_v26, %v1463_v28  ;;  %v1462_v37 = vmul.f32 %v1461_v13, %v1447_v31  ;;  %v1503_v31 = vld [vmem:[#allocation7 + $0x58] sm:$0xff] }
 0x263   : > { %v1479_v45 = vadd.f32 %v1477_v30, %v1471_v36  ;;  %v1470_v46 = vadd.f32 %v1468_v35, %v1462_v37  ;;  %v1502_v30 = vld [vmem:[#allocation7 + $0x50] sm:$0xff]  ;;  %v5088_v35 = vsub.s32 7, %v5018_v38 }
 0x265   : > { %v1489_v48 = vadd.f32 %v3639_v42, %v1479_v45  ;;  %v1478_v49 = vadd.f32 %v1476_v47, %v1470_v46  ;;  %v1505_v45 = vld [vmem:[#allocation7 + $0x68] sm:$0xff] }
 0x267   : > { %v5057_v51 = vmul.f32 %v1489_v48, %v1239_v25  ;;  %v1488_v27 = vadd.f32 %v3639_v42, %v1478_v49 }
 0x269   : > { %v5059_v32 = vmul.f32 %v1488_v27, %v1238_v50  ;;  %v1506_v50 = vld [vmem:[#allocation7 + $0x70] sm:$0xff]  ;;  %v1507_v27 = vld [vmem:[#allocation7 + $0x78] sm:$0xff] }
 0x26b   : > { %v1527_v58 = vrot.slane %v5059_v32, %v5024_v40  ;;  %v1533_v34 = vrot.slane %v5059_v32, %v5021_v39  ;;  %v1541_v59 = vrot.slane %v5059_v32, %v5031_v44  ;;  %v1549_v63 = vrot.slane %v5059_v32, %v5062_v56 }
 0x26c   : > { %v1557_v11 = vrot.slane %v5059_v32, %v5073_v1  ;;  %v1565_v21 = vrot.slane %v5059_v32, %v5078_v12  ;;  %v1573_v33 = vrot.slane %v5059_v32, %v5083_v22  ;;  %v1581_v46 = vrot.slane %v5059_v32, %v5088_v35 }
 0x26d   : > { %v1528_v2 = vmul.f32 %v1527_v58, %v1492_v52  ;;  %v1529_v5 = vmul.f32 %v1527_v58, %v1493_v53  ;;  %v1534_v6 = vmul.f32 %v1533_v34, %v1494_v54  ;;  %v1535_v7 = vmul.f32 %v1533_v34, %v1495_v55  ;;  %v1508_v58 = vld [vmem:[#allocation7 + $0x80] sm:$0xff]  ;;  %v1509_v34 = vld [vmem:[#allocation7 + $0x88] sm:$0xff] }
 0x26e   : > { %v1542_v15 = vmul.f32 %v1541_v59, %v1496_v60  ;;  %v1543_v16 = vmul.f32 %v1541_v59, %v1497_v61  ;;  %v1550_v28 = vmul.f32 %v1549_v63, %v1498_v8  ;;  %v1551_v29 = vmul.f32 %v1549_v63, %v1499_v9 }
 0x26f   : > { %v1536_v13 = vadd.f32 %v1534_v6, %v1528_v2  ;;  %v1537_v14 = vadd.f32 %v1535_v7, %v1529_v5  ;;  %v1558_v41 = vmul.f32 %v1557_v11, %v1500_v17  ;;  %v1559_v42 = vmul.f32 %v1557_v11, %v1501_v18  ;;  %v1510_v5 = vld [vmem:[#allocation7 + $0x90] sm:$0xff]  ;;  %v1511_v6 = vld [vmem:[#allocation7 + $0x98] sm:$0xff] }
 0x270   : > { %v1566_v48 = vmul.f32 %v1565_v21, %v1502_v30  ;;  %v1567_v49 = vmul.f32 %v1565_v21, %v1503_v31  ;;  %v1589_v52 = vrot.slane %v5057_v51, %v5024_v40  ;;  %v1574_v54 = vmul.f32 %v1573_v33, %v1504_v43  ;;  %v1518_v43 = vld [vmem:[#allocation7 + $0xd0] sm:$0xff] }
 0x271   : > { %v1544_v23 = vadd.f32 %v1542_v15, %v1536_v13  ;;  %v1545_v26 = vadd.f32 %v1543_v16, %v1537_v14  ;;  %v1575_v55 = vmul.f32 %v1573_v33, %v1505_v45  ;;  %v1597_v59 = vrot.slane %v5057_v51, %v5021_v39  ;;  %v1512_v14 = vld [vmem:[#allocation7 + $0xa0] sm:$0xff]  ;;  %v1513_v15 = vld [vmem:[#allocation7 + $0xa8] sm:$0xff] }
 0x272   : > { %v1582_v63 = vmul.f32 %v1581_v46, %v1506_v50  ;;  %v1583_v2 = vmul.f32 %v1581_v46, %v1507_v27  ;;  %v1605_v7 = vrot.slane %v5057_v51, %v5031_v44  ;;  %v1590_v11 = vmul.f32 %v1589_v52, %v1508_v58 }
 0x273   : > { %v1552_v36 = vadd.f32 %v1550_v28, %v1544_v23  ;;  %v1553_v37 = vadd.f32 %v1551_v29, %v1545_v26  ;;  %v1591_v13 = vmul.f32 %v1589_v52, %v1509_v34  ;;  %v1613_v16 = vrot.slane %v5057_v51, %v5062_v56  ;;  %v1514_v26 = vld [vmem:[#allocation7 + $0xb0] sm:$0xff]  ;;  %v1515_v28 = vld [vmem:[#allocation7 + $0xb8] sm:$0xff] }
 0x274   : > { %v1598_v21 = vmul.f32 %v1597_v59, %v1510_v5  ;;  %v1599_v23 = vmul.f32 %v1597_v59, %v1511_v6  ;;  %v1621_v29 = vrot.slane %v5057_v51, %v5073_v1  ;;  %v1606_v33 = vmul.f32 %v1605_v7, %v1512_v14 }
 0x275   : > { %v1560_v47 = vadd.f32 %v1558_v41, %v1552_v36  ;;  %v1561_v25 = vadd.f32 %v1559_v42, %v1553_v37  ;;  %v1607_v36 = vmul.f32 %v1605_v7, %v1513_v15  ;;  %v1516_v37 = vld [vmem:[#allocation7 + $0xc0] sm:$0xff]  ;;  %v1517_v41 = vld [vmem:[#allocation7 + $0xc8] sm:$0xff]  ;;  %v1629_v42 = vrot.slane %v5057_v51, %v5078_v12 }
 0x276   : > { %v1622_v52 = vmul.f32 %v1621_v29, %v1516_v37 }
 0x277   : > { %v1568_v38 = vadd.f32 %v1566_v48, %v1560_v47  ;;  %v1569_v53 = vadd.f32 %v1567_v49, %v1561_v25  ;;  %v1614_v47 = vmul.f32 %v1613_v16, %v1514_v26  ;;  %v1615_v25 = vmul.f32 %v1613_v16, %v1515_v28  ;;  %v1519_v48 = vld [vmem:[#allocation7 + $0xd8] sm:$0xff] }
 0x278   : > { %v1637_v49 = vrot.slane %v5057_v51, %v5083_v22  ;;  %v1631_v59 = vmul.f32 %v1629_v42, %v1519_v48 }
 0x279   : > { %v1576_v60 = vadd.f32 %v1574_v54, %v1568_v38  ;;  %v1577_v61 = vadd.f32 %v1575_v55, %v1569_v53  ;;  %v1623_v38 = vmul.f32 %v1621_v29, %v1517_v41  ;;  %v1520_v53 = vld [vmem:[#allocation7 + $0xe0] sm:$0xff]  ;;  %v1521_v54 = vld [vmem:[#allocation7 + $0xe8] sm:$0xff]  ;;  %v1630_v55 = vmul.f32 %v1629_v42, %v1518_v43 }
 0x27a   : > { %v1638_v6 = vmul.f32 %v1637_v49, %v1520_v53  ;;  %v1639_v7 = vmul.f32 %v1637_v49, %v1521_v54 }
 0x27b   : > { %v1584_v8 = vadd.f32 %v1582_v63, %v1576_v60  ;;  %v1585_v9 = vadd.f32 %v1583_v2, %v1577_v61  ;;  %v1645_v60 = vrot.slane %v5057_v51, %v5088_v35  ;;  %v1522_v61 = vld [vmem:[#allocation7 + $0xf0] sm:$0xff]  ;;  %v1523_v63 = vld [vmem:[#allocation7 + $0xf8] sm:$0xff] }
 0x27d   : > { %v1592_v17 = vadd.f32 %v1590_v11, %v1584_v8  ;;  %v1593_v18 = vadd.f32 %v1591_v13, %v1585_v9  ;;  %v3640_v8 = vld [vmem:[%s5445_s7] ss:$0 sm:$0xff]  ;;  %v1646_v13 = vmul.f32 %v1645_v60, %v1522_v61  ;;  %v1647_v14 = vmul.f32 %v1645_v60, %v1523_v63 }
 0x27f   : > { %v1600_v30 = vadd.f32 %v1598_v21, %v1592_v17  ;;  %v1601_v31 = vadd.f32 %v1599_v23, %v1593_v18  ;;  %v1657_v17 = vmul.f32 %v3640_v8, %v5059_v32  ;;  %v1658_v18 = vmul.f32 %v3640_v8, %v5057_v51 }
 0x281   : > { %v1608_v45 = vadd.f32 %v1606_v33, %v1600_v30  ;;  %v1609_v46 = vadd.f32 %v1607_v36, %v1601_v31 }
 0x283   : > { %v1616_v50 = vadd.f32 %v1614_v47, %v1608_v45  ;;  %v1617_v27 = vadd.f32 %v1615_v25, %v1609_v46 }
 0x285   : > { %v1624_v58 = vadd.f32 %v1622_v52, %v1616_v50  ;;  %v1625_v34 = vadd.f32 %v1623_v38, %v1617_v27 }
 0x287   : > { %v1632_v2 = vadd.f32 %v1630_v55, %v1624_v58  ;;  %v1633_v5 = vadd.f32 %v1631_v59, %v1625_v34 }
 0x289   : > { %v1640_v9 = vadd.f32 %v1638_v6, %v1632_v2  ;;  %v1641_v11 = vadd.f32 %v1639_v7, %v1633_v5 }
 0x28b   : > { %v1648_v15 = vadd.f32 %v1646_v13, %v1640_v9  ;;  %v1649_v16 = vadd.f32 %v1647_v14, %v1641_v11 }
 0x28d   : > { %v1659_v21 = vadd.f32 %v1657_v17, %v1648_v15  ;;  %v1660_v23 = vadd.f32 %v1658_v18, %v1649_v16  ;;  %v3611_v17 = vld [vmem:[#allocation5] ss:$0 sm:$0xff] }
 0x28f   : > { %v1663_v26 = vmul.f32 0.70710677, %v1659_v21  ;;  %v1664_v28 = vmul.f32 0.70710677, %v1660_v23  ;;  %v1661_v18 = vmul.f32 0.5, %v1659_v21 }
 0x290   : > { %v3641_v21 = vld [vmem:[%s5447_s9] ss:$0 sm:$0xff] }
 0x291   : > { %v1665_v29 = vand.u32 2147483647, %v1663_v26  ;;  %v1666_v30 = vand.u32 2147483647, %v1664_v28  ;;  %vm1705_vm3 = vcmp.ge.f32.partialorder %v1663_v26, 0.0  ;;  %vm1706_vm4 = vcmp.ge.f32.partialorder %v1664_v28, 0.0 }
 0x293   : > { %v1667_v31 = vmul.f32 0.3275911, %v1665_v29  ;;  %v1668_v33 = vmul.f32 0.3275911, %v1666_v30  ;;  %v1693_v41 = vsub.f32 0.0, %v1665_v29  ;;  %v1694_v42 = vsub.f32 0.0, %v1666_v30 }
 0x295   : > { %v1669_v36 = vadd.f32 1.0, %v1667_v31  ;;  %v1670_v37 = vadd.f32 1.0, %v1668_v33  ;;  %v1695_v43 = vmul.f32 %v1693_v41, %v1665_v29  ;;  %v1696_v45 = vmul.f32 %v1694_v42, %v1666_v30 }
 0x296   : > { %v1662_v31 = vmul.f32 0.5, %v1660_v23  ;;  %v989_v41 = vadd.f32 %v3611_v17, %v5036_v57 }
 0x297   : > { %4189 = vrcp.f32 %v1669_v36  ;;  %v1697_v51 = vmul.f32 1.442695, %v1695_v43  ;;  %v1699_v48 = vmul.f32 1.442695, %v1696_v45  ;;  %v988_v36 = vadd.f32 %v3611_v17, %v5042_v62 }
 0x298   : > { %4191 = vrcp.f32 %v1670_v37 }
 0x299   : > { %4193 = vpow2.f32 %v1697_v51 }
 0x29a   : > { %4195 = vpow2.f32 %v1699_v48 }
 0x2a4   : > { %v4190_v46 = vpop.eup %4189 }
 0x2a5   : > { %v4192_v32 = vpop.eup %4191  ;;  %v1675_v47 = vmul.f32 1.0614054, %v4190_v46 }
 0x2a6   : > { %v1676_v25 = vmul.f32 1.0614054, %v4192_v32  ;;  %v4194_v5 = vpop.eup %4193 }
 0x2a7   : > { %v1677_v49 = vadd.f32 -1.4531521, %v1675_v47  ;;  %v4196_v7 = vpop.eup %4195 }
 0x2a8   : > { %v1678_v50 = vadd.f32 -1.4531521, %v1676_v25 }
 0x2a9   : > { %v1679_v27 = vmul.f32 %v4190_v46, %v1677_v49 }
 0x2aa   : > { %v1680_v52 = vmul.f32 %v4192_v32, %v1678_v50 }
 0x2ab   : > { %v1681_v38 = vadd.f32 1.4214138, %v1679_v27 }
 0x2ac   : > { %v1682_v53 = vadd.f32 1.4214138, %v1680_v52 }
 0x2ad   : > { %v1683_v54 = vmul.f32 %v4190_v46, %v1681_v38 }
 0x2ae   : > { %v1684_v55 = vmul.f32 %v4192_v32, %v1682_v53 }
 0x2af   : > { %v1685_v58 = vadd.f32 -0.28449672, %v1683_v54 }
 0x2b0   : > { %v1686_v34 = vadd.f32 -0.28449672, %v1684_v55 }
 0x2b1   : > { %v1687_v59 = vmul.f32 %v4190_v46, %v1685_v58  ;;  %v4169_v58 = vld [vmem:[#allocation13 + $0x8] sm:$0xff]  }
 0x2b2   : > { %v1688_v60 = vmul.f32 %v4192_v32, %v1686_v34  ;;  %v4170_v34 = vld [vmem:[#allocation13] sm:$0xff]  }
 0x2b3   : > { %v1689_v61 = vadd.f32 0.2548296, %v1687_v59 }
 0x2b4   : > { %v1690_v63 = vadd.f32 0.2548296, %v1688_v60 }
 0x2b5   : > { %v1691_v2 = vmul.f32 %v4190_v46, %v1689_v61 }
 0x2b6   : > { %v1692_v6 = vmul.f32 %v4192_v32, %v1690_v63 }
 0x2b7   : > { %v1701_v8 = vmul.f32 %v4194_v5, %v1691_v2 }
 0x2b8   : > { %v1702_v9 = vmul.f32 %v4196_v7, %v1692_v6 }
 0x2b9   : > { %v1703_v11 = vsub.f32 1.0, %v1701_v8  ;;  %v3645_v8 = vld [vmem:[#allocation10] ss:$0 sm:$0xff] }
 0x2ba   : > { %v1704_v13 = vsub.f32 1.0, %v1702_v9 }
 0x2bb   : > { %v1707_v14 = vsub.f32 0.0, %v1703_v11 }
 0x2bc   : > { %v1708_v15 = vsub.f32 0.0, %v1704_v13 }
 0x2bd   : > { %v1709_v16 = vsel %vm1705_vm3, %v1703_v11, %v1707_v14  ;;  %v3646_v14 = vld [vmem:[#allocation11] ss:$0 sm:$0xff] }
 0x2be   : > { %v1710_v29 = vsel %vm1706_vm4, %v1704_v13, %v1708_v15  ;;  %v1711_v30 = vadd.f32 1.0, %v1709_v16 }
 0x2bf   : > { %v1712_v33 = vadd.f32 1.0, %v1710_v29  ;;  %v4171_v29 = vld [vmem:[%s5452_s14 + $0x18] sm:$0xff]  }
 0x2c0   : > { %v1713_v37 = vmul.f32 %v1711_v30, %v1661_v18  ;;  %3906 = vmatpush3.bf16.msra.mxu0 %v4171_v29  ;;  %v4172_v30 = vld [vmem:[%s5452_s14 + $0x10] sm:$0xff]  }
 0x2c1   : > { %v1714_v42 = vmul.f32 %v1712_v33, %v1662_v31  ;;  %3907 = vmatprep.subr.bf16.mxu0 %v4599_v0  ;;  %v4173_v31 = vld [vmem:[%s5452_s14 + $0x8] sm:$0xff]   ;;  %v4174_v33 = vld [vmem:[%s5452_s14] sm:$0xff]  }
 0x2c2   : > { %v1715_v43 = vmul.f32 %v1713_v37, %v988_v36  ;;  %v3647_v36 = vld [vmem:[#allocation14] ss:$0 sm:$0xff] }
 0x2c3   : > { %v1716_v45 = vmul.f32 %v1714_v42, %v989_v41 }
 0x2c4   : > { %3908 = vmatpush3.bf16.msra.mxu0 %v4172_v30 }
 0x2c5   : > { %v1717_v46 = vpack.c.bf16 %v1716_v45, %v1715_v43  ;;  %3909 = vmatprep.subr.bf16.mxu0 %v4599_v0 }
 0x2c7   : > { %3894 = vmatmul.mubr.msk.bf16.vlgmr.msra.gmra.mxu1 %vm750_vm1, %v1717_v46 }
 0x2c8   : > { %3901 = vmatprep.mubr.msk.bf16.mxu1 %vm4600_vm0, %v4599_v0  ;;  %3898 = vmatpush3.bf16.msra.mxu1 %v4169_v58 }
 0x2c9   : > { %3899 = vmatprep.subr.bf16.mxu1 %v4599_v0  ;;  %3910 = vmatpush3.bf16.msra.mxu0 %v4173_v31 }
 0x2ca   : > { %3911 = vmatprep.subr.bf16.mxu0 %v4599_v0 }
 0x2cc   : > { %3900 = vmatpush3.bf16.msra.mxu1 %v4170_v34 }
 0x2cd   : > { %3917 = vmatprep.subr.bf16.mxu1 %v4599_v0  ;;  %3912 = vmatpush3.bf16.msra.mxu0 %v4174_v33 }
 0x2ce   : > { %3939 = vmatprep.subr.bf16.mxu0 %v4599_v0 }
 0x387   : > { %v1778_v23 = vpop.f32.mrf.mxu1 }
 0x388   : > { %v1779_v26 = vadd.f32 %v3641_v21, %v1778_v23 }
 0x389   : > { %v3895_v28 = vpop.f32.mrf.mxu1 }
 0x38a   : > { %v5122_v62 = vadd.f32 %v1779_v26, %v4900_v3 }
 0x38b   : > { %v1781_v57 = vpop.f32.mrf.mxu1 }
 0x38c   : > { %v1782_v32 = vadd.f32 %v3641_v21, %v1781_v57  ;;  %v1789_v47 = vsel %vm750_vm1, %v5122_v62, 0.0 }
 0x38d   : > { %1790 = vadd.xlane.f32.xlu0 %v1789_v47  ;;  %v3896_v51 = vpop.f32.mrf.mxu1 }
 0x38e   : > { %v5127_v25 = vadd.f32 %v1782_v32, %v4902_v4 }
 0x390   : > { %v1792_v48 = vsel %vm750_vm1, %v5127_v25, 0.0 }
 0x391   : > { %1793 = vadd.xlane.f32.xlu0 %v1792_v48 }
 0x416   : > { %v1791_v49 = vpop.xlane.xlu0 %1790 }
 0x417   : > { %v1796_v50 = vmul.f32 0.03125, %v1791_v49 }
 0x419   : > { %v1798_v27 = vsub.f32 %v5122_v62, %v1796_v50 }
 0x41a   : > { %v1794_v3 = vpop.xlane.xlu0 %1793 }
 0x41b   : > { %v1797_v52 = vmul.f32 0.03125, %v1794_v3  ;;  %v1800_v38 = vmul.f32 %v1798_v27, %v1798_v27 }
 0x41d   : > { %v1799_v53 = vsub.f32 %v5127_v25, %v1797_v52  ;;  %v1802_v54 = vsel %vm750_vm1, %v1800_v38, 0.0 }
 0x41e   : > { %1803 = vadd.xlane.f32.xlu1 %v1802_v54 }
 0x41f   : > { %v1801_v55 = vmul.f32 %v1799_v53, %v1799_v53 }
 0x421   : > { %v1805_v4 = vsel %vm750_vm1, %v1801_v55, 0.0 }
 0x422   : > { %1806 = vadd.xlane.f32.xlu1 %v1805_v4 }
 0x4a7   : > { %v1804_v59 = vpop.xlane.xlu1 %1803 }
 0x4a8   : > { %v1808_v60 = vmul.f32 0.03125, %v1804_v59 }
 0x4aa   : > { %v1810_v61 = vadd.f32 1e-05, %v1808_v60 }
 0x4ab   : > { %v1807_v63 = vpop.xlane.xlu1 %1806 }
 0x4ac   : > { %4197 = vrsqrt.f32 %v1810_v61  ;;  %v1809_v2 = vmul.f32 0.03125, %v1807_v63 }
 0x4ae   : > { %v1811_v5 = vadd.f32 1e-05, %v1809_v2 }
 0x4b0   : > { %4199 = vrsqrt.f32 %v1811_v5 }
 0x4b9   : > { %v4198_v6 = vpop.eup %4197 }
 0x4ba   : > { %v1814_v7 = vmul.f32 %v4198_v6, %v1798_v27 }
 0x4bc   : > { %v1822_v13 = vmul.f32 %v3645_v8, %v1814_v7 }
 0x4bd   : > { %v4200_v9 = vpop.eup %4199 }
 0x4be   : > { %v1815_v11 = vmul.f32 %v4200_v9, %v1799_v53  ;;  %v1830_v16 = vadd.f32 %v3646_v14, %v1822_v13 }
 0x4c0   : > { %v1823_v15 = vmul.f32 %v3645_v8, %v1815_v11 }
 0x4c2   : > { %v1831_v17 = vadd.f32 %v3646_v14, %v1823_v15 }
 0x4c4   : > { %v1832_v18 = vpack.c.bf16 %v1831_v17, %v1830_v16 }
 0x4c6   : > { %3902 = vmatmul.mubr.msk.bf16.vlgmr.msra.gmra.mxu1 %vm750_vm1, %v1832_v18 }
 0x4c7   : > { %3921 = vmatprep.mubr.msk.bf16.mxu1 %vm4600_vm0, %v4599_v0 }
 0x586   : > { %v1893_v37 = vpop.f32.mrf.mxu1 }
 0x587   : > { %v1894_v41 = vadd.f32 %v3647_v36, %v1893_v37 }
 0x588   : > { %v3903_v42 = vpop.f32.mrf.mxu1 }
 0x589   : > { %v1902_v43 = vmul.f32 0.70710677, %v1894_v41 }
 0x58a   : > { %v1896_v45 = vpop.f32.mrf.mxu1 }
 0x58b   : > { %v1904_v46 = vand.u32 2147483647, %v1902_v43  ;;  %v1897_v21 = vadd.f32 %v3647_v36, %v1896_v45  ;;  %vm1944_vm5 = vcmp.ge.f32.partialorder %v1902_v43, 0.0  ;;  %v1900_v45 = vmul.f32 0.5, %v1894_v41  ;;  %v4175_v43 = vld [vmem:[%s5511_s8 + $0x38] sm:$0xff]   ;;  %v4177_v41 = vld [vmem:[%s5511_s8 + $0x30] sm:$0xff]  }
 0x58c   : > { %v3904_v23 = vpop.f32.mrf.mxu1  ;;  %3918 = vmatpush3.bf16.msra.mxu1 %v4175_v43 }
 0x58d   : > { %v1906_v26 = vmul.f32 0.3275911, %v1904_v46  ;;  %v1903_v28 = vmul.f32 0.70710677, %v1897_v21  ;;  %v1932_v48 = vsub.f32 0.0, %v1904_v46  ;;  %3919 = vmatprep.subr.bf16.mxu1 %v4599_v0 }
 0x58f   : > { %v1908_v57 = vadd.f32 1.0, %v1906_v26  ;;  %v1905_v32 = vand.u32 2147483647, %v1903_v28  ;;  %v1934_v49 = vmul.f32 %v1932_v48, %v1904_v46  ;;  %vm1945_vm6 = vcmp.ge.f32.partialorder %v1903_v28, 0.0  ;;  %v4176_v28 = vld [vmem:[%s5511_s8 + $0x48] sm:$0xff]  }
 0x590   : > { %v1901_v46 = vmul.f32 0.5, %v1897_v21  ;;  %v4178_v21 = vld [vmem:[%s5511_s8 + $0x40] sm:$0xff]   ;;  %3920 = vmatpush3.bf16.msra.mxu1 %v4177_v41 }
 0x591   : > { %4201 = vrcp.f32 %v1908_v57  ;;  %v1907_v47 = vmul.f32 0.3275911, %v1905_v32  ;;  %v1933_v50 = vsub.f32 0.0, %v1905_v32  ;;  %v1936_v52 = vmul.f32 1.442695, %v1934_v49 }
 0x593   : > { %v1909_v51 = vadd.f32 1.0, %v1907_v47  ;;  %v1935_v38 = vmul.f32 %v1933_v50, %v1905_v32  ;;  %v3651_v47 = vld [vmem:[#allocation16] ss:$0 sm:$0xff] }
 0x595   : > { %4203 = vrcp.f32 %v1909_v51  ;;  %v1938_v58 = vmul.f32 1.442695, %v1935_v38 }
 0x596   : > { %4205 = vpow2.f32 %v1936_v52 }
 0x597   : > { %4207 = vpow2.f32 %v1938_v58 }
 0x59e   : > { %v4202_v27 = vpop.eup %4201 }
 0x59f   : > { %v1914_v3 = vmul.f32 1.0614054, %v4202_v27 }
 0x5a1   : > { %v1916_v53 = vadd.f32 -1.4531521, %v1914_v3 }
 0x5a2   : > { %v4204_v54 = vpop.eup %4203 }
 0x5a3   : > { %v1918_v55 = vmul.f32 %v4202_v27, %v1916_v53  ;;  %v1915_v4 = vmul.f32 1.0614054, %v4204_v54  ;;  %v4206_v13 = vpop.eup %4205  ;;  %v4179_v53 = vld [vmem:[%s5511_s8 + $0x58] sm:$0xff]  }
 0x5a4   : > { %v4208_v18 = vpop.eup %4207 }
 0x5a5   : > { %v1920_v34 = vadd.f32 1.4214138, %v1918_v55  ;;  %v1917_v59 = vadd.f32 -1.4531521, %v1915_v4 }
 0x5a7   : > { %v1922_v60 = vmul.f32 %v4202_v27, %v1920_v34  ;;  %v1919_v61 = vmul.f32 %v4204_v54, %v1917_v59  ;;  %v3661_v34 = vld [vmem:[#allocation2 + $0x3] ss:$0 sm:$0xff] }
 0x5a9   : > { %v1924_v63 = vadd.f32 -0.28449672, %v1922_v60  ;;  %v1921_v2 = vadd.f32 1.4214138, %v1919_v61 }
 0x5ab   : > { %v1926_v5 = vmul.f32 %v4202_v27, %v1924_v63  ;;  %v1923_v6 = vmul.f32 %v4204_v54, %v1921_v2 }
 0x5ad   : > { %v1928_v7 = vadd.f32 0.2548296, %v1926_v5  ;;  %v1925_v8 = vadd.f32 -0.28449672, %v1923_v6 }
 0x5af   : > { %v1930_v9 = vmul.f32 %v4202_v27, %v1928_v7  ;;  %v1927_v11 = vmul.f32 %v4204_v54, %v1925_v8  ;;  %v3675_v7 = vld [vmem:[#allocation2 + $0x4] ss:$0 sm:$0xff] }
 0x5b1   : > { %v1940_v14 = vmul.f32 %v4206_v13, %v1930_v9  ;;  %v1929_v15 = vadd.f32 0.2548296, %v1927_v11 }
 0x5b3   : > { %v1942_v16 = vsub.f32 1.0, %v1940_v14  ;;  %v1931_v17 = vmul.f32 %v4204_v54, %v1929_v15  ;;  %v4233_v14 = vld [vmem:[%s5512_s23] sm:$0xff] }
 0x5b4   : > { %v3689_v15 = vld [vmem:[#allocation2 + $0x5] ss:$0 sm:$0xff] }
 0x5b5   : > { %v1946_v29 = vsub.f32 0.0, %v1942_v16  ;;  %v1941_v30 = vmul.f32 %v4208_v18, %v1931_v17  ;;  %v4181_v18 = vld [vmem:[#allocation8 + $0x18] sm:$0xff]  }
 0x5b7   : > { %v1948_v31 = vsel %vm1944_vm5, %v1942_v16, %v1946_v29  ;;  %v1943_v33 = vsub.f32 1.0, %v1941_v30  ;;  %v4182_v29 = vld [vmem:[#allocation8 + $0x10] sm:$0xff]  }
 0x5b8   : > { %v1950_v37 = vadd.f32 1.0, %v1948_v31  ;;  %v3669_v31 = vld [vmem:[%s5442_s4 + $0xc] sm:$0x7] }
 0x5b9   : > { %v1947_v36 = vsub.f32 0.0, %v1943_v33 }
 0x5ba   : > { %v1952_v26 = vmul.f32 %v1950_v37, %v1900_v45 }
 0x5bb   : > { %v1949_v42 = vsel %vm1945_vm6, %v1943_v33, %v1947_v36  ;;  %v2272_v33 = vrot.slane %v3669_v31, %v5021_v39  ;;  %v2266_v36 = vrot.slane %v3669_v31, %v5024_v40 }
 0x5bc   : > { %v1951_v23 = vadd.f32 1.0, %v1949_v42 }
 0x5be   : > { %v1953_v57 = vmul.f32 %v1951_v23, %v1901_v46  ;;  %v2280_v46 = vrot.slane %v3669_v31, %v5031_v44  ;;  %v3698_v31 = vld [vmem:[#allocation5 + $0x5] ss:$0 sm:$0xff] }
 0x5c0   : > { %v1954_v32 = vpack.c.bf16 %v1953_v57, %v1952_v26 }
 0x5c2   : > { %3914 = vmatmul.mubr.msk.bf16.vlgmr.msra.gmra.mxu0 %vm1994_vm7, %v1954_v32 }
 0x5c3   : > { %3943 = vmatprep.mubr.msk.bf16.mxu0 %vm4600_vm0, %v4599_v0  ;;  %3940 = vmatpush3.bf16.msra.mxu0 %v4176_v28 }
 0x5c4   : > { %3941 = vmatprep.subr.bf16.mxu0 %v4599_v0 }
 0x5c7   : > { %3942 = vmatpush3.bf16.msra.mxu0 %v4178_v21 }
 0x5c8   : > { %3961 = vmatprep.subr.bf16.mxu0 %v4599_v0 }
 0x682   : > { %v2032_v51 = vpop.f32.mrf.mxu0 }
 0x683   : > { %v2033_v49 = vadd.f32 %v3651_v47, %v2032_v51 }
 0x684   : > { %v3915_v48 = vpop.f32.mrf.mxu0 }
 0x685   : > { %v5175_v52 = vadd.f32 %v2033_v49, %v5122_v62  ;;  %v4180_v62 = vld [vmem:[%s5511_s8 + $0x50] sm:$0xff]  }
 0x686   : > { %v2035_v50 = vpop.f32.mrf.mxu0  ;;  %v3683_v48 = vld [vmem:[%s5442_s4 + $0x10] sm:$0x7] }
 0x687   : > { %v2036_v27 = vadd.f32 %v3651_v47, %v2035_v50 }
 0x688   : > { %v3916_v3 = vpop.f32.mrf.mxu0 }
 0x689   : > { %v5178_v38 = vadd.f32 %v2036_v27, %v5127_v25  ;;  %v2516_v27 = vrot.slane %v3683_v48, %v5024_v40 }
 0x68b   : > { %v2041_v54 = vpack.c.bf16 %v5178_v38, %v5175_v52 }
 0x68d   : > { %3922 = vmatmul.mubr.msk.bf16.vlgmr.msra.gmra.mxu1 %vm750_vm1, %v2041_v54  ;;  %3944 = vmatmul.mubr.msk.bf16.vlgmr.msra.gmra.mxu0 %vm750_vm1, %v2041_v54 }
 0x68e   : > { %3962 = vmatpush3.bf16.msra.mxu0 %v4179_v53  ;;  %3965 = vmatprep.mubr.msk.bf16.mxu0 %vm4600_vm0, %v4599_v0  ;;  %v2522_v53 = vrot.slane %v3683_v48, %v5021_v39 }
 0x68f   : > { %3963 = vmatprep.subr.bf16.mxu0 %v4599_v0  ;;  %3929 = vmatprep.mubr.msk.f32.mxu1 %vm795_vm2, %v4936_v10 }
 0x692   : > { %3964 = vmatpush3.bf16.msra.mxu0 %v4180_v62 }
 0x693   : > { %3983 = vmatprep.subr.bf16.mxu0 %v4599_v0 }
 0x695   : > { %3966 = vmatmul.mubr.msk.bf16.vlgmr.msra.gmra.mxu0 %vm750_vm1, %v2041_v54 }
 0x696   : > { %3987 = vmatprep.mubr.msk.bf16.mxu0 %vm4600_vm0, %v4599_v0  ;;  %3984 = vmatpush3.bf16.msra.mxu0 %v4181_v18 }
 0x697   : > { %3985 = vmatprep.subr.bf16.mxu0 %v4599_v0 }
 0x69a   : > { %3986 = vmatpush3.bf16.msra.mxu0 %v4182_v29 }
 0x69b   : > { %3999 = vmatprep.subr.bf16.mxu0 %v4599_v0 }
 0x74d   : > { %v2104_v25 = vpop.f32.mrf.mxu1  ;;  %v2354_v55 = vpop.f32.mrf.mxu0 }
 0x74e   : > { %v5201_v10 = vadd.f32 %v3661_v34, %v2104_v25  ;;  %v5217_v13 = vadd.f32 %v3675_v7, %v2354_v55  ;;  %v3697_v55 = vld [vmem:[%s5442_s4 + $0x14] sm:$0x7] }
 0x74f   : > { %v3923_v4 = vpop.f32.mrf.mxu1  ;;  %v3945_v58 = vpop.f32.mrf.mxu0 }
 0x750   : > { %v2281_v51 = vmul.f32 %v2280_v46, %v5201_v10 }
 0x751   : > { %v2107_v59 = vpop.f32.mrf.mxu1  ;;  %v2357_v60 = vpop.f32.mrf.mxu0 }
 0x752   : > { %v5199_v61 = vadd.f32 %v3661_v34, %v2107_v59  ;;  %v5213_v9 = vadd.f32 %v3675_v7, %v2357_v60  ;;  %v2772_v34 = vrot.slane %v3697_v55, %v5021_v39  ;;  %v2766_v59 = vrot.slane %v3697_v55, %v5024_v40 }
 0x753   : > { %v3924_v63 = vpop.f32.mrf.mxu1  ;;  %v3946_v2 = vpop.f32.mrf.mxu0  ;;  %v2530_v60 = vrot.slane %v3683_v48, %v5031_v44  ;;  %v2802_v48 = vld [vmem:[#allocation7 + $0x120] sm:$0xff] }
 0x754   : > { %3925 = vmatprep.subr.mxu1 %v5199_v61  ;;  %v2282_v43 = vmul.f32 %v2280_v46, %v5199_v61 }
 0x755   : > { %3926 = vmatpush3.msra.mxu1 %v5199_v61  ;;  %v2604_v5 = vpop.f32.mrf.mxu0 }
 0x756   : > { %3927 = vmatprep.subr.mxu1 %v5201_v10  ;;  %v5239_v17 = vadd.f32 %v3689_v15, %v2604_v5 }
 0x757   : > { %3928 = vmatpush3.msra.mxu1 %v5201_v10  ;;  %v3967_v6 = vpop.f32.mrf.mxu0 }
 0x758   : > { %3930 = vmatmul.mubr.msk.f32.vlgmr.msra.gmra.mxu1 %vm795_vm2, %v4949_v19  ;;  %3932 = vmatprep.subr.mxu1 %v5199_v61  ;;  %v2532_v6 = vmul.f32 %v2530_v60, %v5213_v9 }
 0x759   : > { %3933 = vmatpush3.msra.mxu1 %v5199_v61  ;;  %v2607_v8 = vpop.f32.mrf.mxu0  ;;  %3936 = vmatprep.mubr.msk.f32.mxu1 %vm795_vm2, %v4955_v20 }
 0x75a   : > { %3934 = vmatprep.subr.mxu1 %v5201_v10  ;;  %v5235_v16 = vadd.f32 %v3689_v15, %v2607_v8 }
 0x75b   : > { %3935 = vmatpush3.msra.mxu1 %v5201_v10  ;;  %v3968_v11 = vpop.f32.mrf.mxu0  ;;  %v2780_v10 = vrot.slane %v3697_v55, %v5031_v44 }
 0x75c   : > { %3937 = vmatmul.mubr.msk.f32.vlgmr.msra.gmra.mxu1 %vm795_vm2, %v4967_v24  ;;  %3947 = vmatprep.subr.mxu1 %v5213_v9 }
 0x75d   : > { %3948 = vmatpush3.msra.mxu1 %v5213_v9  ;;  %3951 = vmatprep.mubr.msk.f32.mxu1 %vm795_vm2, %v4233_v14  ;;  %v2782_v15 = vmul.f32 %v2780_v10, %v5235_v16 }
 0x75e   : > { %3949 = vmatprep.subr.mxu1 %v5217_v13 }
 0x75f   : > { %3950 = vmatpush3.msra.mxu1 %v5217_v13 }
 0x760   : > { %3952 = vmatmul.mubr.msk.f32.vlgmr.msra.gmra.mxu1 %vm795_vm2, %v4949_v19  ;;  %3954 = vmatprep.subr.mxu1 %v5213_v9  ;;  %v4234_v19 = vld [vmem:[%s5512_s23 + $0x8] sm:$0xff] }
 0x761   : > { %3955 = vmatpush3.msra.mxu1 %v5213_v9  ;;  %3958 = vmatprep.mubr.msk.f32.mxu1 %vm795_vm2, %v4955_v20  ;;  %v4235_v20 = vld [vmem:[%s5512_s23 + $0x10] sm:$0xff] }
 0x762   : > { %3956 = vmatprep.subr.mxu1 %v5217_v13 }
 0x763   : > { %3957 = vmatpush3.msra.mxu1 %v5217_v13 }
 0x764   : > { %3959 = vmatmul.mubr.msk.f32.vlgmr.msra.gmra.mxu1 %vm795_vm2, %v4967_v24  ;;  %3969 = vmatprep.subr.mxu1 %v5235_v16  ;;  %v4236_v24 = vld [vmem:[%s5512_s23 + $0x18] sm:$0xff] }
 0x765   : > { %3970 = vmatpush3.msra.mxu1 %v5235_v16  ;;  %3973 = vmatprep.mubr.msk.f32.mxu1 %vm795_vm2, %v4233_v14  ;;  %v2531_v14 = vmul.f32 %v2530_v60, %v5217_v13  ;;  %v2806_v60 = vld [vmem:[#allocation7 + $0x140] sm:$0xff] }
 0x766   : > { %3971 = vmatprep.subr.mxu1 %v5239_v17 }
 0x767   : > { %3972 = vmatpush3.msra.mxu1 %v5239_v17 }
 0x768   : > { %3974 = vmatmul.mubr.msk.f32.vlgmr.msra.gmra.mxu1 %vm795_vm2, %v4234_v19  ;;  %3976 = vmatprep.subr.mxu1 %v5235_v16 }
 0x769   : > { %3977 = vmatpush3.msra.mxu1 %v5235_v16  ;;  %3980 = vmatprep.mubr.msk.f32.mxu1 %vm795_vm2, %v4235_v20 }
 0x76a   : > { %3978 = vmatprep.subr.mxu1 %v5239_v17 }
 0x76b   : > { %3979 = vmatpush3.msra.mxu1 %v5239_v17 }
 0x76c   : > { %3981 = vmatmul.mubr.msk.f32.vlgmr.msra.gmra.mxu1 %vm795_vm2, %v4236_v24  ;;  %3991 = vmatprep.subr.bf16.mxu1 %v4599_v0 }
 0x76d   : > { %3995 = vmatprep.mubr.msk.bf16.mxu1 %vm4600_vm0, %v4599_v0 }
 0x818   : > { %v3931_v30 = vpop.f32.mrf.mxu1 }
 0x819   : > { %v2274_v45 = vmul.f32 %v3931_v30, %v2272_v33  ;;  %v3684_v30 = vld [vmem:[#allocation5 + $0x4] ss:$0 sm:$0xff] }
 0x81a   : > { %v2177_v37 = vpop.f32.mrf.mxu1 }
 0x81b   : > { %v2273_v57 = vmul.f32 %v2272_v33, %v2177_v37 }
 0x81c   : > { %v3938_v42 = vpop.f32.mrf.mxu1 }
 0x81d   : > { %v2268_v23 = vmul.f32 %v3938_v42, %v2266_v36  ;;  %v2781_v42 = vmul.f32 %v2780_v10, %v5239_v17 }
 0x81e   : > { %v2252_v26 = vpop.f32.mrf.mxu1 }
 0x81f   : > { %v2276_v32 = vadd.f32 %v2274_v45, %v2268_v23  ;;  %v2267_v28 = vmul.f32 %v2266_v36, %v2252_v26 }
 0x820   : > { %v3953_v41 = vpop.f32.mrf.mxu1 }
 0x821   : > { %v5276_v21 = vadd.f32 %v2282_v43, %v2276_v32  ;;  %v2275_v47 = vadd.f32 %v2273_v57, %v2267_v28  ;;  %v2524_v4 = vmul.f32 %v3953_v41, %v2522_v53  ;;  %v2798_v57 = vld [vmem:[#allocation7 + $0x100] sm:$0xff]  ;;  %v2799_v32 = vld [vmem:[#allocation7 + $0x108] sm:$0xff]  ;;  %v2800_v43 = vld [vmem:[#allocation7 + $0x110] sm:$0xff] }
 0x822   : > { %v2427_v49 = vpop.f32.mrf.mxu1  ;;  %v2801_v28 = vld [vmem:[#allocation7 + $0x118] sm:$0xff] }
 0x823   : > { %v5282_v50 = vadd.f32 %v2281_v51, %v2275_v47  ;;  %v2523_v63 = vmul.f32 %v2522_v53, %v2427_v49  ;;  %v2803_v49 = vld [vmem:[#allocation7 + $0x128] sm:$0xff] }
 0x824   : > { %v3960_v3 = vpop.f32.mrf.mxu1 }
 0x825   : > { %v2518_v62 = vmul.f32 %v3960_v3, %v2516_v27 }
 0x826   : > { %v2502_v54 = vpop.f32.mrf.mxu1 }
 0x827   : > { %v2517_v58 = vmul.f32 %v2516_v27, %v2502_v54  ;;  %v2526_v2 = vadd.f32 %v2524_v4, %v2518_v62  ;;  %v2804_v62 = vld [vmem:[#allocation7 + $0x130] sm:$0xff] }
 0x828   : > { %v3975_v25 = vpop.f32.mrf.mxu1 }
 0x829   : > { %v2525_v7 = vadd.f32 %v2523_v63, %v2517_v58  ;;  %v2774_v8 = vmul.f32 %v3975_v25, %v2772_v34  ;;  %v2534_v20 = vadd.f32 %v2532_v6, %v2526_v2  ;;  %v2805_v25 = vld [vmem:[#allocation7 + $0x138] sm:$0xff] }
 0x82a   : > { %v2677_v61 = vpop.f32.mrf.mxu1 }
 0x82b   : > { %v2773_v24 = vmul.f32 %v2772_v34, %v2677_v61  ;;  %v2533_v33 = vadd.f32 %v2531_v14, %v2525_v7  ;;  %v2544_v9 = vadd.f32 %v3684_v30, %v2534_v20  ;;  %v2807_v61 = vld [vmem:[#allocation7 + $0x148] sm:$0xff]  ;;  %v2808_v7 = vld [vmem:[#allocation7 + $0x150] sm:$0xff] }
 0x82c   : > { %v3982_v5 = vpop.f32.mrf.mxu1 }
 0x82d   : > { %v2768_v11 = vmul.f32 %v3982_v5, %v2766_v59  ;;  %v2543_v23 = vadd.f32 %v3684_v30, %v2533_v33 }
 0x82e   : > { %v2752_v19 = vpop.f32.mrf.mxu1 }
 0x82f   : > { %v2776_v18 = vadd.f32 %v2774_v8, %v2768_v11  ;;  %v2767_v29 = vmul.f32 %v2766_v59, %v2752_v19  ;;  %v2809_v8 = vld [vmem:[#allocation7 + $0x158] sm:$0xff] }
 0x831   : > { %v2784_v36 = vadd.f32 %v2782_v15, %v2776_v18  ;;  %v2775_v37 = vadd.f32 %v2773_v24, %v2767_v29  ;;  %v2810_v24 = vld [vmem:[#allocation7 + $0x160] sm:$0xff]  ;;  %v2811_v18 = vld [vmem:[#allocation7 + $0x168] sm:$0xff] }
 0x833   : > { %v2794_v45 = vadd.f32 %v3698_v31, %v2784_v36  ;;  %v2783_v46 = vadd.f32 %v2781_v42, %v2775_v37  ;;  %v2812_v37 = vld [vmem:[#allocation7 + $0x170] sm:$0xff]  ;;  %v2813_v42 = vld [vmem:[#allocation7 + $0x178] sm:$0xff] }
 0x835   : > { %v5297_v26 = vmul.f32 %v2794_v45, %v2544_v9  ;;  %v2793_v13 = vadd.f32 %v3698_v31, %v2783_v46 }
 0x837   : > { %v5299_v16 = vmul.f32 %v2793_v13, %v2543_v23  ;;  %v2895_v9 = vrot.slane %v5297_v26, %v5024_v40 }
 0x839   : > { %v2833_v41 = vrot.slane %v5299_v16, %v5024_v40  ;;  %v2839_v47 = vrot.slane %v5299_v16, %v5021_v39  ;;  %v2847_v17 = vrot.slane %v5299_v16, %v5031_v44  ;;  %v2855_v51 = vrot.slane %v5299_v16, %v5062_v56 }
 0x83a   : > { %v2863_v55 = vrot.slane %v5299_v16, %v5073_v1  ;;  %v2871_v63 = vrot.slane %v5299_v16, %v5078_v12  ;;  %v2879_v11 = vrot.slane %v5299_v16, %v5083_v22  ;;  %v2887_v29 = vrot.slane %v5299_v16, %v5088_v35 }
 0x83b   : > { %v2834_v27 = vmul.f32 %v2833_v41, %v2798_v57  ;;  %v2835_v3 = vmul.f32 %v2833_v41, %v2799_v32  ;;  %v2840_v53 = vmul.f32 %v2839_v47, %v2800_v43  ;;  %v2841_v54 = vmul.f32 %v2839_v47, %v2801_v28  ;;  %v2814_v57 = vld [vmem:[#allocation7 + $0x180] sm:$0xff]  ;;  %v2815_v32 = vld [vmem:[#allocation7 + $0x188] sm:$0xff] }
 0x83c   : > { %v2848_v34 = vmul.f32 %v2847_v17, %v2802_v48  ;;  %v2849_v59 = vmul.f32 %v2847_v17, %v2803_v49  ;;  %v2856_v5 = vmul.f32 %v2855_v51, %v2804_v62  ;;  %v2857_v6 = vmul.f32 %v2855_v51, %v2805_v25  ;;  %v2816_v51 = vld [vmem:[#allocation7 + $0x190] sm:$0xff]  ;;  %v2817_v48 = vld [vmem:[#allocation7 + $0x198] sm:$0xff]  ;;  %v2819_v62 = vld [vmem:[#allocation7 + $0x1a8] sm:$0xff] }
 0x83d   : > { %v2842_v4 = vadd.f32 %v2840_v53, %v2834_v27  ;;  %v2843_v58 = vadd.f32 %v2841_v54, %v2835_v3  ;;  %v2864_v19 = vmul.f32 %v2863_v55, %v2806_v60  ;;  %v2865_v20 = vmul.f32 %v2863_v55, %v2807_v61  ;;  %v2818_v54 = vld [vmem:[#allocation7 + $0x1a0] sm:$0xff] }
 0x83e   : > { %v2872_v33 = vmul.f32 %v2871_v63, %v2808_v7  ;;  %v2873_v36 = vmul.f32 %v2871_v63, %v2809_v8  ;;  %v2880_v23 = vmul.f32 %v2879_v11, %v2810_v24  ;;  %v2881_v13 = vmul.f32 %v2879_v11, %v2811_v18  ;;  %v2824_v7 = vld [vmem:[#allocation7 + $0x1d0] sm:$0xff] }
 0x83f   : > { %v2850_v2 = vadd.f32 %v2848_v34, %v2842_v4  ;;  %v2851_v10 = vadd.f32 %v2849_v59, %v2843_v58  ;;  %v2903_v43 = vrot.slane %v5297_v26, %v5021_v39  ;;  %v2888_v47 = vmul.f32 %v2887_v29, %v2812_v37  ;;  %v2820_v34 = vld [vmem:[#allocation7 + $0x1b0] sm:$0xff]  ;;  %v2821_v59 = vld [vmem:[#allocation7 + $0x1b8] sm:$0xff] }
 0x840   : > { %v2889_v17 = vmul.f32 %v2887_v29, %v2813_v42  ;;  %v2911_v49 = vrot.slane %v5297_v26, %v5031_v44  ;;  %v2896_v3 = vmul.f32 %v2895_v9, %v2814_v57  ;;  %v2897_v53 = vmul.f32 %v2895_v9, %v2815_v32  ;;  %v2826_v29 = vld [vmem:[#allocation7 + $0x1e0] sm:$0xff]  ;;  %v2828_v42 = vld [vmem:[#allocation7 + $0x1f0] sm:$0xff]  ;;  %v2829_v9 = vld [vmem:[#allocation7 + $0x1f8] sm:$0xff] }
 0x841   : > { %v2858_v14 = vadd.f32 %v2856_v5, %v2850_v2  ;;  %v2859_v15 = vadd.f32 %v2857_v6, %v2851_v10  ;;  %v2919_v25 = vrot.slane %v5297_v26, %v5062_v56  ;;  %v2904_v4 = vmul.f32 %v2903_v43, %v2816_v51  ;;  %v2822_v10 = vld [vmem:[#allocation7 + $0x1c0] sm:$0xff]  ;;  %v2823_v5 = vld [vmem:[#allocation7 + $0x1c8] sm:$0xff] }
 0x842   : > { %v2905_v58 = vmul.f32 %v2903_v43, %v2817_v48  ;;  %v2927_v60 = vrot.slane %v5297_v26, %v5073_v1  ;;  %v2912_v63 = vmul.f32 %v2911_v49, %v2818_v54  ;;  %v2913_v2 = vmul.f32 %v2911_v49, %v2819_v62 }
 0x843   : > { %v2866_v30 = vadd.f32 %v2864_v19, %v2858_v14  ;;  %v2867_v31 = vadd.f32 %v2865_v20, %v2859_v15  ;;  %v2935_v6 = vrot.slane %v5297_v26, %v5078_v12  ;;  %v2920_v11 = vmul.f32 %v2919_v25, %v2820_v34  ;;  %v2825_v15 = vld [vmem:[#allocation7 + $0x1d8] sm:$0xff] }
 0x844   : > { %v2921_v14 = vmul.f32 %v2919_v25, %v2821_v59  ;;  %v2943_v19 = vrot.slane %v5297_v26, %v5083_v22  ;;  %v2928_v24 = vmul.f32 %v2927_v60, %v2822_v10  ;;  %v2929_v18 = vmul.f32 %v2927_v60, %v2823_v5  ;;  %v3700_v22 = vld [vmem:[%s5445_s7 + $0x1] ss:$0 sm:$0xff] }
 0x845   : > { %v2874_v45 = vadd.f32 %v2872_v33, %v2866_v30  ;;  %v2875_v46 = vadd.f32 %v2873_v36, %v2867_v31  ;;  %v2827_v30 = vld [vmem:[#allocation7 + $0x1e8] sm:$0xff]  ;;  %v2936_v31 = vmul.f32 %v2935_v6, %v2824_v7  ;;  %v2937_v37 = vmul.f32 %v2935_v6, %v2825_v15 }
 0x846   : > { %v2951_v12 = vrot.slane %v5297_v26, %v5088_v35  ;;  %v2965_v35 = vmul.f32 %v3700_v22, %v5297_v26 }
 0x847   : > { %v2882_v28 = vadd.f32 %v2880_v23, %v2874_v45  ;;  %v2883_v41 = vadd.f32 %v2881_v13, %v2875_v46  ;;  %v2944_v23 = vmul.f32 %v2943_v19, %v2826_v29  ;;  %v2945_v13 = vmul.f32 %v2943_v19, %v2827_v30 }
 0x848   : > { %v2952_v43 = vmul.f32 %v2951_v12, %v2828_v42 }
 0x849   : > { %v2890_v27 = vadd.f32 %v2888_v47, %v2882_v28  ;;  %v2891_v40 = vadd.f32 %v2889_v17, %v2883_v41  ;;  %v2953_v28 = vmul.f32 %v2951_v12, %v2829_v9  ;;  %v2964_v17 = vmul.f32 %v3700_v22, %v5299_v16  ;;  %v3670_v9 = vld [vmem:[#allocation5 + $0x3] ss:$0 sm:$0xff] }
 0x84b   : > { %v2898_v55 = vadd.f32 %v2896_v3, %v2890_v27  ;;  %v2899_v39 = vadd.f32 %v2897_v53, %v2891_v40 }
 0x84d   : > { %v2906_v61 = vadd.f32 %v2904_v4, %v2898_v55  ;;  %v2907_v44 = vadd.f32 %v2905_v58, %v2899_v39 }
 0x84f   : > { %v2914_v56 = vadd.f32 %v2912_v63, %v2906_v61  ;;  %v2915_v8 = vadd.f32 %v2913_v2, %v2907_v44 }
 0x851   : > { %v2922_v20 = vadd.f32 %v2920_v11, %v2914_v56  ;;  %v2923_v1 = vadd.f32 %v2921_v14, %v2915_v8 }
 0x853   : > { %v2930_v33 = vadd.f32 %v2928_v24, %v2922_v20  ;;  %v2931_v36 = vadd.f32 %v2929_v18, %v2923_v1 }
 0x855   : > { %v2938_v45 = vadd.f32 %v2936_v31, %v2930_v33  ;;  %v2939_v46 = vadd.f32 %v2937_v37, %v2931_v36 }
 0x857   : > { %v2946_v57 = vadd.f32 %v2944_v23, %v2938_v45  ;;  %v2947_v32 = vadd.f32 %v2945_v13, %v2939_v46 }
 0x859   : > { %v2954_v41 = vadd.f32 %v2952_v43, %v2946_v57  ;;  %v2955_v47 = vadd.f32 %v2953_v28, %v2947_v32  ;;  %v2293_v57 = vadd.f32 %v3670_v9, %v5282_v50  ;;  %v2294_v43 = vadd.f32 %v3670_v9, %v5276_v21 }
 0x85b   : > { %v2966_v51 = vadd.f32 %v2964_v17, %v2954_v41  ;;  %v2967_v48 = vadd.f32 %v2965_v35, %v2955_v47  ;;  %v3702_v35 = vld [vmem:[%s5447_s9 + $0x1] ss:$0 sm:$0xff] }
 0x85d   : > { %v2970_v49 = vmul.f32 0.70710677, %v2966_v51  ;;  %v2971_v27 = vmul.f32 0.70710677, %v2967_v48  ;;  %v2968_v45 = vmul.f32 0.5, %v2966_v51  ;;  %v2969_v13 = vmul.f32 0.5, %v2967_v48 }
 0x85f   : > { %v2972_v40 = vand.u32 2147483647, %v2970_v49  ;;  %v2973_v3 = vand.u32 2147483647, %v2971_v27  ;;  %vm3012_vm8 = vcmp.ge.f32.partialorder %v2970_v49, 0.0  ;;  %vm3013_vm9 = vcmp.ge.f32.partialorder %v2971_v27, 0.0 }
 0x861   : > { %v2974_v53 = vmul.f32 0.3275911, %v2972_v40  ;;  %v2975_v54 = vmul.f32 0.3275911, %v2973_v3  ;;  %v3000_v55 = vsub.f32 0.0, %v2972_v40  ;;  %v3001_v39 = vsub.f32 0.0, %v2973_v3 }
 0x863   : > { %v2976_v62 = vadd.f32 1.0, %v2974_v53  ;;  %v2977_v25 = vadd.f32 1.0, %v2975_v54  ;;  %v3002_v4 = vmul.f32 %v3000_v55, %v2972_v40  ;;  %v3003_v58 = vmul.f32 %v3001_v39, %v2973_v3 }
 0x865   : > { %4209 = vrcp.f32 %v2976_v62  ;;  %v3004_v26 = vmul.f32 1.442695, %v3002_v4  ;;  %v3006_v61 = vmul.f32 1.442695, %v3003_v58 }
 0x866   : > { %4211 = vrcp.f32 %v2977_v25 }
 0x867   : > { %4213 = vpow2.f32 %v3004_v26  ;;  %v4184_v26 = vld [vmem:[#allocation13 + $0x10] sm:$0xff]  }
 0x868   : > { %4215 = vpow2.f32 %v3006_v61 }
 0x872   : > { %v4210_v34 = vpop.eup %4209 }
 0x873   : > { %v4212_v16 = vpop.eup %4211  ;;  %v2982_v59 = vmul.f32 1.0614054, %v4210_v34 }
 0x874   : > { %v2983_v60 = vmul.f32 1.0614054, %v4212_v16  ;;  %v4214_v24 = vpop.eup %4213 }
 0x875   : > { %v2984_v44 = vadd.f32 -1.4531521, %v2982_v59  ;;  %v4216_v29 = vpop.eup %4215  ;;  %v4183_v59 = vld [vmem:[#allocation13 + $0x18] sm:$0xff]  }
 0x876   : > { %v2985_v63 = vadd.f32 -1.4531521, %v2983_v60  ;;  %3992 = vmatpush3.bf16.msra.mxu1 %v4183_v59 }
 0x877   : > { %v2986_v2 = vmul.f32 %v4210_v34, %v2984_v44  ;;  %3993 = vmatprep.subr.bf16.mxu1 %v4599_v0 }
 0x878   : > { %v2987_v10 = vmul.f32 %v4212_v16, %v2985_v63 }
 0x879   : > { %v2988_v5 = vadd.f32 1.4214138, %v2986_v2 }
 0x87a   : > { %v2989_v6 = vadd.f32 1.4214138, %v2987_v10  ;;  %3994 = vmatpush3.bf16.msra.mxu1 %v4184_v26 }
 0x87b   : > { %v2990_v7 = vmul.f32 %v4210_v34, %v2988_v5 }
 0x87c   : > { %v2991_v56 = vmul.f32 %v4212_v16, %v2989_v6 }
 0x87d   : > { %v2992_v8 = vadd.f32 -0.28449672, %v2990_v7  ;;  %v3706_v7 = vld [vmem:[#allocation10 + $0x1] ss:$0 sm:$0xff] }
 0x87e   : > { %v2993_v11 = vadd.f32 -0.28449672, %v2991_v56 }
 0x87f   : > { %v2994_v14 = vmul.f32 %v4210_v34, %v2992_v8 }
 0x880   : > { %v2995_v15 = vmul.f32 %v4212_v16, %v2993_v11 }
 0x881   : > { %v2996_v19 = vadd.f32 0.2548296, %v2994_v14  ;;  %v3707_v14 = vld [vmem:[#allocation11 + $0x1] ss:$0 sm:$0xff] }
 0x882   : > { %v2997_v20 = vadd.f32 0.2548296, %v2995_v15 }
 0x883   : > { %v2998_v1 = vmul.f32 %v4210_v34, %v2996_v19 }
 0x884   : > { %v2999_v18 = vmul.f32 %v4212_v16, %v2997_v20 }
 0x885   : > { %v3008_v30 = vmul.f32 %v4214_v24, %v2998_v1  ;;  %v4185_v24 = vld [vmem:[%s5452_s14 + $0x38] sm:$0xff]  }
 0x886   : > { %v3009_v31 = vmul.f32 %v4216_v29, %v2999_v18  ;;  %v4186_v18 = vld [vmem:[%s5452_s14 + $0x30] sm:$0xff]   ;;  %v4187_v29 = vld [vmem:[%s5452_s14 + $0x28] sm:$0xff]  }
 0x887   : > { %v3010_v33 = vsub.f32 1.0, %v3008_v30  ;;  %v4188_v30 = vld [vmem:[%s5452_s14 + $0x20] sm:$0xff]  }
 0x888   : > { %v3011_v36 = vsub.f32 1.0, %v3009_v31  ;;  %v3708_v31 = vld [vmem:[#allocation14 + $0x1] ss:$0 sm:$0xff] }
 0x889   : > { %v3014_v37 = vsub.f32 0.0, %v3010_v33 }
 0x88a   : > { %v3015_v12 = vsub.f32 0.0, %v3011_v36 }
 0x88b   : > { %v3016_v42 = vsel %vm3012_vm8, %v3010_v33, %v3014_v37 }
 0x88c   : > { %v3017_v46 = vsel %vm3013_vm9, %v3011_v36, %v3015_v12  ;;  %v3018_v23 = vadd.f32 1.0, %v3016_v42 }
 0x88d   : > { %v3019_v22 = vadd.f32 1.0, %v3017_v46 }
 0x88e   : > { %v3020_v32 = vmul.f32 %v3018_v23, %v2968_v45 }
 0x88f   : > { %v3021_v28 = vmul.f32 %v3019_v22, %v2969_v13 }
 0x890   : > { %v3022_v41 = vmul.f32 %v3020_v32, %v2293_v57 }
 0x891   : > { %v3023_v47 = vmul.f32 %v3021_v28, %v2294_v43 }
 0x893   : > { %v3024_v17 = vpack.c.bf16 %v3023_v47, %v3022_v41 }
 0x895   : > { %3988 = vmatmul.mubr.msk.bf16.vlgmr.msra.gmra.mxu0 %vm750_vm1, %v3024_v17 }
 0x896   : > { %4007 = vmatprep.mubr.msk.bf16.mxu0 %vm4600_vm0, %v4599_v0  ;;  %4000 = vmatpush3.bf16.msra.mxu0 %v4185_v24  ;;  %v3720_v24 = vld [vmem:[#allocation16 + $0x1] ss:$0 sm:$0xff] }
 0x897   : > { %4001 = vmatprep.subr.bf16.mxu0 %v4599_v0 }
 0x89a   : > { %4002 = vmatpush3.bf16.msra.mxu0 %v4186_v18 }
 0x89b   : > { %4003 = vmatprep.subr.bf16.mxu0 %v4599_v0 }
 0x89e   : > { %4004 = vmatpush3.bf16.msra.mxu0 %v4187_v29 }
 0x89f   : > { %4005 = vmatprep.subr.bf16.mxu0 %v4599_v0 }
 0x8a2   : > { %4006 = vmatpush3.bf16.msra.mxu0 %v4188_v30 }
 0x955   : > { %v3087_v51 = vpop.f32.mrf.mxu0 }
 0x956   : > { %v3088_v48 = vadd.f32 %v3702_v35, %v3087_v51 }
 0x957   : > { %v3989_v49 = vpop.f32.mrf.mxu0 }
 0x958   : > { %v5347_v50 = vadd.f32 %v3088_v48, %v5175_v52 }
 0x959   : > { %v3090_v21 = vpop.f32.mrf.mxu0 }
 0x95a   : > { %v3091_v27 = vadd.f32 %v3702_v35, %v3090_v21  ;;  %v3100_v40 = vsel %vm750_vm1, %v5347_v50, 0.0 }
 0x95b   : > { %3101 = vadd.xlane.f32.xlu0 %v3100_v40  ;;  %v3990_v3 = vpop.f32.mrf.mxu0 }
 0x95c   : > { %v5352_v53 = vadd.f32 %v3091_v27, %v5178_v38 }
 0x95e   : > { %v3103_v54 = vsel %vm750_vm1, %v5352_v53, 0.0 }
 0x95f   : > { %3104 = vadd.xlane.f32.xlu1 %v3103_v54 }
 0x9e4   : > { %v3102_v62 = vpop.xlane.xlu0 %3101 }
 0x9e5   : > { %v3106_v25 = vmul.f32 0.03125, %v3102_v62 }
 0x9e7   : > { %v3108_v55 = vsub.f32 %v5347_v50, %v3106_v25 }
 0x9e8   : > { %v3105_v52 = vpop.xlane.xlu1 %3104 }
 0x9e9   : > { %v3107_v39 = vmul.f32 0.03125, %v3105_v52  ;;  %v3110_v4 = vmul.f32 %v3108_v55, %v3108_v55 }
 0x9eb   : > { %v3109_v58 = vsub.f32 %v5352_v53, %v3107_v39  ;;  %v3112_v34 = vsel %vm750_vm1, %v3110_v4, 0.0 }
 0x9ec   : > { %3113 = vadd.xlane.f32.xlu0 %v3112_v34 }
 0x9ed   : > { %v3111_v16 = vmul.f32 %v3109_v58, %v3109_v58 }
 0x9ef   : > { %v3115_v38 = vsel %vm750_vm1, %v3111_v16, 0.0 }
 0x9f0   : > { %3116 = vadd.xlane.f32.xlu1 %v3115_v38 }
 0xa75   : > { %v3114_v60 = vpop.xlane.xlu0 %3113 }
 0xa76   : > { %v3118_v61 = vmul.f32 0.03125, %v3114_v60 }
 0xa78   : > { %v3120_v44 = vadd.f32 1e-05, %v3118_v61 }
 0xa79   : > { %v3117_v63 = vpop.xlane.xlu1 %3116 }
 0xa7a   : > { %4217 = vrsqrt.f32 %v3120_v44  ;;  %v3119_v2 = vmul.f32 0.03125, %v3117_v63 }
 0xa7c   : > { %v3121_v10 = vadd.f32 1e-05, %v3119_v2 }
 0xa7e   : > { %4219 = vrsqrt.f32 %v3121_v10 }
 0xa87   : > { %v4218_v5 = vpop.eup %4217 }
 0xa88   : > { %v3124_v6 = vmul.f32 %v4218_v5, %v3108_v55 }
 0xa8a   : > { %v3132_v11 = vmul.f32 %v3706_v7, %v3124_v6 }
 0xa8b   : > { %v4220_v56 = vpop.eup %4219 }
 0xa8c   : > { %v3125_v8 = vmul.f32 %v4220_v56, %v3109_v58  ;;  %v3140_v19 = vadd.f32 %v3707_v14, %v3132_v11 }
 0xa8e   : > { %v3133_v15 = vmul.f32 %v3706_v7, %v3125_v8 }
 0xa90   : > { %v3141_v20 = vadd.f32 %v3707_v14, %v3133_v15 }
 0xa92   : > { %v3142_v1 = vpack.c.bf16 %v3141_v20, %v3140_v19 }
 0xa94   : > { %3996 = vmatmul.mubr.msk.bf16.vlgmr.msra.gmra.mxu1 %vm750_vm1, %v3142_v1 }
 0xb54   : > { %v3205_v33 = vpop.f32.mrf.mxu1 }
 0xb55   : > { %v3206_v36 = vadd.f32 %v3708_v31, %v3205_v33 }
 0xb56   : > { %v3997_v37 = vpop.f32.mrf.mxu1 }
 0xb57   : > { %v3214_v12 = vmul.f32 0.70710677, %v3206_v36  ;;  %v3212_v11 = vmul.f32 0.5, %v3206_v36 }
 0xb58   : > { %v3208_v42 = vpop.f32.mrf.mxu1 }
 0xb59   : > { %v3216_v9 = vand.u32 2147483647, %v3214_v12  ;;  %v3209_v45 = vadd.f32 %v3708_v31, %v3208_v42  ;;  %vm3256_vm10 = vcmp.ge.f32.partialorder %v3214_v12, 0.0 }
 0xb5a   : > { %v3998_v46 = vpop.f32.mrf.mxu1 }
 0xb5b   : > { %v3218_v23 = vmul.f32 0.3275911, %v3216_v9  ;;  %v3215_v13 = vmul.f32 0.70710677, %v3209_v45  ;;  %v3244_v28 = vsub.f32 0.0, %v3216_v9  ;;  %v3213_v14 = vmul.f32 0.5, %v3209_v45 }
 0xb5d   : > { %v3220_v22 = vadd.f32 1.0, %v3218_v23  ;;  %v3217_v57 = vand.u32 2147483647, %v3215_v13  ;;  %v3246_v0 = vmul.f32 %v3244_v28, %v3216_v9  ;;  %vm3257_vm11 = vcmp.ge.f32.partialorder %v3215_v13, 0.0 }
 0xb5f   : > { %4221 = vrcp.f32 %v3220_v22  ;;  %v3219_v32 = vmul.f32 0.3275911, %v3217_v57  ;;  %v3245_v41 = vsub.f32 0.0, %v3217_v57  ;;  %v3248_v35 = vmul.f32 1.442695, %v3246_v0 }
 0xb61   : > { %v3221_v43 = vadd.f32 1.0, %v3219_v32  ;;  %v3247_v51 = vmul.f32 %v3245_v41, %v3217_v57 }
 0xb63   : > { %4223 = vrcp.f32 %v3221_v43  ;;  %v3250_v40 = vmul.f32 1.442695, %v3247_v51 }
 0xb64   : > { %4225 = vpow2.f32 %v3248_v35 }
 0xb65   : > { %4227 = vpow2.f32 %v3250_v40 }
 0xb6c   : > { %v4222_v47 = vpop.eup %4221 }
 0xb6d   : > { %v3226_v17 = vmul.f32 1.0614054, %v4222_v47 }
 0xb6f   : > { %v3228_v48 = vadd.f32 -1.4531521, %v3226_v17 }
 0xb70   : > { %v4224_v49 = vpop.eup %4223 }
 0xb71   : > { %v3230_v21 = vmul.f32 %v4222_v47, %v3228_v48  ;;  %v3227_v27 = vmul.f32 1.0614054, %v4224_v49  ;;  %v4226_v59 = vpop.eup %4225  ;;  %v3726_v48 = vld [vmem:[%s5454_s16] ss:$0 sm:$0xff] }
 0xb72   : > { %v4228_v63 = vpop.eup %4227 }
 0xb73   : > { %v3232_v3 = vadd.f32 1.4214138, %v3230_v21  ;;  %v3229_v54 = vadd.f32 -1.4531521, %v3227_v27  ;;  %v3727_v21 = vld [vmem:[#allocation17] ss:$0 sm:$0xff] }
 0xb75   : > { %v3234_v62 = vmul.f32 %v4222_v47, %v3232_v3  ;;  %v3231_v25 = vmul.f32 %v4224_v49, %v3229_v54 }
 0xb77   : > { %v3236_v55 = vadd.f32 -0.28449672, %v3234_v62  ;;  %v3233_v52 = vadd.f32 1.4214138, %v3231_v25 }
 0xb79   : > { %v3238_v39 = vmul.f32 %v4222_v47, %v3236_v55  ;;  %v3235_v4 = vmul.f32 %v4224_v49, %v3233_v52 }
 0xb7b   : > { %v3240_v58 = vadd.f32 0.2548296, %v3238_v39  ;;  %v3237_v34 = vadd.f32 -0.28449672, %v3235_v4 }
 0xb7d   : > { %v3242_v16 = vmul.f32 %v4222_v47, %v3240_v58  ;;  %v3239_v38 = vmul.f32 %v4224_v49, %v3237_v34 }
 0xb7f   : > { %v3252_v26 = vmul.f32 %v4226_v59, %v3242_v16  ;;  %v3241_v60 = vadd.f32 0.2548296, %v3239_v38 }
 0xb81   : > { %v3254_v61 = vsub.f32 1.0, %v3252_v26  ;;  %v3243_v44 = vmul.f32 %v4224_v49, %v3241_v60 }
 0xb83   : > { %v3258_v2 = vsub.f32 0.0, %v3254_v61  ;;  %v3253_v10 = vmul.f32 %v4228_v63, %v3243_v44 }
 0xb85   : > { %v3260_v5 = vsel %vm3256_vm10, %v3254_v61, %v3258_v2  ;;  %v3255_v6 = vsub.f32 1.0, %v3253_v10 }
 0xb86   : > { %v3262_v56 = vadd.f32 1.0, %v3260_v5 }
 0xb87   : > { %v3259_v7 = vsub.f32 0.0, %v3255_v6 }
 0xb88   : > { %v3264_v19 = vmul.f32 %v3262_v56, %v3212_v11 }
 0xb89   : > { %v3261_v8 = vsel %vm3257_vm11, %v3255_v6, %v3259_v7 }
 0xb8a   : > { %v3263_v15 = vadd.f32 1.0, %v3261_v8 }
 0xb8c   : > { %v3265_v20 = vmul.f32 %v3263_v15, %v3213_v14 }
 0xb8e   : > { %v3266_v1 = vpack.c.bf16 %v3265_v20, %v3264_v19 }
 0xb90   : > { %4008 = vmatmul.mubr.msk.bf16.vlgmr.msra.gmra.mxu0 %vm1994_vm7, %v3266_v1 }
 0xc50   : > { %v3345_v18 = vpop.f32.mrf.mxu0 }
 0xc51   : > { %v3346_v29 = vadd.f32 %v3720_v24, %v3345_v18 }
 0xc52   : > { %v4009_v30 = vpop.f32.mrf.mxu0 }
 0xc53   : > { %v3352_v31 = vadd.f32 %v3346_v29, %v5347_v50 }
 0xc54   : > { %v3348_v33 = vpop.f32.mrf.mxu0 }
 0xc55   : > { %v3349_v37 = vadd.f32 %v3720_v24, %v3348_v33  ;;  %v3356_v12 = vsel %vm750_vm1, %v3352_v31, 0.0 }
 0xc56   : > { %3357 = vadd.xlane.f32.xlu0 %v3356_v12  ;;  %v4010_v42 = vpop.f32.mrf.mxu0 }
 0xc57   : > { %v3353_v36 = vadd.f32 %v3349_v37, %v5352_v53 }
 0xc59   : > { %v3359_v9 = vsel %vm750_vm1, %v3353_v36, 0.0 }
 0xc5a   : > { %3360 = vadd.xlane.f32.xlu1 %v3359_v9 }
 0xcdf   : > { %v3358_v45 = vpop.xlane.xlu0 %3357 }
 0xce0   : > { %v3362_v46 = vmul.f32 0.03125, %v3358_v45 }
 0xce2   : > { %v3364_v23 = vsub.f32 %v3352_v31, %v3362_v46 }
 0xce3   : > { %v3361_v13 = vpop.xlane.xlu1 %3360 }
 0xce4   : > { %v3363_v22 = vmul.f32 0.03125, %v3361_v13  ;;  %v3366_v57 = vmul.f32 %v3364_v23, %v3364_v23 }
 0xce6   : > { %v3365_v32 = vsub.f32 %v3353_v36, %v3363_v22  ;;  %v3368_v50 = vsel %vm750_vm1, %v3366_v57, 0.0 }
 0xce7   : > { %3369 = vadd.xlane.f32.xlu0 %v3368_v50 }
 0xce8   : > { %v3367_v43 = vmul.f32 %v3365_v32, %v3365_v32 }
 0xcea   : > { %v3371_v28 = vsel %vm750_vm1, %v3367_v43, 0.0 }
 0xceb   : > { %3372 = vadd.xlane.f32.xlu1 %v3371_v28 }
 0xd70   : > { %v3370_v0 = vpop.xlane.xlu0 %3369 }
 0xd71   : > { %v3374_v53 = vmul.f32 0.03125, %v3370_v0 }
 0xd73   : > { %v3376_v41 = vadd.f32 1e-05, %v3374_v53 }
 0xd74   : > { %v3373_v47 = vpop.xlane.xlu1 %3372 }
 0xd75   : > { %4229 = vrsqrt.f32 %v3376_v41  ;;  %v3375_v17 = vmul.f32 0.03125, %v3373_v47 }
 0xd77   : > { %v3377_v35 = vadd.f32 1e-05, %v3375_v17 }
 0xd79   : > { %4231 = vrsqrt.f32 %v3377_v35 }
 0xd82   : > { %v4230_v51 = vpop.eup %4229 }
 0xd83   : > { %v3380_v49 = vmul.f32 %v4230_v51, %v3364_v23 }
 0xd85   : > { %v3388_v27 = vmul.f32 %v3726_v48, %v3380_v49 }
 0xd86   : > { %v4232_v40 = vpop.eup %4231 }
 0xd87   : > { %v3396_v3 = vadd.f32 %v3727_v21, %v3388_v27  ;;  %v3381_v54 = vmul.f32 %v4232_v40, %v3365_v32 }
 0xd89   : > { %v3389_v62 = vmul.f32 %v3726_v48, %v3381_v54  ;;  %3398 = vst.msk [vmem:[%s712_s19] sm:$0xff] %vm750_vm1, %v3396_v3 }
 0xd8b   : > { %v3397_v25 = vadd.f32 %v3727_v21, %v3389_v62 }
 0xd8d   : > { %3399 = vst.msk [vmem:[%s712_s19 + $0x8] sm:$0xff] %vm750_vm1, %v3397_v25 }
 0xd8e   : > { %4510 = shalt.err (!%p4507_p10)
}
 0xd8f   : > { %s4511_s25 = scalar_lea.hbm %s5393_s29, 256  ;;  %s4515_s22 = scalar_lea.hbm %s5456_s18, 512 }
 0xd90   : > { %p4512_p11 = scmp.ne.s32.totalorder %s5393_s29, %s4511_s25  ;;  %p4516_p0 = scmp.lt.s32.totalorder %s5393_s29, %s5456_s18 }
 0xd91   : > { %p4517_p6 = scmp.lt.s32.totalorder %s4515_s22, %s4511_s25 }
 0xd92   : > { %p4513_p8 = pnand %p4512_p11, %p4737_p5 }
 0xd93   : > { %p4518_p9 = por %p4517_p6, %p4516_p0 }
 0xd94   : > { %p4514_p1 = pneg %p4513_p8 }
 0xd96   : > { %p4519_p2 = pnand %p4518_p9, %p4514_p1 }
 0xd98   : > { %4522 = shalt.err (!%p4519_p2)
}
 0xd99   : > { %s4602_s21 = smov 128   ;;  %s4603_s5 = smov 8  }
 0xd9a   : > { %4051 = dma.vmem_to_hbm [thread:$0]  (%p4737_p5), %s5395_s1, 256, %s5393_s29, %s5398_s30, %s4602_s21, %s4602_s21, %s4603_s5  }
 0xd9b PF: > { %s5513_s0 = sld [smem:[#allocation29_spill]] }
 0xd9c   : > { %s5514_s3 = sld [smem:[#allocation27_spill]] }
 0xd9d   : > { %s5515_s27 = sld [smem:[#allocation32_spill]] }
 0xda1   : > { %p4108_p13 = scmp.ge.s32.totalorder %s5513_s0, 2 }
 0xda2   : > { %s3429_s11 = sand.u32 1, %s5514_s3  }
 0xda3   : > { %p5516_p3 = scmp.ne.s32.totalorder %s5515_s27, 0  ;;  %s3430_s25 = scalar_lea.sflag [#allocation4], %s3429_s11 }
 0xda5   : > { %p4085_p4 = pnand %p4108_p13, %p5516_p3 }
 0xda7   : > { %p4086_p7 = pneg %p4085_p4 }
 0xda9   : > { %4564 = dma.done.wait (%p4086_p7), %s3430_s25, 256  }
 0xdaa   : > { %4566 = vsyncadd (%p4086_p7), %s3430_s25, 4294967040  ;;  %s5517_s30 = sld [smem:[#allocation30_spill]]  ;;  %s5520_s27 = smov %s4573_s28 }
 0xdab   : > { %s5518_s26 = sld [smem:[#allocation28_spill]] }
 0xdac   : > { %s5519_s29 = sld [smem:[#allocation31_spill]] }
 0xdb0   : > { %p34_p12 = scmp.ge.s32.totalorder %s5517_s30, 4  }
 0xdb1   : > { %s5521_s28 = smov %s5518_s26 }
 0xdb2   :  { %36 = sbr.rel (!%p34_p12) target bundleno = 17 (0x11), region = 199 }
 0xdb7   :  { %3435 = vsyncpa [#allocation3], 1 }
 0xdb8   :  { %3437 = vsyncpa [#allocation3 + $0x1], 1 }
 0xdb9   :  { %3438 = vsyncpa [#allocation6], 1 }
 0xdba   :  { %3439 = vsyncpa [#allocation9], 1 }
 0xdbb   :  { %3440 = vsyncpa [#allocation12], 1 }
 0xdbc   :  { %3441 = vsyncpa [#allocation15], 1 }
 0xdbd   :  { %3442 = vsyncpa [#allocation18], 1 }
 0xdbe   :  { %3443 = vsyncpa [#allocation4], 1 }
 0xdbf   :  { %3445 = vsyncpa [#allocation4 + $0x1], 1 }

</bundles_post_ra>
